<compile_context>
chip_gen: v7x
topology: tpu7x:2x2x1
jax: 0.10.0
libtpu: 0.0.40
codegen_flags: <defaults>
</compile_context>

<pallas_src>
import numpy as np
import jax
import jax.numpy as jnp
from jax.experimental import pallas as pl
from jax.experimental.pallas import tpu as pltpu  # noqa: F401  (TPU backend assumed)


# ----------------------------------------------------------------------------
# DCT matrices (same as util.get_dct_matrix in the reference repo)
# ----------------------------------------------------------------------------
def get_dct_matrix(N):
    dct_m = np.eye(N)
    for k in np.arange(N):
        for i in np.arange(N):
            w = np.sqrt(2 / N)
            if k == 0:
                w = np.sqrt(1 / N)
            dct_m[k, i] = w * np.cos(np.pi * (i + 1 / 2) * k / N)
    idct_m = np.linalg.inv(dct_m)
    return dct_m, idct_m


# ----------------------------------------------------------------------------
# Single fused Pallas kernel: conv stacks + attention + value DCT + GCN + iDCT
# ----------------------------------------------------------------------------
def _build_fused_kernel(bs, feat, input_n, output_n, kernel_size, dct_n,
                        d_model, num_stage):
    vl = kernel_size + output_n                 # DCT window length (35)
    vn = input_n - kernel_size - output_n + 1   # number of value windows == key length (16)
    t_key = input_n - output_n                  # convK input length (25)
    k1, k2 = 6, 5                               # conv kernel sizes
    assert t_key - (k1 - 1) - (k2 - 1) == vn
    bn_scale = float(1.0 / np.sqrt(1.0 + 1e-5))  # eval-mode BatchNorm, fresh running stats
    f32 = jnp.float32

    def conv_relu(x, w_ref, k):
        # x: [L, Cin] (time-major); w_ref: [k, Cin, Cout].
        # Valid Conv1d (no bias) as a sum of k shifted matmuls; ReLU fused.
        l_out = x.shape[0] - k + 1
        acc = jnp.dot(x[0:l_out, :], w_ref[0], preferred_element_type=f32)
        for kk in range(1, k):
            acc = acc + jnp.dot(x[kk:kk + l_out, :], w_ref[kk],
                                preferred_element_type=f32)
        return jnp.maximum(acc, 0.0)

    def gc_layer(x, w, a, b):
        # GraphConvolution: att @ (x @ w) + bias
        sup = jnp.dot(x, w, preferred_element_type=f32)
        return jnp.dot(a, sup, preferred_element_type=f32) + b

    def kernel(src_ref, kw1_ref, kw2_ref, qw1_ref, qw2_ref,
               dct_ref, dctg_ref, idct_ref,
               g1w_ref, g1a_ref, g1b_ref,
               gbw_ref, gba_ref, gbb_ref,
               g7w_ref, g7a_ref, g7b_ref,
               o_ref):
        dct = dct_ref[...]       # [dct_n, vl]
        dct_g = dctg_ref[...]    # [dct_n, kernel_size] (repeat-last-frame folded in)
        idct = idct_ref[...]     # [vl, dct_n]
        g1w, g1a, g1b = g1w_ref[...], g1a_ref[...], g1b_ref[...]
        g7w, g7a, g7b = g7w_ref[...], g7a_ref[...], g7b_ref[...]

        for b in range(bs):                              # static unroll over the tiny batch
            src = src_ref[b]                             # [input_n, feat]

            # ---- convK / convQ stacks: Conv1d(k=6)+ReLU, Conv1d(k=5)+ReLU ----
            key_in = src[0:t_key, :] * (1.0 / 1000.0)                         # [25, feat]
            key_t = conv_relu(conv_relu(key_in, kw1_ref, k1), kw2_ref, k2)    # [vn, d_model]

            q_src = src[input_n - kernel_size:, :]                            # [10, feat]
            q = conv_relu(conv_relu(q_src * (1.0 / 1000.0), qw1_ref, k1),
                          qw2_ref, k2)                                        # [1, d_model]

            # ---- attention: score / sum(score) over the key positions ----
            score = jnp.dot(q, key_t.T, preferred_element_type=f32) + 1e-15   # [1, vn]
            att = score * pl.reciprocal(
                jnp.sum(score, axis=1, keepdims=True), approx=True)           # [1, vn]

            # att @ (DCT of each sliding window)  ==  DCT @ (sum_v att[v] * src[v:v+vl])
            mixed = att[:, 0:1] * src[0:vl, :]
            for v in range(1, vn):
                mixed = mixed + att[:, v:v + 1] * src[v:v + vl, :]            # [vl, feat]
            dct_att = jnp.dot(dct, mixed, preferred_element_type=f32).T       # [feat, dct_n]

            # DCT of the GCN input window (last frame repetition folded into dct_g)
            dct_in = jnp.dot(dct_g, q_src, preferred_element_type=f32).T      # [feat, dct_n]

            x0 = jnp.concatenate([dct_in, dct_att], axis=1)                   # [feat, 2*dct_n]

            # ---- GCN: gc1 + num_stage residual GC blocks + gc7 + residual ----
            y = jnp.tanh(bn_scale * gc_layer(x0, g1w, g1a, g1b))              # [feat, d_model]
            for s in range(num_stage):
                y1 = jnp.tanh(bn_scale * gc_layer(y, gbw_ref[2 * s],
                                                  gba_ref[2 * s], gbb_ref[2 * s]))
                y2 = jnp.tanh(bn_scale * gc_layer(y1, gbw_ref[2 * s + 1],
                                                  gba_ref[2 * s + 1], gbb_ref[2 * s + 1]))
                y = y2 + y
            y = gc_layer(y, g7w, g7a, g7b) + x0                               # [feat, 2*dct_n]

            # ---- inverse DCT of the first dct_n coefficients ----
            o_ref[b] = jnp.dot(idct, y[:, 0:dct_n].T,
                               preferred_element_type=f32)                    # [vl, feat]

    return kernel


# ----------------------------------------------------------------------------
# AttModel forward (itera == 1 path)
# ----------------------------------------------------------------------------
def att_model_forward(params, src, output_n=25, input_n=50, itera=1,
                      kernel_size=10, dct_n=10):
    assert kernel_size == 10
    assert itera == 1  # TODO(synk): autoregressive itera > 1 branch not implemented
    src = src[:, :input_n].astype(jnp.float32)                  # [bs, input_n, feat]
    bs, _, feat = src.shape
    vl = kernel_size + output_n
    num_stage = len(params["gcn"]["blocks"])
    d_model = params["convK_w1"].shape[0]

    # Host-side constants: DCT / iDCT matrices.
    dct_m, idct_m = get_dct_matrix(vl)
    dct10 = dct_m[:dct_n].astype(np.float32)                    # [dct_n, vl]
    idct10 = idct_m[:, :dct_n].astype(np.float32)               # [vl, dct_n]
    # GCN input window = last kernel_size frames + last frame repeated output_n times;
    # fold that repetition into a [dct_n, kernel_size] matrix so no gather is needed.
    dct_gcn = dct10[:, :kernel_size].copy()
    dct_gcn[:, kernel_size - 1] += dct10[:, kernel_size:].sum(axis=1)

    # Repack weights into the kernel's layouts (per-tap stacked conv weights, 2D biases).
    kw1 = jnp.transpose(params["convK_w1"], (2, 1, 0))          # [6, feat, d_model]
    kw2 = jnp.transpose(params["convK_w2"], (2, 1, 0))          # [5, d_model, d_model]
    qw1 = jnp.transpose(params["convQ_w1"], (2, 1, 0))
    qw2 = jnp.transpose(params["convQ_w2"], (2, 1, 0))

    g = params["gcn"]
    g1w, g1a = g["gc1"]["w"], g["gc1"]["att"]
    g1b = g["gc1"]["b"].reshape(1, -1)
    g7w, g7a = g["gc7"]["w"], g["gc7"]["att"]
    g7b = g["gc7"]["b"].reshape(1, -1)
    layers = [blk[name] for blk in g["blocks"] for name in ("gc1", "gc2")]
    gbw = jnp.stack([l["w"] for l in layers])                   # [2*num_stage, dm, dm]
    gba = jnp.stack([l["att"] for l in layers])                 # [2*num_stage, feat, feat]
    gbb = jnp.stack([l["b"].reshape(1, -1) for l in layers])    # [2*num_stage, 1, dm]

    kernel = _build_fused_kernel(bs, feat, input_n, output_n, kernel_size,
                                 dct_n, d_model, num_stage)
    out = pl.pallas_call(
        kernel,
        out_shape=jax.ShapeDtypeStruct((bs, vl, feat), jnp.float32),
    )(src, kw1, kw2, qw1, qw2,
      jnp.asarray(dct10), jnp.asarray(dct_gcn), jnp.asarray(idct10),
      g1w, g1a, g1b, gbw, gba, gbb, g7w, g7a, g7b)

    return out[:, :, None, :]                                   # [bs, vl, itera=1, feat]


# ----------------------------------------------------------------------------
# Deterministic parameter init (shapes match the PyTorch module __init__)
# ----------------------------------------------------------------------------
def _uniform(key, shape, scale):
    return jax.random.uniform(key, shape, jnp.float32, minval=-scale, maxval=scale)


def init_params(key, in_features, d_model, num_stage, dct_n):
    keys = iter(jax.random.split(key, 32))
    p = {}
    p["convK_w1"] = _uniform(next(keys), (d_model, in_features, 6), 1.0 / np.sqrt(in_features * 6))
    p["convK_w2"] = _uniform(next(keys), (d_model, d_model, 5), 1.0 / np.sqrt(d_model * 5))
    p["convQ_w1"] = _uniform(next(keys), (d_model, in_features, 6), 1.0 / np.sqrt(in_features * 6))
    p["convQ_w2"] = _uniform(next(keys), (d_model, d_model, 5), 1.0 / np.sqrt(d_model * 5))

    node_n = in_features
    f_in = 2 * dct_n

    def gc(k, fin, fout):
        k1, k2, k3 = jax.random.split(k, 3)
        stdv = 1.0 / np.sqrt(fout)
        return {
            "w": _uniform(k1, (fin, fout), stdv),
            "att": _uniform(k2, (node_n, node_n), stdv),
            "b": _uniform(k3, (fout,), stdv),
        }

    p["gcn"] = {
        "gc1": gc(next(keys), f_in, d_model),
        "blocks": [
            {"gc1": gc(next(keys), d_model, d_model),
             "gc2": gc(next(keys), d_model, d_model)}
            for _ in range(num_stage)
        ],
        "gc7": gc(next(keys), d_model, f_in),
    }
    return p


# ----------------------------------------------------------------------------
if __name__ == "__main__":
    IN_FEATURES = 16   # feat_dim == node_n of the GCN (small for the demo)
    D_MODEL = 64
    NUM_STAGE = 2
    DCT_N = 10
    KERNEL_SIZE = 10
    BS = 2
    INPUT_N = 50
    OUTPUT_N = 25

    key = jax.random.PRNGKey(0)
    pkey, xkey = jax.random.split(key)
    params = init_params(pkey, IN_FEATURES, D_MODEL, NUM_STAGE, DCT_N)

    # src: [batch_size, seq_len, feat_dim] (extra frames get sliced off by forward)
    src = jax.random.normal(xkey, (BS, INPUT_N + 5, IN_FEATURES), jnp.float32) * 100.0

    out = att_model_forward(params, src, output_n=OUTPUT_N, input_n=INPUT_N, itera=1,
                            kernel_size=KERNEL_SIZE, dct_n=DCT_N)
    out = jax.block_until_ready(out)
    assert out.shape == (BS, KERNEL_SIZE + OUTPUT_N, 1, IN_FEATURES), out.shape
    assert bool(jnp.all(jnp.isfinite(out)))
    print("KERNEL_OK")
</pallas_src>

<mosaic_0001>
module attributes {stable_mosaic.version = 11 : i64} {
  func.func @kernel(%arg0: memref<2x50x16xf32, #tpu.memory_space<vmem>>, %arg1: memref<6x16x64xf32, #tpu.memory_space<vmem>>, %arg2: memref<5x64x64xf32, #tpu.memory_space<vmem>>, %arg3: memref<6x16x64xf32, #tpu.memory_space<vmem>>, %arg4: memref<5x64x64xf32, #tpu.memory_space<vmem>>, %arg5: memref<10x35xf32, #tpu.memory_space<vmem>>, %arg6: memref<10x10xf32, #tpu.memory_space<vmem>>, %arg7: memref<35x10xf32, #tpu.memory_space<vmem>>, %arg8: memref<20x64xf32, #tpu.memory_space<vmem>>, %arg9: memref<16x16xf32, #tpu.memory_space<vmem>>, %arg10: memref<1x64xf32, #tpu.memory_space<vmem>>, %arg11: memref<4x64x64xf32, #tpu.memory_space<vmem>>, %arg12: memref<4x16x16xf32, #tpu.memory_space<vmem>>, %arg13: memref<4x1x64xf32, #tpu.memory_space<vmem>>, %arg14: memref<64x20xf32, #tpu.memory_space<vmem>>, %arg15: memref<16x16xf32, #tpu.memory_space<vmem>>, %arg16: memref<1x20xf32, #tpu.memory_space<vmem>>, %arg17: memref<2x35x16xf32, #tpu.memory_space<vmem>>) attributes {dimension_semantics = [], scalar_prefetch = 0 : i64, scratch_operands = 0 : i64, tpu.core_type = #tpu.core_type<tc>} {
    %c0 = arith.constant 0 : index
    %c0_0 = arith.constant 0 : index
    %0 = vector.load %arg5[%c0, %c0_0] : memref<10x35xf32, #tpu.memory_space<vmem>>, vector<10x35xf32>
    %c0_1 = arith.constant 0 : index
    %c0_2 = arith.constant 0 : index
    %1 = vector.load %arg6[%c0_1, %c0_2] : memref<10x10xf32, #tpu.memory_space<vmem>>, vector<10x10xf32>
    %c0_3 = arith.constant 0 : index
    %c0_4 = arith.constant 0 : index
    %2 = vector.load %arg7[%c0_3, %c0_4] : memref<35x10xf32, #tpu.memory_space<vmem>>, vector<35x10xf32>
    %c0_5 = arith.constant 0 : index
    %c0_6 = arith.constant 0 : index
    %3 = vector.load %arg8[%c0_5, %c0_6] : memref<20x64xf32, #tpu.memory_space<vmem>>, vector<20x64xf32>
    %c0_7 = arith.constant 0 : index
    %c0_8 = arith.constant 0 : index
    %4 = vector.load %arg9[%c0_7, %c0_8] : memref<16x16xf32, #tpu.memory_space<vmem>>, vector<16x16xf32>
    %c0_9 = arith.constant 0 : index
    %c0_10 = arith.constant 0 : index
    %5 = vector.load %arg10[%c0_9, %c0_10] : memref<1x64xf32, #tpu.memory_space<vmem>>, vector<1x64xf32>
    %c0_11 = arith.constant 0 : index
    %c0_12 = arith.constant 0 : index
    %6 = vector.load %arg14[%c0_11, %c0_12] : memref<64x20xf32, #tpu.memory_space<vmem>>, vector<64x20xf32>
    %c0_13 = arith.constant 0 : index
    %c0_14 = arith.constant 0 : index
    %7 = vector.load %arg15[%c0_13, %c0_14] : memref<16x16xf32, #tpu.memory_space<vmem>>, vector<16x16xf32>
    %c0_15 = arith.constant 0 : index
    %c0_16 = arith.constant 0 : index
    %8 = vector.load %arg16[%c0_15, %c0_16] : memref<1x20xf32, #tpu.memory_space<vmem>>, vector<1x20xf32>
    %c0_17 = arith.constant 0 : index
    %c0_18 = arith.constant 0 : index
    %c0_19 = arith.constant 0 : index
    %9 = vector.load %arg0[%c0_17, %c0_18, %c0_19] : memref<2x50x16xf32, #tpu.memory_space<vmem>>, vector<1x50x16xf32>
    %10 = vector.shape_cast %9 : vector<1x50x16xf32> to vector<50x16xf32>
    %11 = vector.extract_strided_slice %10 {offsets = [0, 0], sizes = [25, 16], strides = [1, 1]} : vector<50x16xf32> to vector<25x16xf32>
    %cst = arith.constant 1.000000e-03 : f32
    %12 = vector.broadcast %cst : f32 to vector<25x16xf32>
    %13 = arith.mulf %11, %12 : vector<25x16xf32>
    %14 = vector.extract_strided_slice %13 {offsets = [0, 0], sizes = [20, 16], strides = [1, 1]} : vector<25x16xf32> to vector<20x16xf32>
    %c0_20 = arith.constant 0 : index
    %c0_21 = arith.constant 0 : index
    %c0_22 = arith.constant 0 : index
    %15 = vector.load %arg1[%c0_20, %c0_21, %c0_22] : memref<6x16x64xf32, #tpu.memory_space<vmem>>, vector<1x16x64xf32>
    %16 = vector.shape_cast %15 : vector<1x16x64xf32> to vector<16x64xf32>
    %cst_23 = arith.constant dense<0.000000e+00> : vector<20x64xf32>
    %17 = tpu.matmul %14, %16, %cst_23 {dimension_numbers = #tpu.dot_dimension_numbers<[1], [0], [0], [1], [0, 0, 1, 1], [], []>} : vector<20x16xf32>, vector<16x64xf32>, vector<20x64xf32> -> vector<20x64xf32>
    %18 = vector.extract_strided_slice %13 {offsets = [1, 0], sizes = [20, 16], strides = [1, 1]} : vector<25x16xf32> to vector<20x16xf32>
    %c1 = arith.constant 1 : index
    %c0_24 = arith.constant 0 : index
    %c0_25 = arith.constant 0 : index
    %19 = vector.load %arg1[%c1, %c0_24, %c0_25] : memref<6x16x64xf32, #tpu.memory_space<vmem>>, vector<1x16x64xf32>
    %20 = vector.shape_cast %19 : vector<1x16x64xf32> to vector<16x64xf32>
    %cst_26 = arith.constant dense<0.000000e+00> : vector<20x64xf32>
    %21 = tpu.matmul %18, %20, %cst_26 {dimension_numbers = #tpu.dot_dimension_numbers<[1], [0], [0], [1], [0, 0, 1, 1], [], []>} : vector<20x16xf32>, vector<16x64xf32>, vector<20x64xf32> -> vector<20x64xf32>
    %22 = arith.addf %17, %21 : vector<20x64xf32>
    %23 = vector.extract_strided_slice %13 {offsets = [2, 0], sizes = [20, 16], strides = [1, 1]} : vector<25x16xf32> to vector<20x16xf32>
    %c2 = arith.constant 2 : index
    %c0_27 = arith.constant 0 : index
    %c0_28 = arith.constant 0 : index
    %24 = vector.load %arg1[%c2, %c0_27, %c0_28] : memref<6x16x64xf32, #tpu.memory_space<vmem>>, vector<1x16x64xf32>
    %25 = vector.shape_cast %24 : vector<1x16x64xf32> to vector<16x64xf32>
    %cst_29 = arith.constant dense<0.000000e+00> : vector<20x64xf32>
    %26 = tpu.matmul %23, %25, %cst_29 {dimension_numbers = #tpu.dot_dimension_numbers<[1], [0], [0], [1], [0, 0, 1, 1], [], []>} : vector<20x16xf32>, vector<16x64xf32>, vector<20x64xf32> -> vector<20x64xf32>
    %27 = arith.addf %22, %26 : vector<20x64xf32>
    %28 = vector.extract_strided_slice %13 {offsets = [3, 0], sizes = [20, 16], strides = [1, 1]} : vector<25x16xf32> to vector<20x16xf32>
    %c3 = arith.constant 3 : index
    %c0_30 = arith.constant 0 : index
    %c0_31 = arith.constant 0 : index
    %29 = vector.load %arg1[%c3, %c0_30, %c0_31] : memref<6x16x64xf32, #tpu.memory_space<vmem>>, vector<1x16x64xf32>
    %30 = vector.shape_cast %29 : vector<1x16x64xf32> to vector<16x64xf32>
    %cst_32 = arith.constant dense<0.000000e+00> : vector<20x64xf32>
    %31 = tpu.matmul %28, %30, %cst_32 {dimension_numbers = #tpu.dot_dimension_numbers<[1], [0], [0], [1], [0, 0, 1, 1], [], []>} : vector<20x16xf32>, vector<16x64xf32>, vector<20x64xf32> -> vector<20x64xf32>
    %32 = arith.addf %27, %31 : vector<20x64xf32>
    %33 = vector.extract_strided_slice %13 {offsets = [4, 0], sizes = [20, 16], strides = [1, 1]} : vector<25x16xf32> to vector<20x16xf32>
    %c4 = arith.constant 4 : index
    %c0_33 = arith.constant 0 : index
    %c0_34 = arith.constant 0 : index
    %34 = vector.load %arg1[%c4, %c0_33, %c0_34] : memref<6x16x64xf32, #tpu.memory_space<vmem>>, vector<1x16x64xf32>
    %35 = vector.shape_cast %34 : vector<1x16x64xf32> to vector<16x64xf32>
    %cst_35 = arith.constant dense<0.000000e+00> : vector<20x64xf32>
    %36 = tpu.matmul %33, %35, %cst_35 {dimension_numbers = #tpu.dot_dimension_numbers<[1], [0], [0], [1], [0, 0, 1, 1], [], []>} : vector<20x16xf32>, vector<16x64xf32>, vector<20x64xf32> -> vector<20x64xf32>
    %37 = arith.addf %32, %36 : vector<20x64xf32>
    %38 = vector.extract_strided_slice %13 {offsets = [5, 0], sizes = [20, 16], strides = [1, 1]} : vector<25x16xf32> to vector<20x16xf32>
    %c5 = arith.constant 5 : index
    %c0_36 = arith.constant 0 : index
    %c0_37 = arith.constant 0 : index
    %39 = vector.load %arg1[%c5, %c0_36, %c0_37] : memref<6x16x64xf32, #tpu.memory_space<vmem>>, vector<1x16x64xf32>
    %40 = vector.shape_cast %39 : vector<1x16x64xf32> to vector<16x64xf32>
    %cst_38 = arith.constant dense<0.000000e+00> : vector<20x64xf32>
    %41 = tpu.matmul %38, %40, %cst_38 {dimension_numbers = #tpu.dot_dimension_numbers<[1], [0], [0], [1], [0, 0, 1, 1], [], []>} : vector<20x16xf32>, vector<16x64xf32>, vector<20x64xf32> -> vector<20x64xf32>
    %42 = arith.addf %37, %41 : vector<20x64xf32>
    %cst_39 = arith.constant 0.000000e+00 : f32
    %43 = vector.broadcast %cst_39 : f32 to vector<20x64xf32>
    %44 = arith.maximumf %42, %43 : vector<20x64xf32>
    %45 = vector.extract_strided_slice %44 {offsets = [0, 0], sizes = [16, 64], strides = [1, 1]} : vector<20x64xf32> to vector<16x64xf32>
    %c0_40 = arith.constant 0 : index
    %c0_41 = arith.constant 0 : index
    %c0_42 = arith.constant 0 : index
    %46 = vector.load %arg2[%c0_40, %c0_41, %c0_42] : memref<5x64x64xf32, #tpu.memory_space<vmem>>, vector<1x64x64xf32>
    %47 = vector.shape_cast %46 : vector<1x64x64xf32> to vector<64x64xf32>
    %cst_43 = arith.constant dense<0.000000e+00> : vector<16x64xf32>
    %48 = tpu.matmul %45, %47, %cst_43 {dimension_numbers = #tpu.dot_dimension_numbers<[1], [0], [0], [1], [0, 0, 1, 1], [], []>} : vector<16x64xf32>, vector<64x64xf32>, vector<16x64xf32> -> vector<16x64xf32>
    %49 = vector.extract_strided_slice %44 {offsets = [1, 0], sizes = [16, 64], strides = [1, 1]} : vector<20x64xf32> to vector<16x64xf32>
    %c1_44 = arith.constant 1 : index
    %c0_45 = arith.constant 0 : index
    %c0_46 = arith.constant 0 : index
    %50 = vector.load %arg2[%c1_44, %c0_45, %c0_46] : memref<5x64x64xf32, #tpu.memory_space<vmem>>, vector<1x64x64xf32>
    %51 = vector.shape_cast %50 : vector<1x64x64xf32> to vector<64x64xf32>
    %cst_47 = arith.constant dense<0.000000e+00> : vector<16x64xf32>
    %52 = tpu.matmul %49, %51, %cst_47 {dimension_numbers = #tpu.dot_dimension_numbers<[1], [0], [0], [1], [0, 0, 1, 1], [], []>} : vector<16x64xf32>, vector<64x64xf32>, vector<16x64xf32> -> vector<16x64xf32>
    %53 = arith.addf %48, %52 : vector<16x64xf32>
    %54 = vector.extract_strided_slice %44 {offsets = [2, 0], sizes = [16, 64], strides = [1, 1]} : vector<20x64xf32> to vector<16x64xf32>
    %c2_48 = arith.constant 2 : index
    %c0_49 = arith.constant 0 : index
    %c0_50 = arith.constant 0 : index
    %55 = vector.load %arg2[%c2_48, %c0_49, %c0_50] : memref<5x64x64xf32, #tpu.memory_space<vmem>>, vector<1x64x64xf32>
    %56 = vector.shape_cast %55 : vector<1x64x64xf32> to vector<64x64xf32>
    %cst_51 = arith.constant dense<0.000000e+00> : vector<16x64xf32>
    %57 = tpu.matmul %54, %56, %cst_51 {dimension_numbers = #tpu.dot_dimension_numbers<[1], [0], [0], [1], [0, 0, 1, 1], [], []>} : vector<16x64xf32>, vector<64x64xf32>, vector<16x64xf32> -> vector<16x64xf32>
    %58 = arith.addf %53, %57 : vector<16x64xf32>
    %59 = vector.extract_strided_slice %44 {offsets = [3, 0], sizes = [16, 64], strides = [1, 1]} : vector<20x64xf32> to vector<16x64xf32>
    %c3_52 = arith.constant 3 : index
    %c0_53 = arith.constant 0 : index
    %c0_54 = arith.constant 0 : index
    %60 = vector.load %arg2[%c3_52, %c0_53, %c0_54] : memref<5x64x64xf32, #tpu.memory_space<vmem>>, vector<1x64x64xf32>
    %61 = vector.shape_cast %60 : vector<1x64x64xf32> to vector<64x64xf32>
    %cst_55 = arith.constant dense<0.000000e+00> : vector<16x64xf32>
    %62 = tpu.matmul %59, %61, %cst_55 {dimension_numbers = #tpu.dot_dimension_numbers<[1], [0], [0], [1], [0, 0, 1, 1], [], []>} : vector<16x64xf32>, vector<64x64xf32>, vector<16x64xf32> -> vector<16x64xf32>
    %63 = arith.addf %58, %62 : vector<16x64xf32>
    %64 = vector.extract_strided_slice %44 {offsets = [4, 0], sizes = [16, 64], strides = [1, 1]} : vector<20x64xf32> to vector<16x64xf32>
    %c4_56 = arith.constant 4 : index
    %c0_57 = arith.constant 0 : index
    %c0_58 = arith.constant 0 : index
    %65 = vector.load %arg2[%c4_56, %c0_57, %c0_58] : memref<5x64x64xf32, #tpu.memory_space<vmem>>, vector<1x64x64xf32>
    %66 = vector.shape_cast %65 : vector<1x64x64xf32> to vector<64x64xf32>
    %cst_59 = arith.constant dense<0.000000e+00> : vector<16x64xf32>
    %67 = tpu.matmul %64, %66, %cst_59 {dimension_numbers = #tpu.dot_dimension_numbers<[1], [0], [0], [1], [0, 0, 1, 1], [], []>} : vector<16x64xf32>, vector<64x64xf32>, vector<16x64xf32> -> vector<16x64xf32>
    %68 = arith.addf %63, %67 : vector<16x64xf32>
    %cst_60 = arith.constant 0.000000e+00 : f32
    %69 = vector.broadcast %cst_60 : f32 to vector<16x64xf32>
    %70 = arith.maximumf %68, %69 : vector<16x64xf32>
    %71 = vector.extract_strided_slice %10 {offsets = [40, 0], sizes = [10, 16], strides = [1, 1]} : vector<50x16xf32> to vector<10x16xf32>
    %cst_61 = arith.constant 1.000000e-03 : f32
    %72 = vector.broadcast %cst_61 : f32 to vector<10x16xf32>
    %73 = arith.mulf %71, %72 : vector<10x16xf32>
    %74 = vector.extract_strided_slice %73 {offsets = [0, 0], sizes = [5, 16], strides = [1, 1]} : vector<10x16xf32> to vector<5x16xf32>
    %c0_62 = arith.constant 0 : index
    %c0_63 = arith.constant 0 : index
    %c0_64 = arith.constant 0 : index
    %75 = vector.load %arg3[%c0_62, %c0_63, %c0_64] : memref<6x16x64xf32, #tpu.memory_space<vmem>>, vector<1x16x64xf32>
    %76 = vector.shape_cast %75 : vector<1x16x64xf32> to vector<16x64xf32>
    %cst_65 = arith.constant dense<0.000000e+00> : vector<5x64xf32>
    %77 = tpu.matmul %74, %76, %cst_65 {dimension_numbers = #tpu.dot_dimension_numbers<[1], [0], [0], [1], [0, 0, 1, 1], [], []>} : vector<5x16xf32>, vector<16x64xf32>, vector<5x64xf32> -> vector<5x64xf32>
    %78 = vector.extract_strided_slice %73 {offsets = [1, 0], sizes = [5, 16], strides = [1, 1]} : vector<10x16xf32> to vector<5x16xf32>
    %c1_66 = arith.constant 1 : index
    %c0_67 = arith.constant 0 : index
    %c0_68 = arith.constant 0 : index
    %79 = vector.load %arg3[%c1_66, %c0_67, %c0_68] : memref<6x16x64xf32, #tpu.memory_space<vmem>>, vector<1x16x64xf32>
    %80 = vector.shape_cast %79 : vector<1x16x64xf32> to vector<16x64xf32>
    %cst_69 = arith.constant dense<0.000000e+00> : vector<5x64xf32>
    %81 = tpu.matmul %78, %80, %cst_69 {dimension_numbers = #tpu.dot_dimension_numbers<[1], [0], [0], [1], [0, 0, 1, 1], [], []>} : vector<5x16xf32>, vector<16x64xf32>, vector<5x64xf32> -> vector<5x64xf32>
    %82 = arith.addf %77, %81 : vector<5x64xf32>
    %83 = vector.extract_strided_slice %73 {offsets = [2, 0], sizes = [5, 16], strides = [1, 1]} : vector<10x16xf32> to vector<5x16xf32>
    %c2_70 = arith.constant 2 : index
    %c0_71 = arith.constant 0 : index
    %c0_72 = arith.constant 0 : index
    %84 = vector.load %arg3[%c2_70, %c0_71, %c0_72] : memref<6x16x64xf32, #tpu.memory_space<vmem>>, vector<1x16x64xf32>
    %85 = vector.shape_cast %84 : vector<1x16x64xf32> to vector<16x64xf32>
    %cst_73 = arith.constant dense<0.000000e+00> : vector<5x64xf32>
    %86 = tpu.matmul %83, %85, %cst_73 {dimension_numbers = #tpu.dot_dimension_numbers<[1], [0], [0], [1], [0, 0, 1, 1], [], []>} : vector<5x16xf32>, vector<16x64xf32>, vector<5x64xf32> -> vector<5x64xf32>
    %87 = arith.addf %82, %86 : vector<5x64xf32>
    %88 = vector.extract_strided_slice %73 {offsets = [3, 0], sizes = [5, 16], strides = [1, 1]} : vector<10x16xf32> to vector<5x16xf32>
    %c3_74 = arith.constant 3 : index
    %c0_75 = arith.constant 0 : index
    %c0_76 = arith.constant 0 : index
    %89 = vector.load %arg3[%c3_74, %c0_75, %c0_76] : memref<6x16x64xf32, #tpu.memory_space<vmem>>, vector<1x16x64xf32>
    %90 = vector.shape_cast %89 : vector<1x16x64xf32> to vector<16x64xf32>
    %cst_77 = arith.constant dense<0.000000e+00> : vector<5x64xf32>
    %91 = tpu.matmul %88, %90, %cst_77 {dimension_numbers = #tpu.dot_dimension_numbers<[1], [0], [0], [1], [0, 0, 1, 1], [], []>} : vector<5x16xf32>, vector<16x64xf32>, vector<5x64xf32> -> vector<5x64xf32>
    %92 = arith.addf %87, %91 : vector<5x64xf32>
    %93 = vector.extract_strided_slice %73 {offsets = [4, 0], sizes = [5, 16], strides = [1, 1]} : vector<10x16xf32> to vector<5x16xf32>
    %c4_78 = arith.constant 4 : index
    %c0_79 = arith.constant 0 : index
    %c0_80 = arith.constant 0 : index
    %94 = vector.load %arg3[%c4_78, %c0_79, %c0_80] : memref<6x16x64xf32, #tpu.memory_space<vmem>>, vector<1x16x64xf32>
    %95 = vector.shape_cast %94 : vector<1x16x64xf32> to vector<16x64xf32>
    %cst_81 = arith.constant dense<0.000000e+00> : vector<5x64xf32>
    %96 = tpu.matmul %93, %95, %cst_81 {dimension_numbers = #tpu.dot_dimension_numbers<[1], [0], [0], [1], [0, 0, 1, 1], [], []>} : vector<5x16xf32>, vector<16x64xf32>, vector<5x64xf32> -> vector<5x64xf32>
    %97 = arith.addf %92, %96 : vector<5x64xf32>
    %98 = vector.extract_strided_slice %73 {offsets = [5, 0], sizes = [5, 16], strides = [1, 1]} : vector<10x16xf32> to vector<5x16xf32>
    %c5_82 = arith.constant 5 : index
    %c0_83 = arith.constant 0 : index
    %c0_84 = arith.constant 0 : index
    %99 = vector.load %arg3[%c5_82, %c0_83, %c0_84] : memref<6x16x64xf32, #tpu.memory_space<vmem>>, vector<1x16x64xf32>
    %100 = vector.shape_cast %99 : vector<1x16x64xf32> to vector<16x64xf32>
    %cst_85 = arith.constant dense<0.000000e+00> : vector<5x64xf32>
    %101 = tpu.matmul %98, %100, %cst_85 {dimension_numbers = #tpu.dot_dimension_numbers<[1], [0], [0], [1], [0, 0, 1, 1], [], []>} : vector<5x16xf32>, vector<16x64xf32>, vector<5x64xf32> -> vector<5x64xf32>
    %102 = arith.addf %97, %101 : vector<5x64xf32>
    %cst_86 = arith.constant 0.000000e+00 : f32
    %103 = vector.broadcast %cst_86 : f32 to vector<5x64xf32>
    %104 = arith.maximumf %102, %103 : vector<5x64xf32>
    %105 = vector.extract_strided_slice %104 {offsets = [0, 0], sizes = [1, 64], strides = [1, 1]} : vector<5x64xf32> to vector<1x64xf32>
    %c0_87 = arith.constant 0 : index
    %c0_88 = arith.constant 0 : index
    %c0_89 = arith.constant 0 : index
    %106 = vector.load %arg4[%c0_87, %c0_88, %c0_89] : memref<5x64x64xf32, #tpu.memory_space<vmem>>, vector<1x64x64xf32>
    %107 = vector.shape_cast %106 : vector<1x64x64xf32> to vector<64x64xf32>
    %cst_90 = arith.constant dense<0.000000e+00> : vector<1x64xf32>
    %108 = tpu.matmul %105, %107, %cst_90 {dimension_numbers = #tpu.dot_dimension_numbers<[1], [0], [0], [1], [0, 0, 1, 1], [], []>} : vector<1x64xf32>, vector<64x64xf32>, vector<1x64xf32> -> vector<1x64xf32>
    %109 = vector.extract_strided_slice %104 {offsets = [1, 0], sizes = [1, 64], strides = [1, 1]} : vector<5x64xf32> to vector<1x64xf32>
    %c1_91 = arith.constant 1 : index
    %c0_92 = arith.constant 0 : index
    %c0_93 = arith.constant 0 : index
    %110 = vector.load %arg4[%c1_91, %c0_92, %c0_93] : memref<5x64x64xf32, #tpu.memory_space<vmem>>, vector<1x64x64xf32>
    %111 = vector.shape_cast %110 : vector<1x64x64xf32> to vector<64x64xf32>
    %cst_94 = arith.constant dense<0.000000e+00> : vector<1x64xf32>
    %112 = tpu.matmul %109, %111, %cst_94 {dimension_numbers = #tpu.dot_dimension_numbers<[1], [0], [0], [1], [0, 0, 1, 1], [], []>} : vector<1x64xf32>, vector<64x64xf32>, vector<1x64xf32> -> vector<1x64xf32>
    %113 = arith.addf %108, %112 : vector<1x64xf32>
    %114 = vector.extract_strided_slice %104 {offsets = [2, 0], sizes = [1, 64], strides = [1, 1]} : vector<5x64xf32> to vector<1x64xf32>
    %c2_95 = arith.constant 2 : index
    %c0_96 = arith.constant 0 : index
    %c0_97 = arith.constant 0 : index
    %115 = vector.load %arg4[%c2_95, %c0_96, %c0_97] : memref<5x64x64xf32, #tpu.memory_space<vmem>>, vector<1x64x64xf32>
    %116 = vector.shape_cast %115 : vector<1x64x64xf32> to vector<64x64xf32>
    %cst_98 = arith.constant dense<0.000000e+00> : vector<1x64xf32>
    %117 = tpu.matmul %114, %116, %cst_98 {dimension_numbers = #tpu.dot_dimension_numbers<[1], [0], [0], [1], [0, 0, 1, 1], [], []>} : vector<1x64xf32>, vector<64x64xf32>, vector<1x64xf32> -> vector<1x64xf32>
    %118 = arith.addf %113, %117 : vector<1x64xf32>
    %119 = vector.extract_strided_slice %104 {offsets = [3, 0], sizes = [1, 64], strides = [1, 1]} : vector<5x64xf32> to vector<1x64xf32>
    %c3_99 = arith.constant 3 : index
    %c0_100 = arith.constant 0 : index
    %c0_101 = arith.constant 0 : index
    %120 = vector.load %arg4[%c3_99, %c0_100, %c0_101] : memref<5x64x64xf32, #tpu.memory_space<vmem>>, vector<1x64x64xf32>
    %121 = vector.shape_cast %120 : vector<1x64x64xf32> to vector<64x64xf32>
    %cst_102 = arith.constant dense<0.000000e+00> : vector<1x64xf32>
    %122 = tpu.matmul %119, %121, %cst_102 {dimension_numbers = #tpu.dot_dimension_numbers<[1], [0], [0], [1], [0, 0, 1, 1], [], []>} : vector<1x64xf32>, vector<64x64xf32>, vector<1x64xf32> -> vector<1x64xf32>
    %123 = arith.addf %118, %122 : vector<1x64xf32>
    %124 = vector.extract_strided_slice %104 {offsets = [4, 0], sizes = [1, 64], strides = [1, 1]} : vector<5x64xf32> to vector<1x64xf32>
    %c4_103 = arith.constant 4 : index
    %c0_104 = arith.constant 0 : index
    %c0_105 = arith.constant 0 : index
    %125 = vector.load %arg4[%c4_103, %c0_104, %c0_105] : memref<5x64x64xf32, #tpu.memory_space<vmem>>, vector<1x64x64xf32>
    %126 = vector.shape_cast %125 : vector<1x64x64xf32> to vector<64x64xf32>
    %cst_106 = arith.constant dense<0.000000e+00> : vector<1x64xf32>
    %127 = tpu.matmul %124, %126, %cst_106 {dimension_numbers = #tpu.dot_dimension_numbers<[1], [0], [0], [1], [0, 0, 1, 1], [], []>} : vector<1x64xf32>, vector<64x64xf32>, vector<1x64xf32> -> vector<1x64xf32>
    %128 = arith.addf %123, %127 : vector<1x64xf32>
    %cst_107 = arith.constant 0.000000e+00 : f32
    %129 = vector.broadcast %cst_107 : f32 to vector<1x64xf32>
    %130 = arith.maximumf %128, %129 : vector<1x64xf32>
    %131 = tpu.transpose %70, [1, 0] : vector<16x64xf32> -> vector<64x16xf32>
    %cst_108 = arith.constant dense<0.000000e+00> : vector<1x16xf32>
    %132 = tpu.matmul %130, %131, %cst_108 {dimension_numbers = #tpu.dot_dimension_numbers<[1], [0], [0], [1], [0, 0, 1, 1], [], []>} : vector<1x64xf32>, vector<64x16xf32>, vector<1x16xf32> -> vector<1x16xf32>
    %cst_109 = arith.constant 1.000000e-15 : f32
    %133 = vector.broadcast %cst_109 : f32 to vector<1x16xf32>
    %134 = arith.addf %132, %133 : vector<1x16xf32>
    %cst_110 = arith.constant dense<0.000000e+00> : vector<1xf32>
    %135 = vector.multi_reduction <add>, %134, %cst_110 [1] : vector<1x16xf32> to vector<1xf32>
    %136 = vector.shape_cast %135 : vector<1xf32> to vector<1x1xf32>
    %137 = tpu.reciprocal %136 {approx = true} : vector<1x1xf32> -> vector<1x1xf32>
    %138 = vector.broadcast %137 : vector<1x1xf32> to vector<1x16xf32>
    %139 = arith.mulf %134, %138 : vector<1x16xf32>
    %140 = vector.extract_strided_slice %139 {offsets = [0, 0], sizes = [1, 1], strides = [1, 1]} : vector<1x16xf32> to vector<1x1xf32>
    %141 = vector.extract_strided_slice %10 {offsets = [0, 0], sizes = [35, 16], strides = [1, 1]} : vector<50x16xf32> to vector<35x16xf32>
    %142 = vector.broadcast %140 : vector<1x1xf32> to vector<35x16xf32>
    %143 = arith.mulf %142, %141 : vector<35x16xf32>
    %144 = vector.extract_strided_slice %139 {offsets = [0, 1], sizes = [1, 1], strides = [1, 1]} : vector<1x16xf32> to vector<1x1xf32>
    %145 = vector.extract_strided_slice %10 {offsets = [1, 0], sizes = [35, 16], strides = [1, 1]} : vector<50x16xf32> to vector<35x16xf32>
    %146 = vector.broadcast %144 : vector<1x1xf32> to vector<35x16xf32>
    %147 = arith.mulf %146, %145 : vector<35x16xf32>
    %148 = arith.addf %143, %147 : vector<35x16xf32>
    %149 = vector.extract_strided_slice %139 {offsets = [0, 2], sizes = [1, 1], strides = [1, 1]} : vector<1x16xf32> to vector<1x1xf32>
    %150 = vector.extract_strided_slice %10 {offsets = [2, 0], sizes = [35, 16], strides = [1, 1]} : vector<50x16xf32> to vector<35x16xf32>
    %151 = vector.broadcast %149 : vector<1x1xf32> to vector<35x16xf32>
    %152 = arith.mulf %151, %150 : vector<35x16xf32>
    %153 = arith.addf %148, %152 : vector<35x16xf32>
    %154 = vector.extract_strided_slice %139 {offsets = [0, 3], sizes = [1, 1], strides = [1, 1]} : vector<1x16xf32> to vector<1x1xf32>
    %155 = vector.extract_strided_slice %10 {offsets = [3, 0], sizes = [35, 16], strides = [1, 1]} : vector<50x16xf32> to vector<35x16xf32>
    %156 = vector.broadcast %154 : vector<1x1xf32> to vector<35x16xf32>
    %157 = arith.mulf %156, %155 : vector<35x16xf32>
    %158 = arith.addf %153, %157 : vector<35x16xf32>
    %159 = vector.extract_strided_slice %139 {offsets = [0, 4], sizes = [1, 1], strides = [1, 1]} : vector<1x16xf32> to vector<1x1xf32>
    %160 = vector.extract_strided_slice %10 {offsets = [4, 0], sizes = [35, 16], strides = [1, 1]} : vector<50x16xf32> to vector<35x16xf32>
    %161 = vector.broadcast %159 : vector<1x1xf32> to vector<35x16xf32>
    %162 = arith.mulf %161, %160 : vector<35x16xf32>
    %163 = arith.addf %158, %162 : vector<35x16xf32>
    %164 = vector.extract_strided_slice %139 {offsets = [0, 5], sizes = [1, 1], strides = [1, 1]} : vector<1x16xf32> to vector<1x1xf32>
    %165 = vector.extract_strided_slice %10 {offsets = [5, 0], sizes = [35, 16], strides = [1, 1]} : vector<50x16xf32> to vector<35x16xf32>
    %166 = vector.broadcast %164 : vector<1x1xf32> to vector<35x16xf32>
    %167 = arith.mulf %166, %165 : vector<35x16xf32>
    %168 = arith.addf %163, %167 : vector<35x16xf32>
    %169 = vector.extract_strided_slice %139 {offsets = [0, 6], sizes = [1, 1], strides = [1, 1]} : vector<1x16xf32> to vector<1x1xf32>
    %170 = vector.extract_strided_slice %10 {offsets = [6, 0], sizes = [35, 16], strides = [1, 1]} : vector<50x16xf32> to vector<35x16xf32>
    %171 = vector.broadcast %169 : vector<1x1xf32> to vector<35x16xf32>
    %172 = arith.mulf %171, %170 : vector<35x16xf32>
    %173 = arith.addf %168, %172 : vector<35x16xf32>
    %174 = vector.extract_strided_slice %139 {offsets = [0, 7], sizes = [1, 1], strides = [1, 1]} : vector<1x16xf32> to vector<1x1xf32>
    %175 = vector.extract_strided_slice %10 {offsets = [7, 0], sizes = [35, 16], strides = [1, 1]} : vector<50x16xf32> to vector<35x16xf32>
    %176 = vector.broadcast %174 : vector<1x1xf32> to vector<35x16xf32>
    %177 = arith.mulf %176, %175 : vector<35x16xf32>
    %178 = arith.addf %173, %177 : vector<35x16xf32>
    %179 = vector.extract_strided_slice %139 {offsets = [0, 8], sizes = [1, 1], strides = [1, 1]} : vector<1x16xf32> to vector<1x1xf32>
    %180 = vector.extract_strided_slice %10 {offsets = [8, 0], sizes = [35, 16], strides = [1, 1]} : vector<50x16xf32> to vector<35x16xf32>
    %181 = vector.broadcast %179 : vector<1x1xf32> to vector<35x16xf32>
    %182 = arith.mulf %181, %180 : vector<35x16xf32>
    %183 = arith.addf %178, %182 : vector<35x16xf32>
    %184 = vector.extract_strided_slice %139 {offsets = [0, 9], sizes = [1, 1], strides = [1, 1]} : vector<1x16xf32> to vector<1x1xf32>
    %185 = vector.extract_strided_slice %10 {offsets = [9, 0], sizes = [35, 16], strides = [1, 1]} : vector<50x16xf32> to vector<35x16xf32>
    %186 = vector.broadcast %184 : vector<1x1xf32> to vector<35x16xf32>
    %187 = arith.mulf %186, %185 : vector<35x16xf32>
    %188 = arith.addf %183, %187 : vector<35x16xf32>
    %189 = vector.extract_strided_slice %139 {offsets = [0, 10], sizes = [1, 1], strides = [1, 1]} : vector<1x16xf32> to vector<1x1xf32>
    %190 = vector.extract_strided_slice %10 {offsets = [10, 0], sizes = [35, 16], strides = [1, 1]} : vector<50x16xf32> to vector<35x16xf32>
    %191 = vector.broadcast %189 : vector<1x1xf32> to vector<35x16xf32>
    %192 = arith.mulf %191, %190 : vector<35x16xf32>
    %193 = arith.addf %188, %192 : vector<35x16xf32>
    %194 = vector.extract_strided_slice %139 {offsets = [0, 11], sizes = [1, 1], strides = [1, 1]} : vector<1x16xf32> to vector<1x1xf32>
    %195 = vector.extract_strided_slice %10 {offsets = [11, 0], sizes = [35, 16], strides = [1, 1]} : vector<50x16xf32> to vector<35x16xf32>
    %196 = vector.broadcast %194 : vector<1x1xf32> to vector<35x16xf32>
    %197 = arith.mulf %196, %195 : vector<35x16xf32>
    %198 = arith.addf %193, %197 : vector<35x16xf32>
    %199 = vector.extract_strided_slice %139 {offsets = [0, 12], sizes = [1, 1], strides = [1, 1]} : vector<1x16xf32> to vector<1x1xf32>
    %200 = vector.extract_strided_slice %10 {offsets = [12, 0], sizes = [35, 16], strides = [1, 1]} : vector<50x16xf32> to vector<35x16xf32>
    %201 = vector.broadcast %199 : vector<1x1xf32> to vector<35x16xf32>
    %202 = arith.mulf %201, %200 : vector<35x16xf32>
    %203 = arith.addf %198, %202 : vector<35x16xf32>
    %204 = vector.extract_strided_slice %139 {offsets = [0, 13], sizes = [1, 1], strides = [1, 1]} : vector<1x16xf32> to vector<1x1xf32>
    %205 = vector.extract_strided_slice %10 {offsets = [13, 0], sizes = [35, 16], strides = [1, 1]} : vector<50x16xf32> to vector<35x16xf32>
    %206 = vector.broadcast %204 : vector<1x1xf32> to vector<35x16xf32>
    %207 = arith.mulf %206, %205 : vector<35x16xf32>
    %208 = arith.addf %203, %207 : vector<35x16xf32>
    %209 = vector.extract_strided_slice %139 {offsets = [0, 14], sizes = [1, 1], strides = [1, 1]} : vector<1x16xf32> to vector<1x1xf32>
    %210 = vector.extract_strided_slice %10 {offsets = [14, 0], sizes = [35, 16], strides = [1, 1]} : vector<50x16xf32> to vector<35x16xf32>
    %211 = vector.broadcast %209 : vector<1x1xf32> to vector<35x16xf32>
    %212 = arith.mulf %211, %210 : vector<35x16xf32>
    %213 = arith.addf %208, %212 : vector<35x16xf32>
    %214 = vector.extract_strided_slice %139 {offsets = [0, 15], sizes = [1, 1], strides = [1, 1]} : vector<1x16xf32> to vector<1x1xf32>
    %215 = vector.extract_strided_slice %10 {offsets = [15, 0], sizes = [35, 16], strides = [1, 1]} : vector<50x16xf32> to vector<35x16xf32>
    %216 = vector.broadcast %214 : vector<1x1xf32> to vector<35x16xf32>
    %217 = arith.mulf %216, %215 : vector<35x16xf32>
    %218 = arith.addf %213, %217 : vector<35x16xf32>
    %cst_111 = arith.constant dense<0.000000e+00> : vector<10x16xf32>
    %219 = tpu.matmul %0, %218, %cst_111 {dimension_numbers = #tpu.dot_dimension_numbers<[1], [0], [0], [1], [0, 0, 1, 1], [], []>} : vector<10x35xf32>, vector<35x16xf32>, vector<10x16xf32> -> vector<10x16xf32>
    %220 = tpu.transpose %219, [1, 0] : vector<10x16xf32> -> vector<16x10xf32>
    %cst_112 = arith.constant dense<0.000000e+00> : vector<10x16xf32>
    %221 = tpu.matmul %1, %71, %cst_112 {dimension_numbers = #tpu.dot_dimension_numbers<[1], [0], [0], [1], [0, 0, 1, 1], [], []>} : vector<10x10xf32>, vector<10x16xf32>, vector<10x16xf32> -> vector<10x16xf32>
    %222 = tpu.transpose %221, [1, 0] : vector<10x16xf32> -> vector<16x10xf32>
    %223 = tpu.concatenate %222, %220 in 1 : vector<16x10xf32>, vector<16x10xf32> -> vector<16x20xf32>
    %cst_113 = arith.constant dense<0.000000e+00> : vector<16x64xf32>
    %224 = tpu.matmul %223, %3, %cst_113 {dimension_numbers = #tpu.dot_dimension_numbers<[1], [0], [0], [1], [0, 0, 1, 1], [], []>} : vector<16x20xf32>, vector<20x64xf32>, vector<16x64xf32> -> vector<16x64xf32>
    %cst_114 = arith.constant dense<0.000000e+00> : vector<16x64xf32>
    %225 = tpu.matmul %4, %224, %cst_114 {dimension_numbers = #tpu.dot_dimension_numbers<[1], [0], [0], [1], [0, 0, 1, 1], [], []>} : vector<16x16xf32>, vector<16x64xf32>, vector<16x64xf32> -> vector<16x64xf32>
    %226 = vector.broadcast %5 : vector<1x64xf32> to vector<16x64xf32>
    %227 = arith.addf %225, %226 : vector<16x64xf32>
    %cst_115 = arith.constant 0.999994993 : f32
    %228 = vector.broadcast %cst_115 : f32 to vector<16x64xf32>
    %229 = arith.mulf %228, %227 : vector<16x64xf32>
    %230 = math.tanh %229 : vector<16x64xf32>
    %c0_116 = arith.constant 0 : index
    %c0_117 = arith.constant 0 : index
    %c0_118 = arith.constant 0 : index
    %231 = vector.load %arg11[%c0_116, %c0_117, %c0_118] : memref<4x64x64xf32, #tpu.memory_space<vmem>>, vector<1x64x64xf32>
    %232 = vector.shape_cast %231 : vector<1x64x64xf32> to vector<64x64xf32>
    %c0_119 = arith.constant 0 : index
    %c0_120 = arith.constant 0 : index
    %c0_121 = arith.constant 0 : index
    %233 = vector.load %arg12[%c0_119, %c0_120, %c0_121] : memref<4x16x16xf32, #tpu.memory_space<vmem>>, vector<1x16x16xf32>
    %234 = vector.shape_cast %233 : vector<1x16x16xf32> to vector<16x16xf32>
    %c0_122 = arith.constant 0 : index
    %c0_123 = arith.constant 0 : index
    %c0_124 = arith.constant 0 : index
    %235 = vector.load %arg13[%c0_122, %c0_123, %c0_124] : memref<4x1x64xf32, #tpu.memory_space<vmem>>, vector<1x1x64xf32>
    %236 = vector.shape_cast %235 : vector<1x1x64xf32> to vector<1x64xf32>
    %cst_125 = arith.constant dense<0.000000e+00> : vector<16x64xf32>
    %237 = tpu.matmul %230, %232, %cst_125 {dimension_numbers = #tpu.dot_dimension_numbers<[1], [0], [0], [1], [0, 0, 1, 1], [], []>} : vector<16x64xf32>, vector<64x64xf32>, vector<16x64xf32> -> vector<16x64xf32>
    %cst_126 = arith.constant dense<0.000000e+00> : vector<16x64xf32>
    %238 = tpu.matmul %234, %237, %cst_126 {dimension_numbers = #tpu.dot_dimension_numbers<[1], [0], [0], [1], [0, 0, 1, 1], [], []>} : vector<16x16xf32>, vector<16x64xf32>, vector<16x64xf32> -> vector<16x64xf32>
    %239 = vector.broadcast %236 : vector<1x64xf32> to vector<16x64xf32>
    %240 = arith.addf %238, %239 : vector<16x64xf32>
    %cst_127 = arith.constant 0.999994993 : f32
    %241 = vector.broadcast %cst_127 : f32 to vector<16x64xf32>
    %242 = arith.mulf %241, %240 : vector<16x64xf32>
    %243 = math.tanh %242 : vector<16x64xf32>
    %c1_128 = arith.constant 1 : index
    %c0_129 = arith.constant 0 : index
    %c0_130 = arith.constant 0 : index
    %244 = vector.load %arg11[%c1_128, %c0_129, %c0_130] : memref<4x64x64xf32, #tpu.memory_space<vmem>>, vector<1x64x64xf32>
    %245 = vector.shape_cast %244 : vector<1x64x64xf32> to vector<64x64xf32>
    %c1_131 = arith.constant 1 : index
    %c0_132 = arith.constant 0 : index
    %c0_133 = arith.constant 0 : index
    %246 = vector.load %arg12[%c1_131, %c0_132, %c0_133] : memref<4x16x16xf32, #tpu.memory_space<vmem>>, vector<1x16x16xf32>
    %247 = vector.shape_cast %246 : vector<1x16x16xf32> to vector<16x16xf32>
    %c1_134 = arith.constant 1 : index
    %c0_135 = arith.constant 0 : index
    %c0_136 = arith.constant 0 : index
    %248 = vector.load %arg13[%c1_134, %c0_135, %c0_136] : memref<4x1x64xf32, #tpu.memory_space<vmem>>, vector<1x1x64xf32>
    %249 = vector.shape_cast %248 : vector<1x1x64xf32> to vector<1x64xf32>
    %cst_137 = arith.constant dense<0.000000e+00> : vector<16x64xf32>
    %250 = tpu.matmul %243, %245, %cst_137 {dimension_numbers = #tpu.dot_dimension_numbers<[1], [0], [0], [1], [0, 0, 1, 1], [], []>} : vector<16x64xf32>, vector<64x64xf32>, vector<16x64xf32> -> vector<16x64xf32>
    %cst_138 = arith.constant dense<0.000000e+00> : vector<16x64xf32>
    %251 = tpu.matmul %247, %250, %cst_138 {dimension_numbers = #tpu.dot_dimension_numbers<[1], [0], [0], [1], [0, 0, 1, 1], [], []>} : vector<16x16xf32>, vector<16x64xf32>, vector<16x64xf32> -> vector<16x64xf32>
    %252 = vector.broadcast %249 : vector<1x64xf32> to vector<16x64xf32>
    %253 = arith.addf %251, %252 : vector<16x64xf32>
    %cst_139 = arith.constant 0.999994993 : f32
    %254 = vector.broadcast %cst_139 : f32 to vector<16x64xf32>
    %255 = arith.mulf %254, %253 : vector<16x64xf32>
    %256 = math.tanh %255 : vector<16x64xf32>
    %257 = arith.addf %256, %230 : vector<16x64xf32>
    %c2_140 = arith.constant 2 : index
    %c0_141 = arith.constant 0 : index
    %c0_142 = arith.constant 0 : index
    %258 = vector.load %arg11[%c2_140, %c0_141, %c0_142] : memref<4x64x64xf32, #tpu.memory_space<vmem>>, vector<1x64x64xf32>
    %259 = vector.shape_cast %258 : vector<1x64x64xf32> to vector<64x64xf32>
    %c2_143 = arith.constant 2 : index
    %c0_144 = arith.constant 0 : index
    %c0_145 = arith.constant 0 : index
    %260 = vector.load %arg12[%c2_143, %c0_144, %c0_145] : memref<4x16x16xf32, #tpu.memory_space<vmem>>, vector<1x16x16xf32>
    %261 = vector.shape_cast %260 : vector<1x16x16xf32> to vector<16x16xf32>
    %c2_146 = arith.constant 2 : index
    %c0_147 = arith.constant 0 : index
    %c0_148 = arith.constant 0 : index
    %262 = vector.load %arg13[%c2_146, %c0_147, %c0_148] : memref<4x1x64xf32, #tpu.memory_space<vmem>>, vector<1x1x64xf32>
    %263 = vector.shape_cast %262 : vector<1x1x64xf32> to vector<1x64xf32>
    %cst_149 = arith.constant dense<0.000000e+00> : vector<16x64xf32>
    %264 = tpu.matmul %257, %259, %cst_149 {dimension_numbers = #tpu.dot_dimension_numbers<[1], [0], [0], [1], [0, 0, 1, 1], [], []>} : vector<16x64xf32>, vector<64x64xf32>, vector<16x64xf32> -> vector<16x64xf32>
    %cst_150 = arith.constant dense<0.000000e+00> : vector<16x64xf32>
    %265 = tpu.matmul %261, %264, %cst_150 {dimension_numbers = #tpu.dot_dimension_numbers<[1], [0], [0], [1], [0, 0, 1, 1], [], []>} : vector<16x16xf32>, vector<16x64xf32>, vector<16x64xf32> -> vector<16x64xf32>
    %266 = vector.broadcast %263 : vector<1x64xf32> to vector<16x64xf32>
    %267 = arith.addf %265, %266 : vector<16x64xf32>
    %cst_151 = arith.constant 0.999994993 : f32
    %268 = vector.broadcast %cst_151 : f32 to vector<16x64xf32>
    %269 = arith.mulf %268, %267 : vector<16x64xf32>
    %270 = math.tanh %269 : vector<16x64xf32>
    %c3_152 = arith.constant 3 : index
    %c0_153 = arith.constant 0 : index
    %c0_154 = arith.constant 0 : index
    %271 = vector.load %arg11[%c3_152, %c0_153, %c0_154] : memref<4x64x64xf32, #tpu.memory_space<vmem>>, vector<1x64x64xf32>
    %272 = vector.shape_cast %271 : vector<1x64x64xf32> to vector<64x64xf32>
    %c3_155 = arith.constant 3 : index
    %c0_156 = arith.constant 0 : index
    %c0_157 = arith.constant 0 : index
    %273 = vector.load %arg12[%c3_155, %c0_156, %c0_157] : memref<4x16x16xf32, #tpu.memory_space<vmem>>, vector<1x16x16xf32>
    %274 = vector.shape_cast %273 : vector<1x16x16xf32> to vector<16x16xf32>
    %c3_158 = arith.constant 3 : index
    %c0_159 = arith.constant 0 : index
    %c0_160 = arith.constant 0 : index
    %275 = vector.load %arg13[%c3_158, %c0_159, %c0_160] : memref<4x1x64xf32, #tpu.memory_space<vmem>>, vector<1x1x64xf32>
    %276 = vector.shape_cast %275 : vector<1x1x64xf32> to vector<1x64xf32>
    %cst_161 = arith.constant dense<0.000000e+00> : vector<16x64xf32>
    %277 = tpu.matmul %270, %272, %cst_161 {dimension_numbers = #tpu.dot_dimension_numbers<[1], [0], [0], [1], [0, 0, 1, 1], [], []>} : vector<16x64xf32>, vector<64x64xf32>, vector<16x64xf32> -> vector<16x64xf32>
    %cst_162 = arith.constant dense<0.000000e+00> : vector<16x64xf32>
    %278 = tpu.matmul %274, %277, %cst_162 {dimension_numbers = #tpu.dot_dimension_numbers<[1], [0], [0], [1], [0, 0, 1, 1], [], []>} : vector<16x16xf32>, vector<16x64xf32>, vector<16x64xf32> -> vector<16x64xf32>
    %279 = vector.broadcast %276 : vector<1x64xf32> to vector<16x64xf32>
    %280 = arith.addf %278, %279 : vector<16x64xf32>
    %cst_163 = arith.constant 0.999994993 : f32
    %281 = vector.broadcast %cst_163 : f32 to vector<16x64xf32>
    %282 = arith.mulf %281, %280 : vector<16x64xf32>
    %283 = math.tanh %282 : vector<16x64xf32>
    %284 = arith.addf %283, %257 : vector<16x64xf32>
    %cst_164 = arith.constant dense<0.000000e+00> : vector<16x20xf32>
    %285 = tpu.matmul %284, %6, %cst_164 {dimension_numbers = #tpu.dot_dimension_numbers<[1], [0], [0], [1], [0, 0, 1, 1], [], []>} : vector<16x64xf32>, vector<64x20xf32>, vector<16x20xf32> -> vector<16x20xf32>
    %cst_165 = arith.constant dense<0.000000e+00> : vector<16x20xf32>
    %286 = tpu.matmul %7, %285, %cst_165 {dimension_numbers = #tpu.dot_dimension_numbers<[1], [0], [0], [1], [0, 0, 1, 1], [], []>} : vector<16x16xf32>, vector<16x20xf32>, vector<16x20xf32> -> vector<16x20xf32>
    %287 = vector.broadcast %8 : vector<1x20xf32> to vector<16x20xf32>
    %288 = arith.addf %286, %287 : vector<16x20xf32>
    %289 = arith.addf %288, %223 : vector<16x20xf32>
    %290 = vector.extract_strided_slice %289 {offsets = [0, 0], sizes = [16, 10], strides = [1, 1]} : vector<16x20xf32> to vector<16x10xf32>
    %291 = tpu.transpose %290, [1, 0] : vector<16x10xf32> -> vector<10x16xf32>
    %cst_166 = arith.constant dense<0.000000e+00> : vector<35x16xf32>
    %292 = tpu.matmul %2, %291, %cst_166 {dimension_numbers = #tpu.dot_dimension_numbers<[1], [0], [0], [1], [0, 0, 1, 1], [], []>} : vector<35x10xf32>, vector<10x16xf32>, vector<35x16xf32> -> vector<35x16xf32>
    %c0_167 = arith.constant 0 : index
    %c0_168 = arith.constant 0 : index
    %c0_169 = arith.constant 0 : index
    %293 = vector.load %arg17[%c0_167, %c0_168, %c0_169] : memref<2x35x16xf32, #tpu.memory_space<vmem>>, vector<1x35x16xf32>
    %294 = vector.shape_cast %293 : vector<1x35x16xf32> to vector<35x16xf32>
    %295 = vector.shape_cast %292 : vector<35x16xf32> to vector<1x35x16xf32>
    tpu.vector_store %arg17[%c0_167, %c0_168, %c0_169], %295 {strides = array<i32>} : memref<2x35x16xf32, #tpu.memory_space<vmem>>, vector<1x35x16xf32>,
    %c1_170 = arith.constant 1 : index
    %c0_171 = arith.constant 0 : index
    %c0_172 = arith.constant 0 : index
    %296 = vector.load %arg0[%c1_170, %c0_171, %c0_172] : memref<2x50x16xf32, #tpu.memory_space<vmem>>, vector<1x50x16xf32>
    %297 = vector.shape_cast %296 : vector<1x50x16xf32> to vector<50x16xf32>
    %298 = vector.extract_strided_slice %297 {offsets = [0, 0], sizes = [25, 16], strides = [1, 1]} : vector<50x16xf32> to vector<25x16xf32>
    %cst_173 = arith.constant 1.000000e-03 : f32
    %299 = vector.broadcast %cst_173 : f32 to vector<25x16xf32>
    %300 = arith.mulf %298, %299 : vector<25x16xf32>
    %301 = vector.extract_strided_slice %300 {offsets = [0, 0], sizes = [20, 16], strides = [1, 1]} : vector<25x16xf32> to vector<20x16xf32>
    %c0_174 = arith.constant 0 : index
    %c0_175 = arith.constant 0 : index
    %c0_176 = arith.constant 0 : index
    %302 = vector.load %arg1[%c0_174, %c0_175, %c0_176] : memref<6x16x64xf32, #tpu.memory_space<vmem>>, vector<1x16x64xf32>
    %303 = vector.shape_cast %302 : vector<1x16x64xf32> to vector<16x64xf32>
    %cst_177 = arith.constant dense<0.000000e+00> : vector<20x64xf32>
    %304 = tpu.matmul %301, %303, %cst_177 {dimension_numbers = #tpu.dot_dimension_numbers<[1], [0], [0], [1], [0, 0, 1, 1], [], []>} : vector<20x16xf32>, vector<16x64xf32>, vector<20x64xf32> -> vector<20x64xf32>
    %305 = vector.extract_strided_slice %300 {offsets = [1, 0], sizes = [20, 16], strides = [1, 1]} : vector<25x16xf32> to vector<20x16xf32>
    %c1_178 = arith.constant 1 : index
    %c0_179 = arith.constant 0 : index
    %c0_180 = arith.constant 0 : index
    %306 = vector.load %arg1[%c1_178, %c0_179, %c0_180] : memref<6x16x64xf32, #tpu.memory_space<vmem>>, vector<1x16x64xf32>
    %307 = vector.shape_cast %306 : vector<1x16x64xf32> to vector<16x64xf32>
    %cst_181 = arith.constant dense<0.000000e+00> : vector<20x64xf32>
    %308 = tpu.matmul %305, %307, %cst_181 {dimension_numbers = #tpu.dot_dimension_numbers<[1], [0], [0], [1], [0, 0, 1, 1], [], []>} : vector<20x16xf32>, vector<16x64xf32>, vector<20x64xf32> -> vector<20x64xf32>
    %309 = arith.addf %304, %308 : vector<20x64xf32>
    %310 = vector.extract_strided_slice %300 {offsets = [2, 0], sizes = [20, 16], strides = [1, 1]} : vector<25x16xf32> to vector<20x16xf32>
    %c2_182 = arith.constant 2 : index
    %c0_183 = arith.constant 0 : index
    %c0_184 = arith.constant 0 : index
    %311 = vector.load %arg1[%c2_182, %c0_183, %c0_184] : memref<6x16x64xf32, #tpu.memory_space<vmem>>, vector<1x16x64xf32>
    %312 = vector.shape_cast %311 : vector<1x16x64xf32> to vector<16x64xf32>
    %cst_185 = arith.constant dense<0.000000e+00> : vector<20x64xf32>
    %313 = tpu.matmul %310, %312, %cst_185 {dimension_numbers = #tpu.dot_dimension_numbers<[1], [0], [0], [1], [0, 0, 1, 1], [], []>} : vector<20x16xf32>, vector<16x64xf32>, vector<20x64xf32> -> vector<20x64xf32>
    %314 = arith.addf %309, %313 : vector<20x64xf32>
    %315 = vector.extract_strided_slice %300 {offsets = [3, 0], sizes = [20, 16], strides = [1, 1]} : vector<25x16xf32> to vector<20x16xf32>
    %c3_186 = arith.constant 3 : index
    %c0_187 = arith.constant 0 : index
    %c0_188 = arith.constant 0 : index
    %316 = vector.load %arg1[%c3_186, %c0_187, %c0_188] : memref<6x16x64xf32, #tpu.memory_space<vmem>>, vector<1x16x64xf32>
    %317 = vector.shape_cast %316 : vector<1x16x64xf32> to vector<16x64xf32>
    %cst_189 = arith.constant dense<0.000000e+00> : vector<20x64xf32>
    %318 = tpu.matmul %315, %317, %cst_189 {dimension_numbers = #tpu.dot_dimension_numbers<[1], [0], [0], [1], [0, 0, 1, 1], [], []>} : vector<20x16xf32>, vector<16x64xf32>, vector<20x64xf32> -> vector<20x64xf32>
    %319 = arith.addf %314, %318 : vector<20x64xf32>
    %320 = vector.extract_strided_slice %300 {offsets = [4, 0], sizes = [20, 16], strides = [1, 1]} : vector<25x16xf32> to vector<20x16xf32>
    %c4_190 = arith.constant 4 : index
    %c0_191 = arith.constant 0 : index
    %c0_192 = arith.constant 0 : index
    %321 = vector.load %arg1[%c4_190, %c0_191, %c0_192] : memref<6x16x64xf32, #tpu.memory_space<vmem>>, vector<1x16x64xf32>
    %322 = vector.shape_cast %321 : vector<1x16x64xf32> to vector<16x64xf32>
    %cst_193 = arith.constant dense<0.000000e+00> : vector<20x64xf32>
    %323 = tpu.matmul %320, %322, %cst_193 {dimension_numbers = #tpu.dot_dimension_numbers<[1], [0], [0], [1], [0, 0, 1, 1], [], []>} : vector<20x16xf32>, vector<16x64xf32>, vector<20x64xf32> -> vector<20x64xf32>
    %324 = arith.addf %319, %323 : vector<20x64xf32>
    %325 = vector.extract_strided_slice %300 {offsets = [5, 0], sizes = [20, 16], strides = [1, 1]} : vector<25x16xf32> to vector<20x16xf32>
    %c5_194 = arith.constant 5 : index
    %c0_195 = arith.constant 0 : index
    %c0_196 = arith.constant 0 : index
    %326 = vector.load %arg1[%c5_194, %c0_195, %c0_196] : memref<6x16x64xf32, #tpu.memory_space<vmem>>, vector<1x16x64xf32>
    %327 = vector.shape_cast %326 : vector<1x16x64xf32> to vector<16x64xf32>
    %cst_197 = arith.constant dense<0.000000e+00> : vector<20x64xf32>
    %328 = tpu.matmul %325, %327, %cst_197 {dimension_numbers = #tpu.dot_dimension_numbers<[1], [0], [0], [1], [0, 0, 1, 1], [], []>} : vector<20x16xf32>, vector<16x64xf32>, vector<20x64xf32> -> vector<20x64xf32>
    %329 = arith.addf %324, %328 : vector<20x64xf32>
    %cst_198 = arith.constant 0.000000e+00 : f32
    %330 = vector.broadcast %cst_198 : f32 to vector<20x64xf32>
    %331 = arith.maximumf %329, %330 : vector<20x64xf32>
    %332 = vector.extract_strided_slice %331 {offsets = [0, 0], sizes = [16, 64], strides = [1, 1]} : vector<20x64xf32> to vector<16x64xf32>
    %c0_199 = arith.constant 0 : index
    %c0_200 = arith.constant 0 : index
    %c0_201 = arith.constant 0 : index
    %333 = vector.load %arg2[%c0_199, %c0_200, %c0_201] : memref<5x64x64xf32, #tpu.memory_space<vmem>>, vector<1x64x64xf32>
    %334 = vector.shape_cast %333 : vector<1x64x64xf32> to vector<64x64xf32>
    %cst_202 = arith.constant dense<0.000000e+00> : vector<16x64xf32>
    %335 = tpu.matmul %332, %334, %cst_202 {dimension_numbers = #tpu.dot_dimension_numbers<[1], [0], [0], [1], [0, 0, 1, 1], [], []>} : vector<16x64xf32>, vector<64x64xf32>, vector<16x64xf32> -> vector<16x64xf32>
    %336 = vector.extract_strided_slice %331 {offsets = [1, 0], sizes = [16, 64], strides = [1, 1]} : vector<20x64xf32> to vector<16x64xf32>
    %c1_203 = arith.constant 1 : index
    %c0_204 = arith.constant 0 : index
    %c0_205 = arith.constant 0 : index
    %337 = vector.load %arg2[%c1_203, %c0_204, %c0_205] : memref<5x64x64xf32, #tpu.memory_space<vmem>>, vector<1x64x64xf32>
    %338 = vector.shape_cast %337 : vector<1x64x64xf32> to vector<64x64xf32>
    %cst_206 = arith.constant dense<0.000000e+00> : vector<16x64xf32>
    %339 = tpu.matmul %336, %338, %cst_206 {dimension_numbers = #tpu.dot_dimension_numbers<[1], [0], [0], [1], [0, 0, 1, 1], [], []>} : vector<16x64xf32>, vector<64x64xf32>, vector<16x64xf32> -> vector<16x64xf32>
    %340 = arith.addf %335, %339 : vector<16x64xf32>
    %341 = vector.extract_strided_slice %331 {offsets = [2, 0], sizes = [16, 64], strides = [1, 1]} : vector<20x64xf32> to vector<16x64xf32>
    %c2_207 = arith.constant 2 : index
    %c0_208 = arith.constant 0 : index
    %c0_209 = arith.constant 0 : index
    %342 = vector.load %arg2[%c2_207, %c0_208, %c0_209] : memref<5x64x64xf32, #tpu.memory_space<vmem>>, vector<1x64x64xf32>
    %343 = vector.shape_cast %342 : vector<1x64x64xf32> to vector<64x64xf32>
    %cst_210 = arith.constant dense<0.000000e+00> : vector<16x64xf32>
    %344 = tpu.matmul %341, %343, %cst_210 {dimension_numbers = #tpu.dot_dimension_numbers<[1], [0], [0], [1], [0, 0, 1, 1], [], []>} : vector<16x64xf32>, vector<64x64xf32>, vector<16x64xf32> -> vector<16x64xf32>
    %345 = arith.addf %340, %344 : vector<16x64xf32>
    %346 = vector.extract_strided_slice %331 {offsets = [3, 0], sizes = [16, 64], strides = [1, 1]} : vector<20x64xf32> to vector<16x64xf32>
    %c3_211 = arith.constant 3 : index
    %c0_212 = arith.constant 0 : index
    %c0_213 = arith.constant 0 : index
    %347 = vector.load %arg2[%c3_211, %c0_212, %c0_213] : memref<5x64x64xf32, #tpu.memory_space<vmem>>, vector<1x64x64xf32>
    %348 = vector.shape_cast %347 : vector<1x64x64xf32> to vector<64x64xf32>
    %cst_214 = arith.constant dense<0.000000e+00> : vector<16x64xf32>
    %349 = tpu.matmul %346, %348, %cst_214 {dimension_numbers = #tpu.dot_dimension_numbers<[1], [0], [0], [1], [0, 0, 1, 1], [], []>} : vector<16x64xf32>, vector<64x64xf32>, vector<16x64xf32> -> vector<16x64xf32>
    %350 = arith.addf %345, %349 : vector<16x64xf32>
    %351 = vector.extract_strided_slice %331 {offsets = [4, 0], sizes = [16, 64], strides = [1, 1]} : vector<20x64xf32> to vector<16x64xf32>
    %c4_215 = arith.constant 4 : index
    %c0_216 = arith.constant 0 : index
    %c0_217 = arith.constant 0 : index
    %352 = vector.load %arg2[%c4_215, %c0_216, %c0_217] : memref<5x64x64xf32, #tpu.memory_space<vmem>>, vector<1x64x64xf32>
    %353 = vector.shape_cast %352 : vector<1x64x64xf32> to vector<64x64xf32>
    %cst_218 = arith.constant dense<0.000000e+00> : vector<16x64xf32>
    %354 = tpu.matmul %351, %353, %cst_218 {dimension_numbers = #tpu.dot_dimension_numbers<[1], [0], [0], [1], [0, 0, 1, 1], [], []>} : vector<16x64xf32>, vector<64x64xf32>, vector<16x64xf32> -> vector<16x64xf32>
    %355 = arith.addf %350, %354 : vector<16x64xf32>
    %cst_219 = arith.constant 0.000000e+00 : f32
    %356 = vector.broadcast %cst_219 : f32 to vector<16x64xf32>
    %357 = arith.maximumf %355, %356 : vector<16x64xf32>
    %358 = vector.extract_strided_slice %297 {offsets = [40, 0], sizes = [10, 16], strides = [1, 1]} : vector<50x16xf32> to vector<10x16xf32>
    %cst_220 = arith.constant 1.000000e-03 : f32
    %359 = vector.broadcast %cst_220 : f32 to vector<10x16xf32>
    %360 = arith.mulf %358, %359 : vector<10x16xf32>
    %361 = vector.extract_strided_slice %360 {offsets = [0, 0], sizes = [5, 16], strides = [1, 1]} : vector<10x16xf32> to vector<5x16xf32>
    %c0_221 = arith.constant 0 : index
    %c0_222 = arith.constant 0 : index
    %c0_223 = arith.constant 0 : index
    %362 = vector.load %arg3[%c0_221, %c0_222, %c0_223] : memref<6x16x64xf32, #tpu.memory_space<vmem>>, vector<1x16x64xf32>
    %363 = vector.shape_cast %362 : vector<1x16x64xf32> to vector<16x64xf32>
    %cst_224 = arith.constant dense<0.000000e+00> : vector<5x64xf32>
    %364 = tpu.matmul %361, %363, %cst_224 {dimension_numbers = #tpu.dot_dimension_numbers<[1], [0], [0], [1], [0, 0, 1, 1], [], []>} : vector<5x16xf32>, vector<16x64xf32>, vector<5x64xf32> -> vector<5x64xf32>
    %365 = vector.extract_strided_slice %360 {offsets = [1, 0], sizes = [5, 16], strides = [1, 1]} : vector<10x16xf32> to vector<5x16xf32>
    %c1_225 = arith.constant 1 : index
    %c0_226 = arith.constant 0 : index
    %c0_227 = arith.constant 0 : index
    %366 = vector.load %arg3[%c1_225, %c0_226, %c0_227] : memref<6x16x64xf32, #tpu.memory_space<vmem>>, vector<1x16x64xf32>
    %367 = vector.shape_cast %366 : vector<1x16x64xf32> to vector<16x64xf32>
    %cst_228 = arith.constant dense<0.000000e+00> : vector<5x64xf32>
    %368 = tpu.matmul %365, %367, %cst_228 {dimension_numbers = #tpu.dot_dimension_numbers<[1], [0], [0], [1], [0, 0, 1, 1], [], []>} : vector<5x16xf32>, vector<16x64xf32>, vector<5x64xf32> -> vector<5x64xf32>
    %369 = arith.addf %364, %368 : vector<5x64xf32>
    %370 = vector.extract_strided_slice %360 {offsets = [2, 0], sizes = [5, 16], strides = [1, 1]} : vector<10x16xf32> to vector<5x16xf32>
    %c2_229 = arith.constant 2 : index
    %c0_230 = arith.constant 0 : index
    %c0_231 = arith.constant 0 : index
    %371 = vector.load %arg3[%c2_229, %c0_230, %c0_231] : memref<6x16x64xf32, #tpu.memory_space<vmem>>, vector<1x16x64xf32>
    %372 = vector.shape_cast %371 : vector<1x16x64xf32> to vector<16x64xf32>
    %cst_232 = arith.constant dense<0.000000e+00> : vector<5x64xf32>
    %373 = tpu.matmul %370, %372, %cst_232 {dimension_numbers = #tpu.dot_dimension_numbers<[1], [0], [0], [1], [0, 0, 1, 1], [], []>} : vector<5x16xf32>, vector<16x64xf32>, vector<5x64xf32> -> vector<5x64xf32>
    %374 = arith.addf %369, %373 : vector<5x64xf32>
    %375 = vector.extract_strided_slice %360 {offsets = [3, 0], sizes = [5, 16], strides = [1, 1]} : vector<10x16xf32> to vector<5x16xf32>
    %c3_233 = arith.constant 3 : index
    %c0_234 = arith.constant 0 : index
    %c0_235 = arith.constant 0 : index
    %376 = vector.load %arg3[%c3_233, %c0_234, %c0_235] : memref<6x16x64xf32, #tpu.memory_space<vmem>>, vector<1x16x64xf32>
    %377 = vector.shape_cast %376 : vector<1x16x64xf32> to vector<16x64xf32>
    %cst_236 = arith.constant dense<0.000000e+00> : vector<5x64xf32>
    %378 = tpu.matmul %375, %377, %cst_236 {dimension_numbers = #tpu.dot_dimension_numbers<[1], [0], [0], [1], [0, 0, 1, 1], [], []>} : vector<5x16xf32>, vector<16x64xf32>, vector<5x64xf32> -> vector<5x64xf32>
    %379 = arith.addf %374, %378 : vector<5x64xf32>
    %380 = vector.extract_strided_slice %360 {offsets = [4, 0], sizes = [5, 16], strides = [1, 1]} : vector<10x16xf32> to vector<5x16xf32>
    %c4_237 = arith.constant 4 : index
    %c0_238 = arith.constant 0 : index
    %c0_239 = arith.constant 0 : index
    %381 = vector.load %arg3[%c4_237, %c0_238, %c0_239] : memref<6x16x64xf32, #tpu.memory_space<vmem>>, vector<1x16x64xf32>
    %382 = vector.shape_cast %381 : vector<1x16x64xf32> to vector<16x64xf32>
    %cst_240 = arith.constant dense<0.000000e+00> : vector<5x64xf32>
    %383 = tpu.matmul %380, %382, %cst_240 {dimension_numbers = #tpu.dot_dimension_numbers<[1], [0], [0], [1], [0, 0, 1, 1], [], []>} : vector<5x16xf32>, vector<16x64xf32>, vector<5x64xf32> -> vector<5x64xf32>
    %384 = arith.addf %379, %383 : vector<5x64xf32>
    %385 = vector.extract_strided_slice %360 {offsets = [5, 0], sizes = [5, 16], strides = [1, 1]} : vector<10x16xf32> to vector<5x16xf32>
    %c5_241 = arith.constant 5 : index
    %c0_242 = arith.constant 0 : index
    %c0_243 = arith.constant 0 : index
    %386 = vector.load %arg3[%c5_241, %c0_242, %c0_243] : memref<6x16x64xf32, #tpu.memory_space<vmem>>, vector<1x16x64xf32>
    %387 = vector.shape_cast %386 : vector<1x16x64xf32> to vector<16x64xf32>
    %cst_244 = arith.constant dense<0.000000e+00> : vector<5x64xf32>
    %388 = tpu.matmul %385, %387, %cst_244 {dimension_numbers = #tpu.dot_dimension_numbers<[1], [0], [0], [1], [0, 0, 1, 1], [], []>} : vector<5x16xf32>, vector<16x64xf32>, vector<5x64xf32> -> vector<5x64xf32>
    %389 = arith.addf %384, %388 : vector<5x64xf32>
    %cst_245 = arith.constant 0.000000e+00 : f32
    %390 = vector.broadcast %cst_245 : f32 to vector<5x64xf32>
    %391 = arith.maximumf %389, %390 : vector<5x64xf32>
    %392 = vector.extract_strided_slice %391 {offsets = [0, 0], sizes = [1, 64], strides = [1, 1]} : vector<5x64xf32> to vector<1x64xf32>
    %c0_246 = arith.constant 0 : index
    %c0_247 = arith.constant 0 : index
    %c0_248 = arith.constant 0 : index
    %393 = vector.load %arg4[%c0_246, %c0_247, %c0_248] : memref<5x64x64xf32, #tpu.memory_space<vmem>>, vector<1x64x64xf32>
    %394 = vector.shape_cast %393 : vector<1x64x64xf32> to vector<64x64xf32>
    %cst_249 = arith.constant dense<0.000000e+00> : vector<1x64xf32>
    %395 = tpu.matmul %392, %394, %cst_249 {dimension_numbers = #tpu.dot_dimension_numbers<[1], [0], [0], [1], [0, 0, 1, 1], [], []>} : vector<1x64xf32>, vector<64x64xf32>, vector<1x64xf32> -> vector<1x64xf32>
    %396 = vector.extract_strided_slice %391 {offsets = [1, 0], sizes = [1, 64], strides = [1, 1]} : vector<5x64xf32> to vector<1x64xf32>
    %c1_250 = arith.constant 1 : index
    %c0_251 = arith.constant 0 : index
    %c0_252 = arith.constant 0 : index
    %397 = vector.load %arg4[%c1_250, %c0_251, %c0_252] : memref<5x64x64xf32, #tpu.memory_space<vmem>>, vector<1x64x64xf32>
    %398 = vector.shape_cast %397 : vector<1x64x64xf32> to vector<64x64xf32>
    %cst_253 = arith.constant dense<0.000000e+00> : vector<1x64xf32>
    %399 = tpu.matmul %396, %398, %cst_253 {dimension_numbers = #tpu.dot_dimension_numbers<[1], [0], [0], [1], [0, 0, 1, 1], [], []>} : vector<1x64xf32>, vector<64x64xf32>, vector<1x64xf32> -> vector<1x64xf32>
    %400 = arith.addf %395, %399 : vector<1x64xf32>
    %401 = vector.extract_strided_slice %391 {offsets = [2, 0], sizes = [1, 64], strides = [1, 1]} : vector<5x64xf32> to vector<1x64xf32>
    %c2_254 = arith.constant 2 : index
    %c0_255 = arith.constant 0 : index
    %c0_256 = arith.constant 0 : index
    %402 = vector.load %arg4[%c2_254, %c0_255, %c0_256] : memref<5x64x64xf32, #tpu.memory_space<vmem>>, vector<1x64x64xf32>
    %403 = vector.shape_cast %402 : vector<1x64x64xf32> to vector<64x64xf32>
    %cst_257 = arith.constant dense<0.000000e+00> : vector<1x64xf32>
    %404 = tpu.matmul %401, %403, %cst_257 {dimension_numbers = #tpu.dot_dimension_numbers<[1], [0], [0], [1], [0, 0, 1, 1], [], []>} : vector<1x64xf32>, vector<64x64xf32>, vector<1x64xf32> -> vector<1x64xf32>
    %405 = arith.addf %400, %404 : vector<1x64xf32>
    %406 = vector.extract_strided_slice %391 {offsets = [3, 0], sizes = [1, 64], strides = [1, 1]} : vector<5x64xf32> to vector<1x64xf32>
    %c3_258 = arith.constant 3 : index
    %c0_259 = arith.constant 0 : index
    %c0_260 = arith.constant 0 : index
    %407 = vector.load %arg4[%c3_258, %c0_259, %c0_260] : memref<5x64x64xf32, #tpu.memory_space<vmem>>, vector<1x64x64xf32>
    %408 = vector.shape_cast %407 : vector<1x64x64xf32> to vector<64x64xf32>
    %cst_261 = arith.constant dense<0.000000e+00> : vector<1x64xf32>
    %409 = tpu.matmul %406, %408, %cst_261 {dimension_numbers = #tpu.dot_dimension_numbers<[1], [0], [0], [1], [0, 0, 1, 1], [], []>} : vector<1x64xf32>, vector<64x64xf32>, vector<1x64xf32> -> vector<1x64xf32>
    %410 = arith.addf %405, %409 : vector<1x64xf32>
    %411 = vector.extract_strided_slice %391 {offsets = [4, 0], sizes = [1, 64], strides = [1, 1]} : vector<5x64xf32> to vector<1x64xf32>
    %c4_262 = arith.constant 4 : index
    %c0_263 = arith.constant 0 : index
    %c0_264 = arith.constant 0 : index
    %412 = vector.load %arg4[%c4_262, %c0_263, %c0_264] : memref<5x64x64xf32, #tpu.memory_space<vmem>>, vector<1x64x64xf32>
    %413 = vector.shape_cast %412 : vector<1x64x64xf32> to vector<64x64xf32>
    %cst_265 = arith.constant dense<0.000000e+00> : vector<1x64xf32>
    %414 = tpu.matmul %411, %413, %cst_265 {dimension_numbers = #tpu.dot_dimension_numbers<[1], [0], [0], [1], [0, 0, 1, 1], [], []>} : vector<1x64xf32>, vector<64x64xf32>, vector<1x64xf32> -> vector<1x64xf32>
    %415 = arith.addf %410, %414 : vector<1x64xf32>
    %cst_266 = arith.constant 0.000000e+00 : f32
    %416 = vector.broadcast %cst_266 : f32 to vector<1x64xf32>
    %417 = arith.maximumf %415, %416 : vector<1x64xf32>
    %418 = tpu.transpose %357, [1, 0] : vector<16x64xf32> -> vector<64x16xf32>
    %cst_267 = arith.constant dense<0.000000e+00> : vector<1x16xf32>
    %419 = tpu.matmul %417, %418, %cst_267 {dimension_numbers = #tpu.dot_dimension_numbers<[1], [0], [0], [1], [0, 0, 1, 1], [], []>} : vector<1x64xf32>, vector<64x16xf32>, vector<1x16xf32> -> vector<1x16xf32>
    %cst_268 = arith.constant 1.000000e-15 : f32
    %420 = vector.broadcast %cst_268 : f32 to vector<1x16xf32>
    %421 = arith.addf %419, %420 : vector<1x16xf32>
    %cst_269 = arith.constant dense<0.000000e+00> : vector<1xf32>
    %422 = vector.multi_reduction <add>, %421, %cst_269 [1] : vector<1x16xf32> to vector<1xf32>
    %423 = vector.shape_cast %422 : vector<1xf32> to vector<1x1xf32>
    %424 = tpu.reciprocal %423 {approx = true} : vector<1x1xf32> -> vector<1x1xf32>
    %425 = vector.broadcast %424 : vector<1x1xf32> to vector<1x16xf32>
    %426 = arith.mulf %421, %425 : vector<1x16xf32>
    %427 = vector.extract_strided_slice %426 {offsets = [0, 0], sizes = [1, 1], strides = [1, 1]} : vector<1x16xf32> to vector<1x1xf32>
    %428 = vector.extract_strided_slice %297 {offsets = [0, 0], sizes = [35, 16], strides = [1, 1]} : vector<50x16xf32> to vector<35x16xf32>
    %429 = vector.broadcast %427 : vector<1x1xf32> to vector<35x16xf32>
    %430 = arith.mulf %429, %428 : vector<35x16xf32>
    %431 = vector.extract_strided_slice %426 {offsets = [0, 1], sizes = [1, 1], strides = [1, 1]} : vector<1x16xf32> to vector<1x1xf32>
    %432 = vector.extract_strided_slice %297 {offsets = [1, 0], sizes = [35, 16], strides = [1, 1]} : vector<50x16xf32> to vector<35x16xf32>
    %433 = vector.broadcast %431 : vector<1x1xf32> to vector<35x16xf32>
    %434 = arith.mulf %433, %432 : vector<35x16xf32>
    %435 = arith.addf %430, %434 : vector<35x16xf32>
    %436 = vector.extract_strided_slice %426 {offsets = [0, 2], sizes = [1, 1], strides = [1, 1]} : vector<1x16xf32> to vector<1x1xf32>
    %437 = vector.extract_strided_slice %297 {offsets = [2, 0], sizes = [35, 16], strides = [1, 1]} : vector<50x16xf32> to vector<35x16xf32>
    %438 = vector.broadcast %436 : vector<1x1xf32> to vector<35x16xf32>
    %439 = arith.mulf %438, %437 : vector<35x16xf32>
    %440 = arith.addf %435, %439 : vector<35x16xf32>
    %441 = vector.extract_strided_slice %426 {offsets = [0, 3], sizes = [1, 1], strides = [1, 1]} : vector<1x16xf32> to vector<1x1xf32>
    %442 = vector.extract_strided_slice %297 {offsets = [3, 0], sizes = [35, 16], strides = [1, 1]} : vector<50x16xf32> to vector<35x16xf32>
    %443 = vector.broadcast %441 : vector<1x1xf32> to vector<35x16xf32>
    %444 = arith.mulf %443, %442 : vector<35x16xf32>
    %445 = arith.addf %440, %444 : vector<35x16xf32>
    %446 = vector.extract_strided_slice %426 {offsets = [0, 4], sizes = [1, 1], strides = [1, 1]} : vector<1x16xf32> to vector<1x1xf32>
    %447 = vector.extract_strided_slice %297 {offsets = [4, 0], sizes = [35, 16], strides = [1, 1]} : vector<50x16xf32> to vector<35x16xf32>
    %448 = vector.broadcast %446 : vector<1x1xf32> to vector<35x16xf32>
    %449 = arith.mulf %448, %447 : vector<35x16xf32>
    %450 = arith.addf %445, %449 : vector<35x16xf32>
    %451 = vector.extract_strided_slice %426 {offsets = [0, 5], sizes = [1, 1], strides = [1, 1]} : vector<1x16xf32> to vector<1x1xf32>
    %452 = vector.extract_strided_slice %297 {offsets = [5, 0], sizes = [35, 16], strides = [1, 1]} : vector<50x16xf32> to vector<35x16xf32>
    %453 = vector.broadcast %451 : vector<1x1xf32> to vector<35x16xf32>
    %454 = arith.mulf %453, %452 : vector<35x16xf32>
    %455 = arith.addf %450, %454 : vector<35x16xf32>
    %456 = vector.extract_strided_slice %426 {offsets = [0, 6], sizes = [1, 1], strides = [1, 1]} : vector<1x16xf32> to vector<1x1xf32>
    %457 = vector.extract_strided_slice %297 {offsets = [6, 0], sizes = [35, 16], strides = [1, 1]} : vector<50x16xf32> to vector<35x16xf32>
    %458 = vector.broadcast %456 : vector<1x1xf32> to vector<35x16xf32>
    %459 = arith.mulf %458, %457 : vector<35x16xf32>
    %460 = arith.addf %455, %459 : vector<35x16xf32>
    %461 = vector.extract_strided_slice %426 {offsets = [0, 7], sizes = [1, 1], strides = [1, 1]} : vector<1x16xf32> to vector<1x1xf32>
    %462 = vector.extract_strided_slice %297 {offsets = [7, 0], sizes = [35, 16], strides = [1, 1]} : vector<50x16xf32> to vector<35x16xf32>
    %463 = vector.broadcast %461 : vector<1x1xf32> to vector<35x16xf32>
    %464 = arith.mulf %463, %462 : vector<35x16xf32>
    %465 = arith.addf %460, %464 : vector<35x16xf32>
    %466 = vector.extract_strided_slice %426 {offsets = [0, 8], sizes = [1, 1], strides = [1, 1]} : vector<1x16xf32> to vector<1x1xf32>
    %467 = vector.extract_strided_slice %297 {offsets = [8, 0], sizes = [35, 16], strides = [1, 1]} : vector<50x16xf32> to vector<35x16xf32>
    %468 = vector.broadcast %466 : vector<1x1xf32> to vector<35x16xf32>
    %469 = arith.mulf %468, %467 : vector<35x16xf32>
    %470 = arith.addf %465, %469 : vector<35x16xf32>
    %471 = vector.extract_strided_slice %426 {offsets = [0, 9], sizes = [1, 1], strides = [1, 1]} : vector<1x16xf32> to vector<1x1xf32>
    %472 = vector.extract_strided_slice %297 {offsets = [9, 0], sizes = [35, 16], strides = [1, 1]} : vector<50x16xf32> to vector<35x16xf32>
    %473 = vector.broadcast %471 : vector<1x1xf32> to vector<35x16xf32>
    %474 = arith.mulf %473, %472 : vector<35x16xf32>
    %475 = arith.addf %470, %474 : vector<35x16xf32>
    %476 = vector.extract_strided_slice %426 {offsets = [0, 10], sizes = [1, 1], strides = [1, 1]} : vector<1x16xf32> to vector<1x1xf32>
    %477 = vector.extract_strided_slice %297 {offsets = [10, 0], sizes = [35, 16], strides = [1, 1]} : vector<50x16xf32> to vector<35x16xf32>
    %478 = vector.broadcast %476 : vector<1x1xf32> to vector<35x16xf32>
    %479 = arith.mulf %478, %477 : vector<35x16xf32>
    %480 = arith.addf %475, %479 : vector<35x16xf32>
    %481 = vector.extract_strided_slice %426 {offsets = [0, 11], sizes = [1, 1], strides = [1, 1]} : vector<1x16xf32> to vector<1x1xf32>
    %482 = vector.extract_strided_slice %297 {offsets = [11, 0], sizes = [35, 16], strides = [1, 1]} : vector<50x16xf32> to vector<35x16xf32>
    %483 = vector.broadcast %481 : vector<1x1xf32> to vector<35x16xf32>
    %484 = arith.mulf %483, %482 : vector<35x16xf32>
    %485 = arith.addf %480, %484 : vector<35x16xf32>
    %486 = vector.extract_strided_slice %426 {offsets = [0, 12], sizes = [1, 1], strides = [1, 1]} : vector<1x16xf32> to vector<1x1xf32>
    %487 = vector.extract_strided_slice %297 {offsets = [12, 0], sizes = [35, 16], strides = [1, 1]} : vector<50x16xf32> to vector<35x16xf32>
    %488 = vector.broadcast %486 : vector<1x1xf32> to vector<35x16xf32>
    %489 = arith.mulf %488, %487 : vector<35x16xf32>
    %490 = arith.addf %485, %489 : vector<35x16xf32>
    %491 = vector.extract_strided_slice %426 {offsets = [0, 13], sizes = [1, 1], strides = [1, 1]} : vector<1x16xf32> to vector<1x1xf32>
    %492 = vector.extract_strided_slice %297 {offsets = [13, 0], sizes = [35, 16], strides = [1, 1]} : vector<50x16xf32> to vector<35x16xf32>
    %493 = vector.broadcast %491 : vector<1x1xf32> to vector<35x16xf32>
    %494 = arith.mulf %493, %492 : vector<35x16xf32>
    %495 = arith.addf %490, %494 : vector<35x16xf32>
    %496 = vector.extract_strided_slice %426 {offsets = [0, 14], sizes = [1, 1], strides = [1, 1]} : vector<1x16xf32> to vector<1x1xf32>
    %497 = vector.extract_strided_slice %297 {offsets = [14, 0], sizes = [35, 16], strides = [1, 1]} : vector<50x16xf32> to vector<35x16xf32>
    %498 = vector.broadcast %496 : vector<1x1xf32> to vector<35x16xf32>
    %499 = arith.mulf %498, %497 : vector<35x16xf32>
    %500 = arith.addf %495, %499 : vector<35x16xf32>
    %501 = vector.extract_strided_slice %426 {offsets = [0, 15], sizes = [1, 1], strides = [1, 1]} : vector<1x16xf32> to vector<1x1xf32>
    %502 = vector.extract_strided_slice %297 {offsets = [15, 0], sizes = [35, 16], strides = [1, 1]} : vector<50x16xf32> to vector<35x16xf32>
    %503 = vector.broadcast %501 : vector<1x1xf32> to vector<35x16xf32>
    %504 = arith.mulf %503, %502 : vector<35x16xf32>
    %505 = arith.addf %500, %504 : vector<35x16xf32>
    %cst_270 = arith.constant dense<0.000000e+00> : vector<10x16xf32>
    %506 = tpu.matmul %0, %505, %cst_270 {dimension_numbers = #tpu.dot_dimension_numbers<[1], [0], [0], [1], [0, 0, 1, 1], [], []>} : vector<10x35xf32>, vector<35x16xf32>, vector<10x16xf32> -> vector<10x16xf32>
    %507 = tpu.transpose %506, [1, 0] : vector<10x16xf32> -> vector<16x10xf32>
    %cst_271 = arith.constant dense<0.000000e+00> : vector<10x16xf32>
    %508 = tpu.matmul %1, %358, %cst_271 {dimension_numbers = #tpu.dot_dimension_numbers<[1], [0], [0], [1], [0, 0, 1, 1], [], []>} : vector<10x10xf32>, vector<10x16xf32>, vector<10x16xf32> -> vector<10x16xf32>
    %509 = tpu.transpose %508, [1, 0] : vector<10x16xf32> -> vector<16x10xf32>
    %510 = tpu.concatenate %509, %507 in 1 : vector<16x10xf32>, vector<16x10xf32> -> vector<16x20xf32>
    %cst_272 = arith.constant dense<0.000000e+00> : vector<16x64xf32>
    %511 = tpu.matmul %510, %3, %cst_272 {dimension_numbers = #tpu.dot_dimension_numbers<[1], [0], [0], [1], [0, 0, 1, 1], [], []>} : vector<16x20xf32>, vector<20x64xf32>, vector<16x64xf32> -> vector<16x64xf32>
    %cst_273 = arith.constant dense<0.000000e+00> : vector<16x64xf32>
    %512 = tpu.matmul %4, %511, %cst_273 {dimension_numbers = #tpu.dot_dimension_numbers<[1], [0], [0], [1], [0, 0, 1, 1], [], []>} : vector<16x16xf32>, vector<16x64xf32>, vector<16x64xf32> -> vector<16x64xf32>
    %513 = vector.broadcast %5 : vector<1x64xf32> to vector<16x64xf32>
    %514 = arith.addf %512, %513 : vector<16x64xf32>
    %cst_274 = arith.constant 0.999994993 : f32
    %515 = vector.broadcast %cst_274 : f32 to vector<16x64xf32>
    %516 = arith.mulf %515, %514 : vector<16x64xf32>
    %517 = math.tanh %516 : vector<16x64xf32>
    %c0_275 = arith.constant 0 : index
    %c0_276 = arith.constant 0 : index
    %c0_277 = arith.constant 0 : index
    %518 = vector.load %arg11[%c0_275, %c0_276, %c0_277] : memref<4x64x64xf32, #tpu.memory_space<vmem>>, vector<1x64x64xf32>
    %519 = vector.shape_cast %518 : vector<1x64x64xf32> to vector<64x64xf32>
    %c0_278 = arith.constant 0 : index
    %c0_279 = arith.constant 0 : index
    %c0_280 = arith.constant 0 : index
    %520 = vector.load %arg12[%c0_278, %c0_279, %c0_280] : memref<4x16x16xf32, #tpu.memory_space<vmem>>, vector<1x16x16xf32>
    %521 = vector.shape_cast %520 : vector<1x16x16xf32> to vector<16x16xf32>
    %c0_281 = arith.constant 0 : index
    %c0_282 = arith.constant 0 : index
    %c0_283 = arith.constant 0 : index
    %522 = vector.load %arg13[%c0_281, %c0_282, %c0_283] : memref<4x1x64xf32, #tpu.memory_space<vmem>>, vector<1x1x64xf32>
    %523 = vector.shape_cast %522 : vector<1x1x64xf32> to vector<1x64xf32>
    %cst_284 = arith.constant dense<0.000000e+00> : vector<16x64xf32>
    %524 = tpu.matmul %517, %519, %cst_284 {dimension_numbers = #tpu.dot_dimension_numbers<[1], [0], [0], [1], [0, 0, 1, 1], [], []>} : vector<16x64xf32>, vector<64x64xf32>, vector<16x64xf32> -> vector<16x64xf32>
    %cst_285 = arith.constant dense<0.000000e+00> : vector<16x64xf32>
    %525 = tpu.matmul %521, %524, %cst_285 {dimension_numbers = #tpu.dot_dimension_numbers<[1], [0], [0], [1], [0, 0, 1, 1], [], []>} : vector<16x16xf32>, vector<16x64xf32>, vector<16x64xf32> -> vector<16x64xf32>
    %526 = vector.broadcast %523 : vector<1x64xf32> to vector<16x64xf32>
    %527 = arith.addf %525, %526 : vector<16x64xf32>
    %cst_286 = arith.constant 0.999994993 : f32
    %528 = vector.broadcast %cst_286 : f32 to vector<16x64xf32>
    %529 = arith.mulf %528, %527 : vector<16x64xf32>
    %530 = math.tanh %529 : vector<16x64xf32>
    %c1_287 = arith.constant 1 : index
    %c0_288 = arith.constant 0 : index
    %c0_289 = arith.constant 0 : index
    %531 = vector.load %arg11[%c1_287, %c0_288, %c0_289] : memref<4x64x64xf32, #tpu.memory_space<vmem>>, vector<1x64x64xf32>
    %532 = vector.shape_cast %531 : vector<1x64x64xf32> to vector<64x64xf32>
    %c1_290 = arith.constant 1 : index
    %c0_291 = arith.constant 0 : index
    %c0_292 = arith.constant 0 : index
    %533 = vector.load %arg12[%c1_290, %c0_291, %c0_292] : memref<4x16x16xf32, #tpu.memory_space<vmem>>, vector<1x16x16xf32>
    %534 = vector.shape_cast %533 : vector<1x16x16xf32> to vector<16x16xf32>
    %c1_293 = arith.constant 1 : index
    %c0_294 = arith.constant 0 : index
    %c0_295 = arith.constant 0 : index
    %535 = vector.load %arg13[%c1_293, %c0_294, %c0_295] : memref<4x1x64xf32, #tpu.memory_space<vmem>>, vector<1x1x64xf32>
    %536 = vector.shape_cast %535 : vector<1x1x64xf32> to vector<1x64xf32>
    %cst_296 = arith.constant dense<0.000000e+00> : vector<16x64xf32>
    %537 = tpu.matmul %530, %532, %cst_296 {dimension_numbers = #tpu.dot_dimension_numbers<[1], [0], [0], [1], [0, 0, 1, 1], [], []>} : vector<16x64xf32>, vector<64x64xf32>, vector<16x64xf32> -> vector<16x64xf32>
    %cst_297 = arith.constant dense<0.000000e+00> : vector<16x64xf32>
    %538 = tpu.matmul %534, %537, %cst_297 {dimension_numbers = #tpu.dot_dimension_numbers<[1], [0], [0], [1], [0, 0, 1, 1], [], []>} : vector<16x16xf32>, vector<16x64xf32>, vector<16x64xf32> -> vector<16x64xf32>
    %539 = vector.broadcast %536 : vector<1x64xf32> to vector<16x64xf32>
    %540 = arith.addf %538, %539 : vector<16x64xf32>
    %cst_298 = arith.constant 0.999994993 : f32
    %541 = vector.broadcast %cst_298 : f32 to vector<16x64xf32>
    %542 = arith.mulf %541, %540 : vector<16x64xf32>
    %543 = math.tanh %542 : vector<16x64xf32>
    %544 = arith.addf %543, %517 : vector<16x64xf32>
    %c2_299 = arith.constant 2 : index
    %c0_300 = arith.constant 0 : index
    %c0_301 = arith.constant 0 : index
    %545 = vector.load %arg11[%c2_299, %c0_300, %c0_301] : memref<4x64x64xf32, #tpu.memory_space<vmem>>, vector<1x64x64xf32>
    %546 = vector.shape_cast %545 : vector<1x64x64xf32> to vector<64x64xf32>
    %c2_302 = arith.constant 2 : index
    %c0_303 = arith.constant 0 : index
    %c0_304 = arith.constant 0 : index
    %547 = vector.load %arg12[%c2_302, %c0_303, %c0_304] : memref<4x16x16xf32, #tpu.memory_space<vmem>>, vector<1x16x16xf32>
    %548 = vector.shape_cast %547 : vector<1x16x16xf32> to vector<16x16xf32>
    %c2_305 = arith.constant 2 : index
    %c0_306 = arith.constant 0 : index
    %c0_307 = arith.constant 0 : index
    %549 = vector.load %arg13[%c2_305, %c0_306, %c0_307] : memref<4x1x64xf32, #tpu.memory_space<vmem>>, vector<1x1x64xf32>
    %550 = vector.shape_cast %549 : vector<1x1x64xf32> to vector<1x64xf32>
    %cst_308 = arith.constant dense<0.000000e+00> : vector<16x64xf32>
    %551 = tpu.matmul %544, %546, %cst_308 {dimension_numbers = #tpu.dot_dimension_numbers<[1], [0], [0], [1], [0, 0, 1, 1], [], []>} : vector<16x64xf32>, vector<64x64xf32>, vector<16x64xf32> -> vector<16x64xf32>
    %cst_309 = arith.constant dense<0.000000e+00> : vector<16x64xf32>
    %552 = tpu.matmul %548, %551, %cst_309 {dimension_numbers = #tpu.dot_dimension_numbers<[1], [0], [0], [1], [0, 0, 1, 1], [], []>} : vector<16x16xf32>, vector<16x64xf32>, vector<16x64xf32> -> vector<16x64xf32>
    %553 = vector.broadcast %550 : vector<1x64xf32> to vector<16x64xf32>
    %554 = arith.addf %552, %553 : vector<16x64xf32>
    %cst_310 = arith.constant 0.999994993 : f32
    %555 = vector.broadcast %cst_310 : f32 to vector<16x64xf32>
    %556 = arith.mulf %555, %554 : vector<16x64xf32>
    %557 = math.tanh %556 : vector<16x64xf32>
    %c3_311 = arith.constant 3 : index
    %c0_312 = arith.constant 0 : index
    %c0_313 = arith.constant 0 : index
    %558 = vector.load %arg11[%c3_311, %c0_312, %c0_313] : memref<4x64x64xf32, #tpu.memory_space<vmem>>, vector<1x64x64xf32>
    %559 = vector.shape_cast %558 : vector<1x64x64xf32> to vector<64x64xf32>
    %c3_314 = arith.constant 3 : index
    %c0_315 = arith.constant 0 : index
    %c0_316 = arith.constant 0 : index
    %560 = vector.load %arg12[%c3_314, %c0_315, %c0_316] : memref<4x16x16xf32, #tpu.memory_space<vmem>>, vector<1x16x16xf32>
    %561 = vector.shape_cast %560 : vector<1x16x16xf32> to vector<16x16xf32>
    %c3_317 = arith.constant 3 : index
    %c0_318 = arith.constant 0 : index
    %c0_319 = arith.constant 0 : index
    %562 = vector.load %arg13[%c3_317, %c0_318, %c0_319] : memref<4x1x64xf32, #tpu.memory_space<vmem>>, vector<1x1x64xf32>
    %563 = vector.shape_cast %562 : vector<1x1x64xf32> to vector<1x64xf32>
    %cst_320 = arith.constant dense<0.000000e+00> : vector<16x64xf32>
    %564 = tpu.matmul %557, %559, %cst_320 {dimension_numbers = #tpu.dot_dimension_numbers<[1], [0], [0], [1], [0, 0, 1, 1], [], []>} : vector<16x64xf32>, vector<64x64xf32>, vector<16x64xf32> -> vector<16x64xf32>
    %cst_321 = arith.constant dense<0.000000e+00> : vector<16x64xf32>
    %565 = tpu.matmul %561, %564, %cst_321 {dimension_numbers = #tpu.dot_dimension_numbers<[1], [0], [0], [1], [0, 0, 1, 1], [], []>} : vector<16x16xf32>, vector<16x64xf32>, vector<16x64xf32> -> vector<16x64xf32>
    %566 = vector.broadcast %563 : vector<1x64xf32> to vector<16x64xf32>
    %567 = arith.addf %565, %566 : vector<16x64xf32>
    %cst_322 = arith.constant 0.999994993 : f32
    %568 = vector.broadcast %cst_322 : f32 to vector<16x64xf32>
    %569 = arith.mulf %568, %567 : vector<16x64xf32>
    %570 = math.tanh %569 : vector<16x64xf32>
    %571 = arith.addf %570, %544 : vector<16x64xf32>
    %cst_323 = arith.constant dense<0.000000e+00> : vector<16x20xf32>
    %572 = tpu.matmul %571, %6, %cst_323 {dimension_numbers = #tpu.dot_dimension_numbers<[1], [0], [0], [1], [0, 0, 1, 1], [], []>} : vector<16x64xf32>, vector<64x20xf32>, vector<16x20xf32> -> vector<16x20xf32>
    %cst_324 = arith.constant dense<0.000000e+00> : vector<16x20xf32>
    %573 = tpu.matmul %7, %572, %cst_324 {dimension_numbers = #tpu.dot_dimension_numbers<[1], [0], [0], [1], [0, 0, 1, 1], [], []>} : vector<16x16xf32>, vector<16x20xf32>, vector<16x20xf32> -> vector<16x20xf32>
    %574 = vector.broadcast %8 : vector<1x20xf32> to vector<16x20xf32>
    %575 = arith.addf %573, %574 : vector<16x20xf32>
    %576 = arith.addf %575, %510 : vector<16x20xf32>
    %577 = vector.extract_strided_slice %576 {offsets = [0, 0], sizes = [16, 10], strides = [1, 1]} : vector<16x20xf32> to vector<16x10xf32>
    %578 = tpu.transpose %577, [1, 0] : vector<16x10xf32> -> vector<10x16xf32>
    %cst_325 = arith.constant dense<0.000000e+00> : vector<35x16xf32>
    %579 = tpu.matmul %2, %578, %cst_325 {dimension_numbers = #tpu.dot_dimension_numbers<[1], [0], [0], [1], [0, 0, 1, 1], [], []>} : vector<35x10xf32>, vector<10x16xf32>, vector<35x16xf32> -> vector<35x16xf32>
    %c1_326 = arith.constant 1 : index
    %c0_327 = arith.constant 0 : index
    %c0_328 = arith.constant 0 : index
    %580 = vector.load %arg17[%c1_326, %c0_327, %c0_328] : memref<2x35x16xf32, #tpu.memory_space<vmem>>, vector<1x35x16xf32>
    %581 = vector.shape_cast %580 : vector<1x35x16xf32> to vector<35x16xf32>
    %582 = vector.shape_cast %579 : vector<35x16xf32> to vector<1x35x16xf32>
    tpu.vector_store %arg17[%c1_326, %c0_327, %c0_328], %582 {strides = array<i32>} : memref<2x35x16xf32, #tpu.memory_space<vmem>>, vector<1x35x16xf32>,
    return
  }
}

</mosaic_0001>

<bundles_post_ra>
// kernel: tpu_custom_call.1
= control target key start
LH: loop header
LB: loop body
LE: loop exit
PB: predicated region body
PF: predicated region fallthrough
CT: control target
= control target key end

     0   :  { %s12675_s0 = inlined_call_operand.vmem [shape: f32[2,50,16], index: 0, kind: input, shape index: {}]   ;;  %s12676_s1 = inlined_call_operand.hbm [shape: f32[6,16,64], index: 1, kind: input, shape index: {}]   ;;  %s12677_s2 = inlined_call_operand.hbm [shape: f32[5,64,64], index: 2, kind: input, shape index: {}]   ;;  %s12678_s3 = inlined_call_operand.hbm [shape: f32[6,16,64], index: 3, kind: input, shape index: {}]   ;;  %s12679_s4 = inlined_call_operand.hbm [shape: f32[5,64,64], index: 4, kind: input, shape index: {}]   ;;  %s12680_s5 = inlined_call_operand.hbm [shape: f32[10,35], index: 5, kind: input, shape index: {}]   ;;  %s12681_s6 = inlined_call_operand.hbm [shape: f32[10,10], index: 6, kind: input, shape index: {}]   ;;  %s12682_s7 = inlined_call_operand.vmem [shape: f32[35,10], index: 7, kind: input, shape index: {}]   ;;  %s12683_s8 = inlined_call_operand.hbm [shape: f32[20,64], index: 8, kind: input, shape index: {}]   ;;  %s12684_s9 = inlined_call_operand.hbm [shape: f32[16,16], index: 9, kind: input, shape index: {}]   ;;  %s12685_s10 = inlined_call_operand.vmem [shape: f32[1,64], index: 10, kind: input, shape index: {}]   ;;  %s12686_s11 = inlined_call_operand.vmem [shape: f32[4,64,64], index: 11, kind: input, shape index: {}]   ;;  %s12687_s12 = inlined_call_operand.vmem [shape: f32[4,16,16], index: 12, kind: input, shape index: {}]   ;;  %s12688_s13 = inlined_call_operand.hbm [shape: f32[4,1,64], index: 13, kind: input, shape index: {}]   ;;  %s12689_s14 = inlined_call_operand.vmem [shape: f32[64,20], index: 14, kind: input, shape index: {}]   ;;  %s12690_s15 = inlined_call_operand.vmem [shape: f32[16,16], index: 15, kind: input, shape index: {}]   ;;  %s12691_s16 = inlined_call_operand.vmem [shape: f32[1,20], index: 16, kind: input, shape index: {}]   ;;  %s12692_s17 = inlined_call_operand.vmem [shape: f32[2,35,16], index: 17, kind: output, shape index: {}]  }
   0x1   :  { %12703 = sst [smem:[#allocation21_spill]] %s12675_s0 }
   0x2   :  { %12704 = sst [smem:[#allocation22_spill]] %s12676_s1 }
   0x3   :  { %22 = vsyncpa [#allocation3], 0 }
   0x4   :  { %23 = vsyncpa [#allocation5], 0 }
   0x5   :  { %24 = vsyncpa [#allocation8], 0 }
   0x6   :  { %25 = vsyncpa [#allocation11], 0 }
   0x7   :  { %26 = vsyncpa [#allocation14], 0  ;;  %s10954_s24 = smov [#allocation4]   ;;  %s10955_s26 = smov [#allocation7]  }
   0x8   :  { %s46_s25 = sshll.u32 %s10954_s24, 4  ;;  %s70_s27 = sshll.u32 %s10955_s26, 4  ;;  %s47_s25 = int_to_ptr.vmem [resolvable:$true] %s46_s25  ;;  %s11077_s27 = int_to_ptr.vmem [resolvable:$true] %s70_s27 }
   0x9   :  { %s10746_s0 = scalar_lea.hbm %s12677_s2, 5120 }
   0xa   :  { %p10747_p0 = scmp.ne.s32.totalorder %s12677_s2, %s10746_s0  ;;  %p10750_p1 = scmp.lt.u32.totalorder %s10746_s0, %s12677_s2 }
   0xc   :  { %p10752_p2 = pnand %p10750_p1, %p10747_p0 }
   0xe   :  { %10755 = shalt.err (!%p10752_p2)
}
   0xf   :  { %s10756_s20 = scalar_lea.vmem %s47_s25, 5120  ;;  %p10761_p4 = scmp.lt.s32.totalorder %s47_s25, %s47_s25 }
  0x10   :  { %p10757_p3 = scmp.ne.s32.totalorder %s47_s25, %s10756_s20  ;;  %p10762_p5 = scmp.lt.s32.totalorder %s10756_s20, %s10756_s20 }
  0x12   :  { %p10763_p6 = por %p10762_p5, %p10761_p4 }
  0x14   :  { %p10764_p7 = pnand %p10763_p6, %p10757_p3 }
  0x16   :  { %10767 = shalt.err (!%p10764_p7)
}
  0x17   :  { %s10956_s21 = smov 128   ;;  %s10957_s22 = smov 8  }
  0x18   :  { %52 = dma.hbm_to_vmem [thread:$0]  %s12677_s2, 5120, %s47_s25, [#allocation5], %s10956_s21, %s10956_s21, %s10957_s22  }
  0x19   :  { %s10768_s29 = scalar_lea.hbm %s12679_s4, 5120 }
  0x1a   :  { %p10769_p8 = scmp.ne.s32.totalorder %s12679_s4, %s10768_s29  ;;  %p10772_p9 = scmp.lt.u32.totalorder %s10768_s29, %s12679_s4 }
  0x1c   :  { %p10774_p10 = pnand %p10772_p9, %p10769_p8 }
  0x1e   :  { %10777 = shalt.err (!%p10774_p10)
}
  0x1f   :  { %s10778_s1 = scalar_lea.vmem %s11077_s27, 5120  ;;  %p10783_p12 = scmp.lt.s32.totalorder %s11077_s27, %s11077_s27 }
  0x20   :  { %p10779_p11 = scmp.ne.s32.totalorder %s11077_s27, %s10778_s1  ;;  %p10784_p13 = scmp.lt.s32.totalorder %s10778_s1, %s10778_s1 }
  0x22   :  { %p10785_p0 = por %p10784_p13, %p10783_p12 }
  0x24   :  { %p10786_p1 = pnand %p10785_p0, %p10779_p11 }
  0x26   :  { %10789 = shalt.err (!%p10786_p1)
}
  0x27   :  { %76 = dma.hbm_to_vmem [thread:$0]  %s12679_s4, 5120, %s11077_s27, [#allocation8], %s10956_s21, %s10956_s21, %s10957_s22  }
  0x28   :  { %s10958_s20 = smov [#allocation10]   ;;  %s10959_s24 = smov [#allocation13]  }
  0x29   :  { %s94_s23 = sshll.u32 %s10958_s20, 4  ;;  %s120_s26 = sshll.u32 %s10959_s24, 4  ;;  %s95_s23 = int_to_ptr.vmem [resolvable:$true] %s94_s23  ;;  %s11114_s26 = int_to_ptr.vmem [resolvable:$true] %s120_s26 }
  0x2a   :  { %s10790_s0 = scalar_lea.hbm %s12681_s6, 256 }
  0x2b   :  { %p10791_p2 = scmp.ne.s32.totalorder %s12681_s6, %s10790_s0  ;;  %p10794_p3 = scmp.lt.u32.totalorder %s10790_s0, %s12681_s6 }
  0x2d   :  { %p10796_p4 = pnand %p10794_p3, %p10791_p2 }
  0x2f   :  { %10799 = shalt.err (!%p10796_p4)
}
  0x30   :  { %s10800_s4 = scalar_lea.vmem %s95_s23, 256  ;;  %p10805_p6 = scmp.lt.s32.totalorder %s95_s23, %s95_s23 }
  0x31   :  { %p10801_p5 = scmp.ne.s32.totalorder %s95_s23, %s10800_s4  ;;  %p10806_p7 = scmp.lt.s32.totalorder %s10800_s4, %s10800_s4 }
  0x33   :  { %p10807_p8 = por %p10806_p7, %p10805_p6 }
  0x35   :  { %p10808_p9 = pnand %p10807_p8, %p10801_p5 }
  0x37   :  { %10811 = shalt.err (!%p10808_p9)
}
  0x38   :  { %100 = dma.hbm_to_vmem [thread:$0]  %s12681_s6, 256, %s95_s23, [#allocation11], %s10956_s21, %s10956_s21, %s10957_s22  }
  0x39   :  { %s10812_s24 = scalar_lea.hbm %s12684_s9, 256 }
  0x3a   :  { %p10813_p10 = scmp.ne.s32.totalorder %s12684_s9, %s10812_s24  ;;  %p10816_p11 = scmp.lt.u32.totalorder %s10812_s24, %s12684_s9 }
  0x3c   :  { %p10818_p12 = pnand %p10816_p11, %p10813_p10 }
  0x3e   :  { %10821 = shalt.err (!%p10818_p12)
}
  0x3f   :  { %s10822_s18 = scalar_lea.vmem %s11114_s26, 256  ;;  %p10827_p0 = scmp.lt.s32.totalorder %s11114_s26, %s11114_s26 }
  0x40   :  { %p10823_p13 = scmp.ne.s32.totalorder %s11114_s26, %s10822_s18  ;;  %p10828_p1 = scmp.lt.s32.totalorder %s10822_s18, %s10822_s18 }
  0x42   :  { %p10829_p2 = por %p10828_p1, %p10827_p0 }
  0x44   :  { %p10830_p3 = pnand %p10829_p2, %p10823_p13 }
  0x46   :  { %10833 = shalt.err (!%p10830_p3)
}
  0x47   :  { %126 = dma.hbm_to_vmem [thread:$0]  %s12684_s9, 256, %s11114_s26, [#allocation14], %s10956_s21, %s10956_s21, %s10957_s22  }
  0x48   :  { %s10960_s19 = smov [#allocation2]   ;;  %s10961_s4 = smov [#allocation6]  }
  0x49   :  { %s34_s1 = sshll.u32 %s10960_s19, 4  ;;  %s58_s27 = sshll.u32 %s10961_s4, 4  ;;  %s35_s1 = int_to_ptr.vmem [resolvable:$true] %s34_s1  ;;  %s11151_s27 = int_to_ptr.vmem [resolvable:$true] %s58_s27 }
  0x4a   :  { %s12705_s20 = sld [smem:[#allocation22_spill]] }
  0x50   :  { %s10834_s24 = scalar_lea.hbm %s12705_s20, 1536 }
  0x51   :  { %p10835_p4 = scmp.ne.s32.totalorder %s12705_s20, %s10834_s24  ;;  %p10838_p5 = scmp.lt.u32.totalorder %s10834_s24, %s12705_s20 }
  0x53   :  { %p10840_p6 = pnand %p10838_p5, %p10835_p4 }
  0x55   :  { %10843 = shalt.err (!%p10840_p6)
}
  0x56   :  { %s10844_s9 = scalar_lea.vmem %s35_s1, 1536  ;;  %p10849_p8 = scmp.lt.s32.totalorder %s35_s1, %s35_s1 }
  0x57   :  { %p10845_p7 = scmp.ne.s32.totalorder %s35_s1, %s10844_s9  ;;  %p10850_p9 = scmp.lt.s32.totalorder %s10844_s9, %s10844_s9 }
  0x59   :  { %p10851_p10 = por %p10850_p9, %p10849_p8 }
  0x5b   :  { %p10852_p11 = pnand %p10851_p10, %p10845_p7 }
  0x5d   :  { %10855 = shalt.err (!%p10852_p11)
}
  0x5e   :  { %40 = dma.hbm_to_vmem [thread:$0]  %s12705_s20, 1536, %s35_s1, [#allocation3], %s10956_s21, %s10956_s21, %s10957_s22  }
  0x5f   :  { %s10856_s19 = scalar_lea.hbm %s12678_s3, 1536 }
  0x60   :  { %p10857_p12 = scmp.ne.s32.totalorder %s12678_s3, %s10856_s19  ;;  %p10860_p13 = scmp.lt.u32.totalorder %s10856_s19, %s12678_s3 }
  0x62   :  { %p10862_p0 = pnand %p10860_p13, %p10857_p12 }
  0x64   :  { %10865 = shalt.err (!%p10862_p0)
}
  0x65   :  { %s10866_s28 = scalar_lea.vmem %s11151_s27, 1536  ;;  %p10871_p2 = scmp.lt.s32.totalorder %s11151_s27, %s11151_s27 }
  0x66   :  { %p10867_p1 = scmp.ne.s32.totalorder %s11151_s27, %s10866_s28  ;;  %p10872_p3 = scmp.lt.s32.totalorder %s10866_s28, %s10866_s28 }
  0x68   :  { %p10873_p4 = por %p10872_p3, %p10871_p2 }
  0x6a   :  { %p10874_p5 = pnand %p10873_p4, %p10867_p1 }
  0x6c   :  { %10877 = shalt.err (!%p10874_p5)
}
  0x6d   :  { %64 = dma.hbm_to_vmem [thread:$0]  %s12678_s3, 1536, %s11151_s27, [#allocation5], %s10956_s21, %s10956_s21, %s10957_s22  }
  0x6e   :  { %s10962_s29 = smov [#allocation9]   ;;  %s10963_s30 = smov [#allocation12]  }
  0x6f   :  { %s82_s0 = sshll.u32 %s10962_s29, 4  ;;  %s108_s9 = sshll.u32 %s10963_s30, 4  ;;  %s83_s0 = int_to_ptr.vmem [resolvable:$true] %s82_s0  ;;  %s11188_s9 = int_to_ptr.vmem [resolvable:$true] %s108_s9 }
  0x70   :  { %s10878_s6 = scalar_lea.hbm %s12680_s5, 256 }
  0x71   :  { %p10879_p6 = scmp.ne.s32.totalorder %s12680_s5, %s10878_s6  ;;  %p10882_p7 = scmp.lt.u32.totalorder %s10878_s6, %s12680_s5 }
  0x73   :  { %p10884_p8 = pnand %p10882_p7, %p10879_p6 }
  0x75   :  { %10887 = shalt.err (!%p10884_p8)
}
  0x76   :  { %s10888_s3 = scalar_lea.vmem %s83_s0, 256  ;;  %p10893_p10 = scmp.lt.s32.totalorder %s83_s0, %s83_s0 }
  0x77   :  { %p10889_p9 = scmp.ne.s32.totalorder %s83_s0, %s10888_s3  ;;  %p10894_p11 = scmp.lt.s32.totalorder %s10888_s3, %s10888_s3 }
  0x79   :  { %p10895_p12 = por %p10894_p11, %p10893_p10 }
  0x7b   :  { %p10896_p13 = pnand %p10895_p12, %p10889_p9 }
  0x7d   :  { %10899 = shalt.err (!%p10896_p13)
}
  0x7e   :  { %88 = dma.hbm_to_vmem [thread:$0]  %s12680_s5, 256, %s83_s0, [#allocation8], %s10956_s21, %s10956_s21, %s10957_s22  }
  0x7f   :  { %s10900_s1 = scalar_lea.hbm %s12683_s8, 384 }
  0x80   :  { %p10901_p0 = scmp.ne.s32.totalorder %s12683_s8, %s10900_s1  ;;  %p10904_p1 = scmp.lt.u32.totalorder %s10900_s1, %s12683_s8 }
  0x82   :  { %p10906_p2 = pnand %p10904_p1, %p10901_p0 }
  0x84   :  { %10909 = shalt.err (!%p10906_p2)
}
  0x85   :  { %s10910_s18 = scalar_lea.vmem %s11188_s9, 384  ;;  %p10915_p4 = scmp.lt.s32.totalorder %s11188_s9, %s11188_s9 }
  0x86   :  { %p10911_p3 = scmp.ne.s32.totalorder %s11188_s9, %s10910_s18  ;;  %p10916_p5 = scmp.lt.s32.totalorder %s10910_s18, %s10910_s18 }
  0x88   :  { %p10917_p6 = por %p10916_p5, %p10915_p4 }
  0x8a   :  { %p10918_p7 = pnand %p10917_p6, %p10911_p3 }
  0x8c   :  { %10921 = shalt.err (!%p10918_p7)
}
  0x8d   :  { %114 = dma.hbm_to_vmem [thread:$0]  %s12683_s8, 384, %s11188_s9, [#allocation11], %s10956_s21, %s10956_s21, %s10957_s22  }
  0x8e   :  { %s10964_s6 = smov [#allocation15]   ;;  %s10922_s2 = scalar_lea.hbm %s12688_s13, 64 }
  0x8f   :  { %s138_s23 = sshll.u32 %s10964_s6, 4  ;;  %p10923_p8 = scmp.ne.s32.totalorder %s12688_s13, %s10922_s2  ;;  %s139_s23 = int_to_ptr.vmem [resolvable:$true] %s138_s23 }
  0x90   :  { %p10926_p9 = scmp.lt.u32.totalorder %s10922_s2, %s12688_s13 }
  0x92   :  { %p10928_p10 = pnand %p10926_p9, %p10923_p8 }
  0x94   :  { %10931 = shalt.err (!%p10928_p10)
}
  0x95   :  { %s10932_s28 = scalar_lea.vmem %s139_s23, 64  ;;  %p10937_p12 = scmp.lt.s32.totalorder %s139_s23, %s139_s23 }
  0x96   :  { %p10933_p11 = scmp.ne.s32.totalorder %s139_s23, %s10932_s28  ;;  %p10938_p13 = scmp.lt.s32.totalorder %s10932_s28, %s10932_s28 }
  0x98   :  { %p10939_p0 = por %p10938_p13, %p10937_p12 }
  0x9a   :  { %p10940_p1 = pnand %p10939_p0, %p10933_p11 }
  0x9c   :  { %10943 = shalt.err (!%p10940_p1)
}
  0x9d   :  { %s10965_s8 = smov 16   ;;  %s10966_s21 = smov 1  }
  0x9e   :  { %144 = dma.hbm_to_vmem [thread:$0]  %s12688_s13, 64, %s139_s23, [#allocation14], %s10965_s8, %s10965_s8, %s10966_s21  }
  0x9f   :  { %10944 = dma.done.wait [#allocation3], 1536  }
  0xa0   :  { %10945 = vsyncadd [#allocation3], 4294965760 }
  0xa1   :  { %10946 = dma.done.wait [#allocation5], 6656  }
  0xa2   :  { %10947 = vsyncadd [#allocation5], 4294960640 }
  0xa3   :  { %10948 = dma.done.wait [#allocation8], 5376  }
  0xa4   :  { %10949 = vsyncadd [#allocation8], 4294961920 }
  0xa5   :  { %10950 = dma.done.wait [#allocation11], 640  }
  0xa6   :  { %10951 = vsyncadd [#allocation11], 4294966656 }
  0xa7   :  { %10952 = dma.done.wait [#allocation14], 320  }
  0xa8   :  { %10953 = vsyncadd [#allocation14], 4294966976  ;;  %v10967_v0 = vmov 0.0|0.0   ;;  %vm12701_vm0 = vmmov 0   ;;  %v10969_v1 = vmov 0.0   ;;  %v215_v2 = vld [vmem:[#allocation2] sm:$0xff] }
  0xa9   :  { %9859 = vmatprep.subr.bf16.mxu0 %v10967_v0  ;;  %8869 = vmatprep.mubr.msk.f32.mxu0 %vm12701_vm0, %v10969_v1  ;;  %v216_v3 = vld [vmem:[#allocation2 + $0x8] sm:$0xff]  ;;  %s12706_s20 = sld [smem:[#allocation21_spill]]  ;;  %v403_v6 = vld [vmem:[#allocation2 + $0x20] sm:$0xff]  ;;  %vm229_vm1 = vcmask 130048   ;;  %v218_v12 = vld [vmem:[#allocation2 + $0x10] sm:$0xff]  ;;  %vm223_vm2 = vcmask 1046528  }
  0xaa   :  { %9856 = vmatprep.subr.bf16.mxu1 %v10967_v0  ;;  %8856 = vmatprep.mubr.msk.f32.mxu1 %vm12701_vm0, %v10969_v1  ;;  %v9860_v5 = vpack.c.bf16 %v216_v3, %v215_v2  ;;  %v404_v7 = vld [vmem:[#allocation2 + $0x28] sm:$0xff]  ;;  %v219_v13 = vld [vmem:[#allocation2 + $0x18] sm:$0xff]  ;;  %v800_v16 = vld [vmem:[#allocation4] sm:$0xff]  ;;  %vm405_vm3 = vcmask 1045504   ;;  %vm503_vm4 = vcmask 1044480   ;;  %vm601_vm5 = vcmask 1043456  }
  0xab   :  { %v9863_v9 = vpack.c.bf16 %v404_v7, %v403_v6  ;;  %v9857_v15 = vpack.c.bf16 %v219_v13, %v218_v12  ;;  %v801_v17 = vld [vmem:[#allocation4 + $0x8] sm:$0xff]  ;;  %v802_v20 = vld [vmem:[#allocation4 + $0x10] sm:$0xff]  ;;  %v803_v21 = vld [vmem:[#allocation4 + $0x18] sm:$0xff]  ;;  %vm700_vm6 = vcmask 1042432   ;;  %vm825_vm7 = vcmask 523264   ;;  %s10970_s2 = smov 126  }
  0xac   :  { %9861 = vmatpush3.bf16.msra.mxu0 %v9860_v5  ;;  %v9890_v24 = vpack.c.bf16 %v801_v17, %v800_v16  ;;  %v9894_v26 = vpack.c.bf16 %v803_v21, %v802_v20  ;;  %v501_v29 = vld [vmem:[#allocation2 + $0x30] sm:$0xff]  ;;  %v502_v30 = vld [vmem:[#allocation2 + $0x38] sm:$0xff]  ;;  %v599_v38 = vld [vmem:[#allocation2 + $0x40] sm:$0xff]  ;;  %vm2230_vm9 = vcmask 122880   ;;  %s10971_s3 = smov 127   ;;  %s10972_s27 = smov 125  }
  0xad   :  { %9862 = vmatprep.subr.bf16.mxu0 %v10967_v0  ;;  %9858 = vmatpush3.bf16.msra.mxu1 %v9857_v15  ;;  %v9866_v33 = vpack.c.bf16 %v502_v30, %v501_v29  ;;  %v600_v39 = vld [vmem:[#allocation2 + $0x48] sm:$0xff]  ;;  %v697_v46 = vld [vmem:[#allocation2 + $0x50] sm:$0xff]  ;;  %v698_v47 = vld [vmem:[#allocation2 + $0x58] sm:$0xff]  ;;  %s10973_s25 = smov 119   ;;  %s10974_s24 = smov 124   ;;  %vm2754_vm10 = vcmask 285696  }
  0xae   :  { %9891 = vmatprep.subr.bf16.mxu1 %v9890_v24  ;;  %v9869_v41 = vpack.c.bf16 %v600_v39, %v599_v38  ;;  %v9872_v49 = vpack.c.bf16 %v698_v47, %v697_v46  ;;  %v809_v61 = vld [vmem:[#allocation4 + $0x40] sm:$0xff]  ;;  %v810_v62 = vld [vmem:[#allocation4 + $0x48] sm:$0xff]  ;;  %v811_v5 = vld [vmem:[#allocation4 + $0x50] sm:$0xff]  ;;  %s12699_s28 = smov 117   ;;  %s10976_s8 = smov 123   ;;  %vm2432_vm11 = vcmask 1041408  }
  0xaf   :  { %v204_v4 = vld [vmem:[%s12706_s20] sm:$0xff]  ;;  %v11251_v10 = vld [vmem:[%s12706_s20 + $0x8] sm:$0xff]  ;;  %v206_v11 = vld [vmem:[%s12706_s20 + $0x10] sm:$0xff]  ;;  %v9874_v2 = vpack.c.bf16 %v810_v62, %v809_v61  ;;  %s12698_s21 = smov 115   ;;  %s10978_s22 = smov 122   ;;  %vm2471_vm12 = vcmask 1040384  }
  0xb0   :  { %v11246_v8 = vmul.f32 0.001, %v204_v4  ;;  %v11260_v14 = vmul.f32 0.001, %v11251_v10  ;;  %v11264_v18 = vmul.f32 0.001, %v206_v11  ;;  %vm11434_vm8 = vmpackc.low %vm825_vm7, %vm825_vm7 }
  0xb1   :  { %v11333_v54 = vld [vmem:[%s12706_s20 + $0x18] sm:$0xff]  ;;  %v804_v63 = vld [vmem:[#allocation4 + $0x20] sm:$0xff]  ;;  %v805_v3 = vld [vmem:[#allocation4 + $0x28] sm:$0xff]  ;;  %s12695_s9 = smov 113   ;;  %s10980_s13 = smov 121   ;;  %vm10985_vm13 = vmmov 1  }
  0xb2   :  { %8870 = vmatmul.mubr.msk.f32.vlgmr.msra.gmra.mrb[0].mxu0 %vm229_vm1, %v11246_v8  ;;  %v224_v19 = vrot.slane %v11246_v8, 1  ;;  %v225_v22 = vrot.slane %v11260_v14, 1  ;;  %v227_v23 = vrot.slane %v11264_v18, 1  ;;  %v406_v27 = vrot.slane %v11246_v8, 2  ;;  %v812_v6 = vld [vmem:[#allocation4 + $0x58] sm:$0xff]  ;;  %v806_v7 = vld [vmem:[#allocation4 + $0x30] sm:$0xff]  ;;  %vm11674_vm14 = vmpackc.low %vm2432_vm11, %vm10985_vm13 }
  0xb3   :  { %9864 = vmatpush3.bf16.msra.mxu0 %v9863_v9  ;;  %8872 = vmatprep.mubr.msk.f32.mxu0 %vm12701_vm0, %v10969_v1  ;;  %v407_v28 = vrot.slane %v11260_v14, 2  ;;  %v409_v34 = vrot.slane %v11264_v18, 2  ;;  %v504_v36 = vrot.slane %v11246_v8, 3  ;;  %v505_v37 = vrot.slane %v11260_v14, 3  ;;  %v807_v9 = vld [vmem:[#allocation4 + $0x38] sm:$0xff]  ;;  %v813_v12 = vld [vmem:[#allocation4 + $0x60] sm:$0xff] }
  0xb4   :  { %9865 = vmatprep.subr.bf16.mxu0 %v10967_v0  ;;  %v226_v25 = vsel %vm223_vm2, %v224_v19, %v225_v22  ;;  %v228_v31 = vsel %vm223_vm2, %v225_v22, %v227_v23  ;;  %v507_v42 = vrot.slane %v11264_v18, 3  ;;  %v602_v44 = vrot.slane %v11246_v8, 4  ;;  %v814_v13 = vld [vmem:[#allocation4 + $0x68] sm:$0xff]  ;;  %v816_v19 = vld [vmem:[#allocation4 + $0x78] sm:$0xff]  ;;  %v989_v38 = vld [vmem:[#allocation4 + $0xa0] sm:$0xff]  ;;  %s10981_s1 = smov 120  }
  0xb5   :  { %8857 = vmatmul.mubr.msk.f32.vlgmr.msra.gmra.mrb[0].mxu1 %vm229_vm1, %v226_v25  ;;  %v408_v32 = vsel %vm405_vm3, %v406_v27, %v407_v28  ;;  %v410_v35 = vsel %vm405_vm3, %v407_v28, %v409_v34  ;;  %v506_v40 = vsel %vm503_vm4, %v504_v36, %v505_v37  ;;  %v603_v45 = vrot.slane %v11260_v14, 4  ;;  %v986_v16 = vld [vmem:[#allocation4 + $0x88] sm:$0xff]  ;;  %s10982_s29 = smov 118   ;;  %s10983_s30 = smov 116  }
  0xb6   :  { %8873 = vmatmul.mubr.msk.f32.gmra.mrb[2].mxu0 %vm229_vm1, %v11260_v14  ;;  %8859 = vmatprep.mubr.msk.f32.mxu1 %vm12701_vm0, %v10969_v1  ;;  %v508_v43 = vsel %vm503_vm4, %v505_v37, %v507_v42  ;;  %v605_v50 = vrot.slane %v11264_v18, 4  ;;  %v701_v52 = vrot.slane %v11246_v8, 5  ;;  %v702_v53 = vrot.slane %v11260_v14, 5  ;;  %v985_v14 = vld [vmem:[#allocation4 + $0x80] sm:$0xff]  ;;  %v990_v39 = vld [vmem:[#allocation4 + $0xa8] sm:$0xff]  ;;  %s10984_s26 = smov 114  }
  0xb7   :  { %8875 = vmatprep.mubr.msk.f32.mxu0 %vm12701_vm0, %v10969_v1  ;;  %9893 = vmatpush3.bf16.msra.mxu1 %v9890_v24  ;;  %v604_v48 = vsel %vm601_vm5, %v602_v44, %v603_v45  ;;  %v704_v56 = vrot.slane %v11264_v18, 5  ;;  %v214_v57 = vmul.f32 0.001, %v11333_v54  ;;  %v9898_v4 = vpack.c.bf16 %v805_v3, %v804_v63 }
  0xb8   :  { %9895 = vmatprep.subr.bf16.mxu1 %v9894_v26  ;;  %v606_v51 = vsel %vm601_vm5, %v603_v45, %v605_v50  ;;  %v703_v55 = vsel %vm700_vm6, %v701_v52, %v702_v53  ;;  %v9878_v8 = vpack.c.bf16 %v812_v6, %v811_v5  ;;  %v9902_v11 = vpack.c.bf16 %v807_v9, %v806_v7  ;;  %v1274_v9 = vld [vmem:[#allocation6 + $0x8] sm:$0xff] }
  0xb9   :  { %8860 = vmatmul.mubr.msk.f32.gmra.mrb[2].mxu1 %vm229_vm1, %v228_v31  ;;  %v705_v58 = vsel %vm700_vm6, %v702_v53, %v704_v56  ;;  %v706_v59 = vrot.slane %v214_v57, 5  ;;  %v9882_v15 = vpack.c.bf16 %v814_v13, %v813_v12  ;;  %v9906_v17 = vpack.c.bf16 %v986_v16, %v985_v14  ;;  %v1080_v16 = vld [vmem:[#allocation4 + $0xc0] sm:$0xff] }
  0xba   :  { %8876 = vmatmul.mubr.msk.f32.gmra.mrb[4].mxu0 %vm229_vm1, %v11264_v18  ;;  %8862 = vmatprep.mubr.msk.f32.mxu1 %vm12701_vm0, %v10969_v1  ;;  %v815_v18 = vld [vmem:[#allocation4 + $0x70] sm:$0xff]  ;;  %v9914_v52 = vpack.c.bf16 %v990_v39, %v989_v38  ;;  %vm2871_vm15 = vcmask 80896   ;;  %vm12700_vm13 = vcmask 162816  }
  0xbb   :  { %8882 = vmatprep.mubr.msk.f32.mxu0 %vm12701_vm0, %v10969_v1  ;;  %9897 = vmatpush3.bf16.msra.mxu1 %v9894_v26  ;;  %v707_v60 = vsel %vm700_vm6, %v704_v56, %v706_v59  ;;  %v9886_v20 = vpack.c.bf16 %v816_v19, %v815_v18  ;;  %v991_v59 = vld [vmem:[#allocation4 + $0xb0] sm:$0xff] }
  0xbc   :  { %9899 = vmatprep.subr.bf16.mxu1 %v9898_v4  ;;  %v1177_v39 = vld [vmem:[#allocation4 + $0x110] sm:$0xff] }
  0xbd   :  { %8863 = vmatmul.mubr.msk.f32.gmra.mrb[4].mxu1 %vm229_vm1, %v227_v23 }
  0xbe   :  { %8883 = vmatmul.mubr.msk.f32.vlgmr.msra.gmra.mrb[0].mxu0 %vm229_vm1, %v408_v32  ;;  %v987_v32 = vld [vmem:[#allocation4 + $0x90] sm:$0xff] }
  0xbf   :  { %9867 = vmatpush3.bf16.msra.mxu0 %v9866_v33  ;;  %8885 = vmatprep.mubr.msk.f32.mxu0 %vm12701_vm0, %v10969_v1  ;;  %v988_v33 = vld [vmem:[#allocation4 + $0x98] sm:$0xff] }
  0xc0   :  { %9868 = vmatprep.subr.bf16.mxu0 %v10967_v0  ;;  %9901 = vmatpush3.bf16.msra.mxu1 %v9898_v4  ;;  %v9910_v37 = vpack.c.bf16 %v988_v33, %v987_v32  ;;  %v1503_v32 = vld [vmem:[#allocation6 + $0x38] sm:$0xff] }
  0xc1   :  { %9903 = vmatprep.subr.bf16.mxu1 %v9902_v11 }
  0xc2   :  { %8886 = vmatmul.mubr.msk.f32.gmra.mrb[2].mxu0 %vm229_vm1, %v410_v35 }
  0xc3   :  { %8888 = vmatprep.mubr.msk.f32.mxu0 %vm12701_vm0, %v10969_v1 }
  0xc4   :  { %9905 = vmatpush3.bf16.msra.mxu1 %v9902_v11 }
  0xc5   :  { %9907 = vmatprep.subr.bf16.mxu1 %v9906_v17 }
  0xc6   :  { %8889 = vmatmul.mubr.msk.f32.gmra.mrb[4].mxu0 %vm229_vm1, %v409_v34 }
  0xc7   :  { %8895 = vmatprep.mubr.msk.f32.mxu0 %vm12701_vm0, %v10969_v1 }
  0xca   :  { %8896 = vmatmul.mubr.msk.f32.vlgmr.msra.gmra.mrb[0].mxu0 %vm229_vm1, %v506_v40 }
  0xcb   :  { %9870 = vmatpush3.bf16.msra.mxu0 %v9869_v41  ;;  %8898 = vmatprep.mubr.msk.f32.mxu0 %vm12701_vm0, %v10969_v1 }
  0xcc   :  { %9871 = vmatprep.subr.bf16.mxu0 %v10967_v0 }
  0xce   :  { %8899 = vmatmul.mubr.msk.f32.gmra.mrb[2].mxu0 %vm229_vm1, %v508_v43  ;;  %v1276_v43 = vld [vmem:[#allocation6 + $0x10] sm:$0xff] }
  0xcf   :  { %8901 = vmatprep.mubr.msk.f32.mxu0 %vm12701_vm0, %v10969_v1 }
  0xd2   :  { %8902 = vmatmul.mubr.msk.f32.gmra.mrb[4].mxu0 %vm229_vm1, %v507_v42 }
  0xd3   :  { %8908 = vmatprep.mubr.msk.f32.mxu0 %vm12701_vm0, %v10969_v1 }
  0xd6   :  { %8909 = vmatmul.mubr.msk.f32.vlgmr.msra.gmra.mrb[0].mxu0 %vm229_vm1, %v604_v48 }
  0xd7   :  { %9873 = vmatpush3.bf16.msra.mxu0 %v9872_v49  ;;  %8911 = vmatprep.mubr.msk.f32.mxu0 %vm12701_vm0, %v10969_v1  ;;  %v1277_v49 = vld [vmem:[#allocation6 + $0x18] sm:$0xff] }
  0xd8   :  { %9875 = vmatprep.subr.bf16.mxu0 %v9874_v2  ;;  %v9955_v62 = vpack.c.bf16 %v1277_v49, %v1276_v43  ;;  %v210_v43 = vld [vmem:[%s12706_s20 + $0x30] sm:$0x3] }
  0xd9   :  { %v1272_v49 = vmul.f32 0.001, %v210_v43  ;;  %v1903_v43 = vld [vmem:[#allocation7 + $0x88] sm:$0xff] }
  0xda   :  { %8912 = vmatmul.mubr.msk.f32.gmra.mrb[2].mxu0 %vm229_vm1, %v606_v51 }
  0xdb   :  { %8914 = vmatprep.mubr.msk.f32.mxu0 %vm12701_vm0, %v10969_v1 }
  0xde   :  { %8915 = vmatmul.mubr.msk.f32.gmra.mrb[4].mxu0 %vm229_vm1, %v605_v50  ;;  %v11356_v50 = vld [vmem:[%s12706_s20 + $0x28] sm:$0xff] }
  0xdf   :  { %8921 = vmatprep.mubr.msk.f32.mxu0 %vm12701_vm0, %v10969_v1  ;;  %v11364_v63 = vmul.f32 0.001, %v11356_v50 }
  0xe2   :  { %8922 = vmatmul.mubr.msk.f32.vlgmr.msra.gmra.mrb[0].mxu0 %vm229_vm1, %v703_v55 }
  0xe3   :  { %8924 = vmatprep.mubr.msk.f32.mxu0 %vm12701_vm0, %v10969_v1  ;;  %9877 = vmatpush3.bf16.msra.mxu0 %v9874_v2 }
  0xe4   :  { %9879 = vmatprep.subr.bf16.mxu0 %v9878_v8 }
  0xe6   :  { %8925 = vmatmul.mubr.msk.f32.gmra.mrb[2].mxu0 %vm229_vm1, %v705_v58 }
  0xe7   :  { %8927 = vmatprep.mubr.msk.f32.mxu0 %vm12701_vm0, %v10969_v1  ;;  %9881 = vmatpush3.bf16.msra.mxu0 %v9878_v8  ;;  %v1273_v8 = vld [vmem:[#allocation6] sm:$0xff] }
  0xe8   :  { %9883 = vmatprep.subr.bf16.mxu0 %v9882_v15  ;;  %v9958_v18 = vpack.c.bf16 %v1274_v9, %v1273_v8  ;;  %v1751_v9 = vld [vmem:[#allocation7 + $0x60] sm:$0xff] }
  0xea   :  { %8928 = vmatmul.mubr.msk.f32.gmra.mrb[4].mxu0 %vm229_vm1, %v707_v60  ;;  %v992_v60 = vld [vmem:[#allocation4 + $0xb8] sm:$0xff] }
  0xeb   :  { %9885 = vmatpush3.bf16.msra.mxu0 %v9882_v15  ;;  %v9918_v7 = vpack.c.bf16 %v992_v60, %v991_v59  ;;  %v1279_v15 = vrot.slane %v11364_v63, 1 }
  0xec   :  { %9887 = vmatprep.subr.bf16.mxu0 %v9886_v20 }
  0xef   :  { %9889 = vmatpush3.bf16.msra.mxu0 %v9886_v20  ;;  %v1082_v20 = vld [vmem:[#allocation4 + $0xd0] sm:$0xff] }
  0xf0   :  { %9954 = vmatprep.subr.bf16.mxu0 %v10967_v0 }
 0x188   :  { %v302_v21 = vpop.f32.mrb[0].mxu1 }
 0x189   :  { %v8858_v22 = vpop.f32.mrb[1].mxu1 }
 0x18a   :  { %v1425_v22 = vld [vmem:[#allocation6 + $0x20] sm:$0xff] }
 0x18c   :  { %v307_v23 = vpop.f32.mrb[2].mxu1 }
 0x18d   :  { %v8861_v24 = vpop.f32.mrb[3].mxu1 }
 0x190   :  { %v312_v25 = vpop.f32.mrb[4].mxu1 }
 0x191   :  { %v8864_v26 = vpop.f32.mrb[5].mxu1 }
 0x192   :  { %v1085_v26 = vld [vmem:[#allocation4 + $0xe8] sm:$0xff] }
 0x1b5   :  { %v780_v27 = vpop.f32.mrb[0].mxu0 }
 0x1b6   :  { %v10468_v28 = vadd.f32 %v780_v27, %v302_v21  ;;  %v8923_v29 = vpop.f32.mrb[1].mxu0  ;;  %v1083_v21 = vld [vmem:[#allocation4 + $0xd8] sm:$0xff] }
 0x1b7   :  { %v9926_v24 = vpack.c.bf16 %v1083_v21, %v1082_v20  ;;  %v1086_v29 = vld [vmem:[#allocation4 + $0xf0] sm:$0xff] }
 0x1b8   :  { %v797_v30 = vmax.f32 %v10468_v28, 0.0 }
 0x1b9   :  { %v785_v31 = vpop.f32.mrb[2].mxu0 }
 0x1ba   :  { %v10469_v34 = vadd.f32 %v785_v31, %v307_v23  ;;  %v8926_v35 = vpop.f32.mrb[3].mxu0  ;;  %8965 = vmatprep.mubr.msk.f32.mxu1 %vm825_vm7, %v797_v30  ;;  %v820_v41 = vrot.slane %v797_v30, 1  ;;  %v993_v42 = vrot.slane %v797_v30, 2  ;;  %v1088_v44 = vrot.slane %v797_v30, 3  ;;  %v1426_v23 = vld [vmem:[#allocation6 + $0x28] sm:$0xff]  ;;  %v1502_v31 = vld [vmem:[#allocation6 + $0x30] sm:$0xff] }
 0x1bb   :  { %v1183_v53 = vrot.slane %v797_v30, 4  ;;  %v9961_v27 = vpack.c.bf16 %v1426_v23, %v1425_v22  ;;  %v1087_v30 = vld [vmem:[#allocation4 + $0xf8] sm:$0xff]  ;;  %v1175_v35 = vld [vmem:[#allocation4 + $0x100] sm:$0xff]  ;;  %v1739_v23 = vld [vmem:[#allocation7 + $0x8] sm:$0xff] }
 0x1bc   :  { %v798_v36 = vmax.f32 %v10469_v34, 0.0  ;;  %v9934_v33 = vpack.c.bf16 %v1087_v30, %v1086_v29  ;;  %v1427_v34 = vrot.slane %v11364_v63, 2  ;;  %v1738_v22 = vld [vmem:[#allocation7] sm:$0xff] }
 0x1bd   :  { %v790_v40 = vpop.f32.mrb[4].mxu0  ;;  %v9985_v30 = vpack.c.bf16 %v1739_v23, %v1738_v22 }
 0x1be   :  { %v10470_v45 = vadd.f32 %v790_v40, %v312_v25  ;;  %v8929_v46 = vpop.f32.mrb[5].mxu0  ;;  %8966 = vmatmul.mubr.msk.f32.vlgmr.msra.gmra.mrb[6].mxu1 %vm825_vm7, %v798_v36  ;;  %v821_v47 = vrot.slane %v798_v36, 1  ;;  %v994_v48 = vrot.slane %v798_v36, 2  ;;  %v1089_v51 = vrot.slane %v798_v36, 3  ;;  %v1084_v25 = vld [vmem:[#allocation4 + $0xe0] sm:$0xff]  ;;  %v1178_v40 = vld [vmem:[#allocation4 + $0x118] sm:$0xff] }
 0x1bf   :  { %9909 = vmatpush3.bf16.msra.mxu1 %v9906_v17  ;;  %v1184_v55 = vrot.slane %v798_v36, 4  ;;  %v1081_v17 = vld [vmem:[#allocation4 + $0xc8] sm:$0xff]  ;;  %v9930_v28 = vpack.c.bf16 %v1085_v26, %v1084_v25  ;;  %v1179_v46 = vld [vmem:[#allocation4 + $0x120] sm:$0xff] }
 0x1c0   :  { %v799_v56 = vmax.f32 %v10470_v45, 0.0  ;;  %v822_v57 = vsel %vm223_vm2, %v820_v41, %v821_v47  ;;  %9911 = vmatprep.subr.bf16.mxu1 %v9910_v37  ;;  %v995_v58 = vsel %vm405_vm3, %v993_v42, %v994_v48  ;;  %v1090_v61 = vsel %vm503_vm4, %v1088_v44, %v1089_v51  ;;  %v1176_v36 = vld [vmem:[#allocation4 + $0x108] sm:$0xff]  ;;  %v1579_v41 = vld [vmem:[#allocation6 + $0x40] sm:$0xff] }
 0x1c1   :  { %8946 = vmatprep.mubr.msk.f32.mxu0 %vm825_vm7, %v822_v57  ;;  %8984 = vmatprep.mubr.msk.f32.mxu1 %vm825_vm7, %v995_v58  ;;  %v11367_v2 = vsel %vm601_vm5, %v1183_v53, %v1184_v55  ;;  %v9922_v19 = vpack.c.bf16 %v1081_v17, %v1080_v16  ;;  %v9938_v38 = vpack.c.bf16 %v1176_v36, %v1175_v35  ;;  %v1580_v42 = vld [vmem:[#allocation6 + $0x48] sm:$0xff]  ;;  %v1504_v45 = vrot.slane %v11364_v63, 3  ;;  %v1182_v53 = vld [vmem:[#allocation4 + $0x138] sm:$0xff]  ;;  %v1659_v57 = vld [vmem:[#allocation6 + $0x50] sm:$0xff] }
 0x1c2   :  { %v823_v3 = vrot.slane %v799_v56, 1  ;;  %v996_v4 = vrot.slane %v799_v56, 2  ;;  %v1091_v5 = vrot.slane %v799_v56, 3  ;;  %v1186_v6 = vrot.slane %v799_v56, 4  ;;  %v1660_v58 = vld [vmem:[#allocation6 + $0x58] sm:$0xff]  ;;  %v1742_v36 = vld [vmem:[#allocation7 + $0x20] sm:$0xff] }
 0x1c3   :  { %9913 = vmatpush3.bf16.msra.mxu1 %v9910_v37  ;;  %v9964_v37 = vpack.c.bf16 %v1503_v32, %v1502_v31  ;;  %v9942_v44 = vpack.c.bf16 %v1178_v40, %v1177_v39  ;;  %v1583_v56 = vrot.slane %v1272_v49, 4  ;;  %v1744_v39 = vld [vmem:[#allocation7 + $0x30] sm:$0xff]  ;;  %v1745_v40 = vld [vmem:[#allocation7 + $0x38] sm:$0xff] }
 0x1c4   :  { %v824_v11 = vsel %vm223_vm2, %v821_v47, %v823_v3  ;;  %9915 = vmatprep.subr.bf16.mxu1 %v9914_v52  ;;  %v997_v12 = vsel %vm405_vm3, %v994_v48, %v996_v4  ;;  %v11372_v13 = vsel %vm503_vm4, %v1089_v51, %v1091_v5  ;;  %v11375_v14 = vsel %vm601_vm5, %v1184_v55, %v1186_v6  ;;  %v1180_v47 = vld [vmem:[#allocation4 + $0x128] sm:$0xff]  ;;  %v1749_v5 = vld [vmem:[#allocation7 + $0x50] sm:$0xff] }
 0x1c5   :  { %8947 = vmatmul.mubr.msk.f32.vlgmr.msra.gmra.mrb[6].mxu0 %vm825_vm7, %v824_v11  ;;  %v9967_v48 = vpack.c.bf16 %v1580_v42, %v1579_v41  ;;  %v9946_v51 = vpack.c.bf16 %v1180_v47, %v1179_v46  ;;  %v1582_v55 = vrot.slane %v11364_v63, 4  ;;  %v1748_v4 = vld [vmem:[#allocation7 + $0x48] sm:$0xff]  ;;  %v9994_v41 = vpack.c.bf16 %v1745_v40, %v1744_v39  ;;  %v1902_v42 = vld [vmem:[#allocation7 + $0x80] sm:$0xff]  ;;  %v1905_v46 = vld [vmem:[#allocation7 + $0x98] sm:$0xff] }
 0x1c6   :  { %9956 = vmatpush3.bf16.msra.mxu0 %v9955_v62  ;;  %9029 = vmatprep.mubr.msk.f32.mxu0 %vm12701_vm0, %v10969_v1  ;;  %v1661_v62 = vrot.slane %v11364_v63, 5  ;;  %v1752_v11 = vld [vmem:[#allocation7 + $0x68] sm:$0xff] }
 0x1c7   :  { %9917 = vmatpush3.bf16.msra.mxu1 %v9914_v52  ;;  %9957 = vmatprep.subr.bf16.mxu0 %v10967_v0  ;;  %v1181_v52 = vld [vmem:[#allocation4 + $0x130] sm:$0xff]  ;;  %v1584_v60 = vsel %vm601_vm5, %v1582_v55, %v1583_v56  ;;  %v1985_v56 = vld [vmem:[#allocation7 + $0xc0] sm:$0xff] }
 0x1c8   :  { %9919 = vmatprep.subr.bf16.mxu1 %v9918_v7  ;;  %v9950_v59 = vpack.c.bf16 %v1182_v53, %v1181_v52  ;;  %v1908_v52 = vld [vmem:[#allocation7 + $0xb0] sm:$0xff]  ;;  %v1909_v53 = vld [vmem:[#allocation7 + $0xb8] sm:$0xff] }
 0x1c9   :  { %9030 = vmatmul.mubr.msk.f32.vlgmr.msra.gmra.mrb[8].mxu0 %vm229_vm1, %v1279_v15  ;;  %v10006_v55 = vpack.c.bf16 %v1909_v53, %v1908_v52 }
 0x1ca   :  { %9959 = vmatpush3.bf16.msra.mxu0 %v9958_v18  ;;  %9036 = vmatprep.mubr.msk.f32.mxu0 %vm12701_vm0, %v10969_v1 }
 0x1cb   :  { %9921 = vmatpush3.bf16.msra.mxu1 %v9918_v7  ;;  %9960 = vmatprep.subr.bf16.mxu0 %v10967_v0  ;;  %v1750_v7 = vld [vmem:[#allocation7 + $0x58] sm:$0xff] }
 0x1cc   :  { %9923 = vmatprep.subr.bf16.mxu1 %v9922_v19  ;;  %v9976_v8 = vpack.c.bf16 %v1750_v7, %v1749_v5  ;;  %v1992_v5 = vld [vmem:[#allocation7 + $0xf8] sm:$0xff]  ;;  %v2068_v7 = vld [vmem:[#allocation7 + $0x100] sm:$0xff] }
 0x1ce   :  { %8985 = vmatmul.mubr.msk.f32.vlgmr.msra.gmra.mrb[6].mxu1 %vm825_vm7, %v997_v12  ;;  %v9979_v12 = vpack.c.bf16 %v1752_v11, %v1751_v9 }
 0x1cf   :  { %9925 = vmatpush3.bf16.msra.mxu1 %v9922_v19  ;;  %9003 = vmatprep.mubr.msk.f32.mxu1 %vm825_vm7, %v1090_v61  ;;  %v9970_v61 = vpack.c.bf16 %v1660_v58, %v1659_v57  ;;  %v1986_v57 = vld [vmem:[#allocation7 + $0xc8] sm:$0xff] }
 0x1d0   :  { %9927 = vmatprep.subr.bf16.mxu1 %v9926_v24  ;;  %v10009_v58 = vpack.c.bf16 %v1986_v57, %v1985_v56  ;;  %v11501_v56 = vld [vmem:[%s12706_s20 + $0x20] sm:$0xff] }
 0x1d1   :  { %9037 = vmatmul.mubr.msk.f32.vlgmr.msra.gmra.mrb[8].mxu0 %vm229_vm1, %v11364_v63  ;;  %v1747_v63 = vld [vmem:[#allocation7 + $0x40] sm:$0xff] }
 0x1d2   :  { %9962 = vmatpush3.bf16.msra.mxu0 %v9961_v27  ;;  %9043 = vmatprep.mubr.msk.f32.mxu0 %vm12701_vm0, %v10969_v1  ;;  %v9973_v6 = vpack.c.bf16 %v1748_v4, %v1747_v63  ;;  %v1991_v4 = vld [vmem:[#allocation7 + $0xf0] sm:$0xff] }
 0x1d3   :  { %9929 = vmatpush3.bf16.msra.mxu1 %v9926_v24  ;;  %9963 = vmatprep.subr.bf16.mxu0 %v10967_v0 }
 0x1d4   :  { %9931 = vmatprep.subr.bf16.mxu1 %v9930_v28 }
 0x1d7   :  { %9933 = vmatpush3.bf16.msra.mxu1 %v9930_v28 }
 0x1d8   :  { %9935 = vmatprep.subr.bf16.mxu1 %v9934_v33 }
 0x1d9   :  { %9044 = vmatmul.mubr.msk.f32.vlgmr.msra.gmra.mrb[8].mxu0 %vm229_vm1, %v1427_v34  ;;  %v1741_v34 = vld [vmem:[#allocation7 + $0x18] sm:$0xff] }
 0x1da   :  { %9965 = vmatpush3.bf16.msra.mxu0 %v9964_v37  ;;  %9050 = vmatprep.mubr.msk.f32.mxu0 %vm12701_vm0, %v10969_v1  ;;  %v1743_v37 = vld [vmem:[#allocation7 + $0x28] sm:$0xff] }
 0x1db   :  { %9937 = vmatpush3.bf16.msra.mxu1 %v9934_v33  ;;  %9966 = vmatprep.subr.bf16.mxu0 %v10967_v0  ;;  %v1740_v33 = vld [vmem:[#allocation7 + $0x10] sm:$0xff] }
 0x1dc   :  { %9939 = vmatprep.subr.bf16.mxu1 %v9938_v38  ;;  %v9988_v35 = vpack.c.bf16 %v1741_v34, %v1740_v33 }
 0x1de   :  { %9004 = vmatmul.mubr.msk.f32.vlgmr.msra.gmra.mrb[6].mxu1 %vm825_vm7, %v11372_v13  ;;  %v1753_v13 = vld [vmem:[#allocation7 + $0x70] sm:$0xff] }
 0x1df   :  { %9941 = vmatpush3.bf16.msra.mxu1 %v9938_v38  ;;  %9022 = vmatprep.mubr.msk.f32.mxu1 %vm825_vm7, %v11367_v2  ;;  %v1662_v2 = vrot.slane %v1272_v49, 5  ;;  %v9991_v38 = vpack.c.bf16 %v1743_v37, %v1742_v36  ;;  %v1907_v49 = vld [vmem:[#allocation7 + $0xa8] sm:$0xff]  ;;  %v178_v37 = vld [vmem:[#allocation9] sm:$0xff] }
 0x1e0   :  { %9943 = vmatprep.subr.bf16.mxu1 %v9942_v44 }
 0x1e1   :  { %9051 = vmatmul.mubr.msk.f32.vlgmr.msra.gmra.mrb[8].mxu0 %vm229_vm1, %v1504_v45  ;;  %v1663_v3 = vsel %vm700_vm6, %v1661_v62, %v1662_v2  ;;  %v1904_v45 = vld [vmem:[#allocation7 + $0x90] sm:$0xff]  ;;  %v1989_v2 = vld [vmem:[#allocation7 + $0xe0] sm:$0xff] }
 0x1e2   :  { %9968 = vmatpush3.bf16.msra.mxu0 %v9967_v48  ;;  %9057 = vmatprep.mubr.msk.f32.mxu0 %vm12701_vm0, %v10969_v1  ;;  %v10000_v47 = vpack.c.bf16 %v1905_v46, %v1904_v45  ;;  %v1906_v48 = vld [vmem:[#allocation7 + $0xa0] sm:$0xff] }
 0x1e3   :  { %9945 = vmatpush3.bf16.msra.mxu1 %v9942_v44  ;;  %9969 = vmatprep.subr.bf16.mxu0 %v10967_v0  ;;  %v9997_v44 = vpack.c.bf16 %v1903_v43, %v1902_v42 }
 0x1e4   :  { %9947 = vmatprep.subr.bf16.mxu1 %v9946_v51 }
 0x1e7   :  { %9949 = vmatpush3.bf16.msra.mxu1 %v9946_v51  ;;  %v10003_v51 = vpack.c.bf16 %v1907_v49, %v1906_v48 }
 0x1e8   :  { %9951 = vmatprep.subr.bf16.mxu1 %v9950_v59 }
 0x1e9   :  { %9058 = vmatmul.mubr.msk.f32.vlgmr.msra.gmra.mrb[8].mxu0 %vm229_vm1, %v1584_v60  ;;  %v1987_v60 = vld [vmem:[#allocation7 + $0xd0] sm:$0xff] }
 0x1ea   :  { %9971 = vmatpush3.bf16.msra.mxu0 %v9970_v61  ;;  %9064 = vmatprep.mubr.msk.f32.mxu0 %vm12701_vm0, %v10969_v1  ;;  %v1988_v61 = vld [vmem:[#allocation7 + $0xd8] sm:$0xff] }
 0x1eb   :  { %9953 = vmatpush3.bf16.msra.mxu1 %v9950_v59  ;;  %10032 = vmatprep.subr.bf16.mxu0 %v10967_v0  ;;  %v10012_v62 = vpack.c.bf16 %v1988_v61, %v1987_v60 }
 0x1ec   :  { %9972 = vmatprep.subr.bf16.mxu1 %v10967_v0 }
 0x1ee   :  { %9023 = vmatmul.mubr.msk.f32.vlgmr.msra.gmra.mrb[6].mxu1 %vm825_vm7, %v11375_v14  ;;  %v1754_v14 = vld [vmem:[#allocation7 + $0x78] sm:$0xff] }
 0x1ef   :  { %9083 = vmatprep.mubr.msk.f32.mxu1 %vm12701_vm0, %v10969_v1  ;;  %9974 = vmatpush3.bf16.msra.mxu1 %v9973_v6  ;;  %v9982_v15 = vpack.c.bf16 %v1754_v14, %v1753_v13  ;;  %v10018_v6 = vpack.c.bf16 %v1992_v5, %v1991_v4  ;;  %v2071_v13 = vld [vmem:[#allocation7 + $0x118] sm:$0xff] }
 0x1f0   :  { %9975 = vmatprep.subr.bf16.mxu1 %v10967_v0 }
 0x1f1   :  { %9065 = vmatmul.mubr.msk.f32.vlgmr.msra.gmra.mrb[8].mxu0 %vm229_vm1, %v1663_v3  ;;  %v1990_v3 = vld [vmem:[#allocation7 + $0xe8] sm:$0xff] }
 0x1f2   :  { %9166 = vmatprep.mubr.msk.f32.mxu0 %vm12701_vm0, %v10969_v1  ;;  %v10015_v63 = vpack.c.bf16 %v1990_v3, %v1989_v2 }
 0x1f3   :  { %9977 = vmatpush3.bf16.msra.mxu1 %v9976_v8  ;;  %v2069_v8 = vld [vmem:[#allocation7 + $0x108] sm:$0xff] }
 0x1f4   :  { %9978 = vmatprep.subr.bf16.mxu1 %v10967_v0  ;;  %v10021_v9 = vpack.c.bf16 %v2069_v8, %v2068_v7 }
 0x1f7   :  { %9980 = vmatpush3.bf16.msra.mxu1 %v9979_v12  ;;  %v2070_v12 = vld [vmem:[#allocation7 + $0x110] sm:$0xff] }
 0x1f8   :  { %9981 = vmatprep.subr.bf16.mxu1 %v10967_v0  ;;  %v10024_v14 = vpack.c.bf16 %v2071_v13, %v2070_v12 }
 0x1fb   :  { %9983 = vmatpush3.bf16.msra.mxu1 %v9982_v15  ;;  %v2072_v15 = vld [vmem:[#allocation7 + $0x120] sm:$0xff] }
 0x1fc   :  { %9984 = vmatprep.subr.bf16.mxu1 %v10967_v0 }
 0x298   :  { %v8948_v16 = vpop.f32.mrb[6].mxu0 }
 0x299   :  { %v896_v17 = vpop.f32.mrb[7].mxu0 }
 0x2c1   :  { %v9024_v18 = vpop.f32.mrb[6].mxu1 }
 0x2c2   :  { %v10471_v19 = vadd.f32 %v9024_v18, %v8948_v16  ;;  %v1258_v20 = vpop.f32.mrb[7].mxu1  ;;  %v2073_v16 = vld [vmem:[#allocation7 + $0x128] sm:$0xff]  ;;  %v2074_v18 = vld [vmem:[#allocation7 + $0x130] sm:$0xff] }
 0x2c3   :  { %v10472_v21 = vadd.f32 %v1258_v20, %v896_v17  ;;  %v10027_v17 = vpack.c.bf16 %v2073_v16, %v2072_v15 }
 0x2c4   :  { %v1270_v24 = vmax.f32 %v10471_v19, 0.0  ;;  %v1732_v25 = vpop.f32.mrb[8].mxu0  ;;  %v2075_v19 = vld [vmem:[#allocation7 + $0x138] sm:$0xff] }
 0x2c5   :  { %v1269_v26 = vmax.f32 %v10472_v21, 0.0  ;;  %v11430_v27 = vmax.f32 %v1732_v25, 0.0  ;;  %v9066_v28 = vpop.f32.mrb[9].mxu0  ;;  %v10030_v20 = vpack.c.bf16 %v2075_v19, %v2074_v18 }
 0x2c7   :  { %v10033_v31 = vpack.c.bf16 %v1270_v24, %v1269_v26  ;;  %v1756_v32 = vrot.slane %v11430_v27, 1  ;;  %v1910_v59 = vrot.slane %v11430_v27, 2  ;;  %v1993_v11 = vrot.slane %v11430_v27, 3 }
 0x2c8   :  { %v2076_v21 = vrot.slane %v11430_v27, 4 }
 0x2c9   :  { %10035 = vmatpush3.bf16.xpose.msk.msra.mxu0 %vm11434_vm8, %v10033_v31  ;;  %9084 = vmatmul.mubr.msk.f32.vlgmr.msra.gmra.mrb[8].mxu1 %vm825_vm7, %v1756_v32 }
 0x2ca   :  { %9986 = vmatpush3.bf16.msra.mxu1 %v9985_v30  ;;  %9102 = vmatprep.mubr.msk.f32.mxu1 %vm12701_vm0, %v10969_v1 }
 0x2cb   :  { %9987 = vmatprep.subr.bf16.mxu1 %v10967_v0 }
 0x2ce   :  { %9989 = vmatpush3.bf16.msra.mxu1 %v9988_v35 }
 0x2cf   :  { %9990 = vmatprep.subr.bf16.mxu1 %v10967_v0 }
 0x2d2   :  { %9992 = vmatpush3.bf16.msra.mxu1 %v9991_v38 }
 0x2d3   :  { %9993 = vmatprep.subr.bf16.mxu1 %v10967_v0 }
 0x2d6   :  { %9995 = vmatpush3.bf16.msra.mxu1 %v9994_v41 }
 0x2d7   :  { %9996 = vmatprep.subr.bf16.mxu1 %v10967_v0 }
 0x2d9   :  { %9103 = vmatmul.mubr.msk.f32.vlgmr.msra.gmra.mrb[8].mxu1 %vm825_vm7, %v11430_v27 }
 0x2da   :  { %9998 = vmatpush3.bf16.msra.mxu1 %v9997_v44  ;;  %9121 = vmatprep.mubr.msk.f32.mxu1 %vm12701_vm0, %v10969_v1 }
 0x2db   :  { %9999 = vmatprep.subr.bf16.mxu1 %v10967_v0 }
 0x2de   :  { %10001 = vmatpush3.bf16.msra.mxu1 %v10000_v47 }
 0x2df   :  { %10002 = vmatprep.subr.bf16.mxu1 %v10967_v0 }
 0x2e2   :  { %10004 = vmatpush3.bf16.msra.mxu1 %v10003_v51  ;;  %v11494_v51 = vld [vmem:[%s12706_s20] sm:$0xff] }
 0x2e3   :  { %10005 = vmatprep.subr.bf16.mxu1 %v10967_v0 }
 0x2e6   :  { %10007 = vmatpush3.bf16.msra.mxu1 %v10006_v55 }
 0x2e7   :  { %10008 = vmatprep.subr.bf16.mxu1 %v10967_v0 }
 0x2e9   :  { %9122 = vmatmul.mubr.msk.f32.vlgmr.msra.gmra.mrb[8].mxu1 %vm825_vm7, %v1910_v59 }
 0x2ea   :  { %10010 = vmatpush3.bf16.msra.mxu1 %v10009_v58  ;;  %9140 = vmatprep.mubr.msk.f32.mxu1 %vm12701_vm0, %v10969_v1  ;;  %v11507_v58 = vld [vmem:[%s12706_s20 + $0x8] sm:$0xff] }
 0x2eb   :  { %10011 = vmatprep.subr.bf16.mxu1 %v10967_v0 }
 0x2ee   :  { %10013 = vmatpush3.bf16.msra.mxu1 %v10012_v62 }
 0x2ef   :  { %10014 = vmatprep.subr.bf16.mxu1 %v10967_v0 }
 0x2f2   :  { %10016 = vmatpush3.bf16.msra.mxu1 %v10015_v63 }
 0x2f3   :  { %10017 = vmatprep.subr.bf16.mxu1 %v10967_v0 }
 0x2f6   :  { %10019 = vmatpush3.bf16.msra.mxu1 %v10018_v6 }
 0x2f7   :  { %10020 = vmatprep.subr.bf16.mxu1 %v10967_v0 }
 0x2f9   :  { %9141 = vmatmul.mubr.msk.f32.vlgmr.msra.gmra.mrb[8].mxu1 %vm825_vm7, %v1993_v11 }
 0x2fa   :  { %10022 = vmatpush3.bf16.msra.mxu1 %v10021_v9  ;;  %9159 = vmatprep.mubr.msk.f32.mxu1 %vm12701_vm0, %v10969_v1 }
 0x2fb   :  { %10023 = vmatprep.subr.bf16.mxu1 %v10967_v0 }
 0x2fe   :  { %10025 = vmatpush3.bf16.msra.mxu1 %v10024_v14 }
 0x2ff   :  { %10026 = vmatprep.subr.bf16.mxu1 %v10967_v0 }
 0x302   :  { %10028 = vmatpush3.bf16.msra.mxu1 %v10027_v17 }
 0x303   :  { %10029 = vmatprep.subr.bf16.mxu1 %v10967_v0 }
 0x306   :  { %10031 = vmatpush3.bf16.msra.mxu1 %v10030_v20 }
 0x309   :  { %9160 = vmatmul.mubr.msk.f32.vlgmr.msra.gmra.mrb[8].mxu1 %vm825_vm7, %v2076_v21 }
 0x3dc   :  { %v2145_v22 = vpop.f32.mrb[8].mxu1 }
 0x3dd   :  { %v2150_v23 = vmax.f32 %v2145_v22, 0.0  ;;  %v9161_v24 = vpop.f32.mrb[9].mxu1 }
 0x3df   :  { %9167 = vmatmul.mubr.msk.f32.vlgmr.msra.gmra.mrb[10].mxu0 %vm825_vm7, %v2150_v23 }
 0x3e0   :  { %9179 = vmatprep.mubr.msk.f32.mxu0 %vm2754_vm10, %v178_v37 }
 0x4b2   :  { %v2226_v25 = vpop.f32.mrb[10].mxu0 }
 0x4b3   :  { %v2227_v26 = vadd.f32 1e-15, %v2226_v25  ;;  %v9168_v28 = vpop.f32.mrb[11].mxu0 }
 0x4b5   :  { %v2231_v30 = vsel %vm2230_vm9, %v2227_v26, 0.0 }
 0x4b6   :  { %2232 = vadd.xlane.f32.xlu0 %v2231_v30 }
 0x543   :  { %v2233_v31 = vpop.xlane.xlu0 %2232 }
 0x544   :  { %10674 = vrcp.f32 %v2233_v31 }
 0x54e   :  { %v10675_v32 = vpop.eup %10674 }
 0x54f   :  { %v2235_v33 = vmul.f32 %v10675_v32, %v2227_v26 }
 0x551   :  { %2279 = vrot.lane.b32.xlu1 %v2235_v33, %s10970_s2  ;;  %2245 = vrot.lane.b32.xlu0 %v2235_v33, %s10971_s3  ;;  %10577 = vpush %v2235_v33 }
 0x555   :  { %2313 = vrot.lane.b32.xlu1 %v2235_v33, %s10972_s27  ;;  %2508 = vrot.lane.b32.xlu0 %v2235_v33, %s10973_s25 }
 0x559   :  { %2347 = vrot.lane.b32.xlu1 %v2235_v33, %s10974_s24  ;;  %2576 = vrot.lane.b32.xlu0 %v2235_v33, %s12699_s28 }
 0x55d   :  { %2381 = vrot.lane.b32.xlu1 %v2235_v33, %s10976_s8  ;;  %2644 = vrot.lane.b32.xlu0 %v2235_v33, %s12698_s21 }
 0x561   :  { %2415 = vrot.lane.b32.xlu1 %v2235_v33, %s10978_s22  ;;  %2716 = vrot.lane.b32.xlu0 %v2235_v33, %s12695_s9 }
 0x565   :  { %2454 = vrot.lane.b32.xlu1 %v2235_v33, %s10980_s13 }
 0x569   :  { %2493 = vrot.lane.b32.xlu1 %v2235_v33, %s10981_s1 }
 0x56d   :  { %2542 = vrot.lane.b32.xlu1 %v2235_v33, %s10982_s29 }
 0x571   :  { %2610 = vrot.lane.b32.xlu1 %v2235_v33, %s10983_s30 }
 0x575   :  { %2678 = vrot.lane.b32.xlu1 %v2235_v33, %s10984_s26 }
 0x582   :  { %s10578_s18 = spop %10577 }
 0x583   :  { %v2238_v49 = vstv %s10578_s18 }
 0x584   :  { %v2240_v52 = vmul.f32 %v11494_v51, %v2238_v49  ;;  %v2241_v53 = vmul.f32 %v2238_v49, %v11251_v10  ;;  %v11513_v10 = vld [vmem:[%s12706_s20 + $0x10] sm:$0xff]  ;;  %v2243_v2 = vmul.f32 %v2238_v49, %v11333_v54  ;;  %v2244_v17 = vmul.f32 %v2238_v49, %v11501_v56 }
 0x585   :  { %v2242_v62 = vmul.f32 %v11513_v10, %v2238_v49 }
 0x5c3   :  { %v2280_v27 = vpop.permute.xlu1 %2279  ;;  %v2246_v34 = vpop.permute.xlu0 %2245 }
 0x5c4   :  { %10579 = vpush %v2246_v34 }
 0x5c5   :  { %10581 = vpush %v2280_v27 }
 0x5c7   :  { %v2314_v35 = vpop.permute.xlu1 %2313  ;;  %v2509_v40 = vpop.permute.xlu0 %2508 }
 0x5c8   :  { %10583 = vpush %v2314_v35 }
 0x5cb   :  { %v2348_v36 = vpop.permute.xlu1 %2347  ;;  %v2577_v43 = vpop.permute.xlu0 %2576 }
 0x5cc   :  { %10585 = vpush %v2348_v36 }
 0x5cf   :  { %v2382_v38 = vpop.permute.xlu1 %2381  ;;  %v2645_v45 = vpop.permute.xlu0 %2644 }
 0x5d0   :  { %10587 = vpush %v2382_v38 }
 0x5d3   :  { %v2416_v39 = vpop.permute.xlu1 %2415  ;;  %v2717_v48 = vpop.permute.xlu0 %2716 }
 0x5d4   :  { %10589 = vpush %v2416_v39 }
 0x5d7   :  { %v2455_v41 = vpop.permute.xlu1 %2454 }
 0x5d8   :  { %10591 = vpush %v2455_v41 }
 0x5db   :  { %v2494_v42 = vpop.permute.xlu1 %2493 }
 0x5dc   :  { %10593 = vpush %v2494_v42 }
 0x5dd   :  { %10595 = vpush %v2509_v40 }
 0x5df   :  { %v2543_v44 = vpop.permute.xlu1 %2542 }
 0x5e0   :  { %10597 = vpush %v2543_v44 }
 0x5e1   :  { %10599 = vpush %v2577_v43 }
 0x5e3   :  { %v2611_v46 = vpop.permute.xlu1 %2610 }
 0x5e4   :  { %10601 = vpush %v2611_v46 }
 0x5e5   :  { %10603 = vpush %v2645_v45 }
 0x5e7   :  { %v2679_v47 = vpop.permute.xlu1 %2678 }
 0x5e8   :  { %10605 = vpush %v2679_v47 }
 0x5e9   :  { %10607 = vpush %v2717_v48 }
 0x5f5   :  { %s10580_s5 = spop %10579 }
 0x5f6   :  { %v2248_v55 = vstv %s10580_s5  ;;  %s10582_s23 = spop %10581 }
 0x5f7   :  { %v2250_v57 = vmul.f32 %v11494_v51, %v2248_v55  ;;  %v2251_v59 = vmul.f32 %v11507_v58, %v2248_v55  ;;  %v2252_v60 = vmul.f32 %v11513_v10, %v2248_v55  ;;  %v2253_v61 = vmul.f32 %v2248_v55, %v11333_v54 }
 0x5f8   :  { %v2254_v3 = vmul.f32 %v2248_v55, %v11501_v56  ;;  %v2282_v63 = vstv %s10582_s23 }
 0x5f9   :  { %v2260_v4 = vrot.slane %v2250_v57, 1  ;;  %v2261_v5 = vrot.slane %v2251_v59, 1  ;;  %v2263_v6 = vrot.slane %v2252_v60, 1  ;;  %v2265_v7 = vrot.slane %v2253_v61, 1  ;;  %s10584_s9 = spop %10583 }
 0x5fa   :  { %v2267_v8 = vrot.slane %v2254_v3, 1  ;;  %v2284_v9 = vmul.f32 %v11494_v51, %v2282_v63  ;;  %v2285_v11 = vmul.f32 %v11507_v58, %v2282_v63  ;;  %v2286_v12 = vmul.f32 %v11513_v10, %v2282_v63 }
 0x5fb   :  { %v2262_v13 = vsel %vm223_vm2, %v2260_v4, %v2261_v5  ;;  %v2264_v14 = vsel %vm223_vm2, %v2261_v5, %v2263_v6  ;;  %v2266_v15 = vsel %vm223_vm2, %v2263_v6, %v2265_v7  ;;  %v2287_v16 = vmul.f32 %v2282_v63, %v11333_v54 }
 0x5fc   :  { %v2268_v18 = vsel %vm223_vm2, %v2265_v7, %v2267_v8  ;;  %v2274_v19 = vadd.f32 %v2262_v13, %v2240_v52  ;;  %v2275_v20 = vadd.f32 %v2264_v14, %v2241_v53  ;;  %v2276_v21 = vadd.f32 %v2266_v15, %v2242_v62 }
 0x5fd   :  { %v2277_v22 = vadd.f32 %v2268_v18, %v2243_v2  ;;  %v2288_v23 = vmul.f32 %v2282_v63, %v11501_v56  ;;  %v2294_v24 = vrot.slane %v2284_v9, 2  ;;  %v2295_v25 = vrot.slane %v2285_v11, 2  ;;  %s10586_s5 = spop %10585 }
 0x5fe   :  { %v2297_v26 = vrot.slane %v2286_v12, 2  ;;  %v2299_v28 = vrot.slane %v2287_v16, 2  ;;  %v2316_v30 = vstv %s10584_s9  ;;  %v2278_v34 = vadd.f32 %v2267_v8, %v2244_v17 }
 0x5ff   :  { %v2301_v31 = vrot.slane %v2288_v23, 2  ;;  %v2318_v32 = vmul.f32 %v11494_v51, %v2316_v30  ;;  %v2319_v33 = vmul.f32 %v11507_v58, %v2316_v30  ;;  %v2320_v27 = vmul.f32 %v11513_v10, %v2316_v30 }
 0x600   :  { %v2296_v35 = vsel %vm405_vm3, %v2294_v24, %v2295_v25  ;;  %v2298_v36 = vsel %vm405_vm3, %v2295_v25, %v2297_v26  ;;  %v2321_v37 = vmul.f32 %v2316_v30, %v11333_v54  ;;  %v2300_v38 = vsel %vm405_vm3, %v2297_v26, %v2299_v28 }
 0x601   :  { %v2302_v39 = vsel %vm405_vm3, %v2299_v28, %v2301_v31  ;;  %v2308_v40 = vadd.f32 %v2296_v35, %v2274_v19  ;;  %v2309_v41 = vadd.f32 %v2298_v36, %v2275_v20  ;;  %v2310_v42 = vadd.f32 %v2300_v38, %v2276_v21  ;;  %s10588_s23 = spop %10587 }
 0x602   :  { %v2311_v43 = vadd.f32 %v2302_v39, %v2277_v22  ;;  %v2322_v44 = vmul.f32 %v2316_v30, %v11501_v56  ;;  %v2328_v45 = vrot.slane %v2318_v32, 3  ;;  %v2329_v46 = vrot.slane %v2319_v33, 3 }
 0x603   :  { %v2331_v47 = vrot.slane %v2320_v27, 3  ;;  %v2333_v48 = vrot.slane %v2321_v37, 3  ;;  %v2350_v49 = vstv %s10586_s5  ;;  %v2312_v2 = vadd.f32 %v2301_v31, %v2278_v34 }
 0x604   :  { %v2335_v52 = vrot.slane %v2322_v44, 3  ;;  %v2352_v53 = vmul.f32 %v11494_v51, %v2350_v49  ;;  %v2353_v55 = vmul.f32 %v11507_v58, %v2350_v49  ;;  %v2354_v57 = vmul.f32 %v11513_v10, %v2350_v49 }
 0x605   :  { %v2330_v59 = vsel %vm503_vm4, %v2328_v45, %v2329_v46  ;;  %v2332_v60 = vsel %vm503_vm4, %v2329_v46, %v2331_v47  ;;  %v2334_v61 = vsel %vm503_vm4, %v2331_v47, %v2333_v48  ;;  %v2355_v62 = vmul.f32 %v2350_v49, %v11333_v54  ;;  %s10590_s19 = spop %10589 }
 0x606   :  { %v2336_v3 = vsel %vm503_vm4, %v2333_v48, %v2335_v52  ;;  %v2342_v63 = vadd.f32 %v2330_v59, %v2308_v40  ;;  %v2343_v4 = vadd.f32 %v2332_v60, %v2309_v41  ;;  %v2344_v5 = vadd.f32 %v2334_v61, %v2310_v42  ;;  %v11566_v41 = vld [vmem:[%s12706_s20 + $0x18] sm:$0xff] }
 0x607   :  { %v2345_v6 = vadd.f32 %v2336_v3, %v2311_v43  ;;  %v2356_v7 = vmul.f32 %v2350_v49, %v11501_v56  ;;  %v2362_v8 = vrot.slane %v2352_v53, 4  ;;  %v2363_v9 = vrot.slane %v2353_v55, 4 }
 0x608   :  { %v2365_v11 = vrot.slane %v2354_v57, 4  ;;  %v2367_v12 = vrot.slane %v2355_v62, 4  ;;  %v2384_v13 = vstv %s10588_s23  ;;  %v2346_v22 = vadd.f32 %v2335_v52, %v2312_v2 }
 0x609   :  { %v2369_v14 = vrot.slane %v2356_v7, 4  ;;  %v2386_v15 = vmul.f32 %v11494_v51, %v2384_v13  ;;  %v2387_v16 = vmul.f32 %v11507_v58, %v2384_v13  ;;  %v2388_v17 = vmul.f32 %v11513_v10, %v2384_v13  ;;  %s10592_s0 = spop %10591 }
 0x60a   :  { %v2364_v18 = vsel %vm601_vm5, %v2362_v8, %v2363_v9  ;;  %v2366_v19 = vsel %vm601_vm5, %v2363_v9, %v2365_v11  ;;  %v2368_v20 = vsel %vm601_vm5, %v2365_v11, %v2367_v12  ;;  %v2389_v21 = vmul.f32 %v2384_v13, %v11333_v54 }
 0x60b   :  { %v2370_v23 = vsel %vm601_vm5, %v2367_v12, %v2369_v14  ;;  %v2376_v24 = vadd.f32 %v2364_v18, %v2342_v63  ;;  %v2377_v25 = vadd.f32 %v2366_v19, %v2343_v4  ;;  %v2378_v26 = vadd.f32 %v2368_v20, %v2344_v5 }
 0x60c   :  { %v2379_v28 = vadd.f32 %v2370_v23, %v2345_v6  ;;  %v2390_v30 = vmul.f32 %v2384_v13, %v11501_v56  ;;  %v2396_v31 = vrot.slane %v2386_v15, 5  ;;  %v2397_v32 = vrot.slane %v2387_v16, 5 }
 0x60d   :  { %v2399_v33 = vrot.slane %v2388_v17, 5  ;;  %v2401_v27 = vrot.slane %v2389_v21, 5  ;;  %v2418_v34 = vstv %s10590_s19  ;;  %v2380_v43 = vadd.f32 %v2369_v14, %v2346_v22  ;;  %s10594_s6 = spop %10593  ;;  %s12696_s19 = smov 10  }
 0x60e   :  { %v2403_v35 = vrot.slane %v2390_v30, 5  ;;  %v2420_v36 = vmul.f32 %v11494_v51, %v2418_v34  ;;  %v2421_v54 = vmul.f32 %v11507_v58, %v2418_v34  ;;  %v2422_v37 = vmul.f32 %v11513_v10, %v2418_v34  ;;  %s10596_s9 = spop %10595 }
 0x60f   :  { %v2398_v38 = vsel %vm700_vm6, %v2396_v31, %v2397_v32  ;;  %v2400_v39 = vsel %vm700_vm6, %v2397_v32, %v2399_v33  ;;  %v2402_v40 = vsel %vm700_vm6, %v2399_v33, %v2401_v27  ;;  %v2423_v42 = vmul.f32 %v11566_v41, %v2418_v34 }
 0x610   :  { %v2404_v44 = vsel %vm700_vm6, %v2401_v27, %v2403_v35  ;;  %v2410_v45 = vadd.f32 %v2398_v38, %v2376_v24  ;;  %v2411_v46 = vadd.f32 %v2400_v39, %v2377_v25  ;;  %v2412_v47 = vadd.f32 %v2402_v40, %v2378_v26 }
 0x611   :  { %v2413_v48 = vadd.f32 %v2404_v44, %v2379_v28  ;;  %v2424_v49 = vmul.f32 %v2418_v34, %v11501_v56  ;;  %v2425_v52 = vmul.f32 %v2418_v34, %v11356_v50  ;;  %v2414_v53 = vadd.f32 %v2403_v35, %v2380_v43  ;;  %s10598_s5 = spop %10597 }
 0x612   :  { %v2433_v55 = vrot.slane %v2420_v36, 6  ;;  %v2434_v57 = vrot.slane %v2421_v54, 6  ;;  %v2436_v59 = vrot.slane %v2422_v37, 6  ;;  %v2438_v60 = vrot.slane %v2423_v42, 6  ;;  %s10600_s4 = spop %10599 }
 0x613   :  { %v2440_v61 = vrot.slane %v2424_v49, 6  ;;  %v2442_v62 = vrot.slane %v2425_v52, 6  ;;  %v2457_v2 = vstv %s10592_s0  ;;  %v2496_v17 = vstv %s10594_s6 }
 0x614   :  { %v2459_v3 = vmul.f32 %v11494_v51, %v2457_v2  ;;  %v2460_v63 = vmul.f32 %v11507_v58, %v2457_v2  ;;  %v2461_v4 = vmul.f32 %v11513_v10, %v2457_v2  ;;  %v2462_v5 = vmul.f32 %v11566_v41, %v2457_v2 }
 0x615   :  { %v2463_v6 = vmul.f32 %v2457_v2, %v11501_v56  ;;  %v2464_v7 = vmul.f32 %v2457_v2, %v11356_v50  ;;  %v2435_v8 = vsel %vm2432_vm11, %v2433_v55, %v2434_v57  ;;  %v2437_v9 = vsel %vm2432_vm11, %v2434_v57, %v2436_v59  ;;  %s10602_s18 = spop %10601 }
 0x616   :  { %v2472_v11 = vrot.slane %v2459_v3, 7  ;;  %v2473_v12 = vrot.slane %v2460_v63, 7  ;;  %v2475_v13 = vrot.slane %v2461_v4, 7  ;;  %v2477_v14 = vrot.slane %v2462_v5, 7  ;;  %s10604_s0 = spop %10603 }
 0x617   :  { %v2479_v51 = vrot.slane %v2463_v6, 7  ;;  %v2481_v15 = vrot.slane %v2464_v7, 7  ;;  %v2439_v16 = vsel %vm2432_vm11, %v2436_v59, %v2438_v60  ;;  %v2441_v18 = vsel %vm2432_vm11, %v2438_v60, %v2440_v61 }
 0x618   :  { %v2443_v19 = vsel %vm2432_vm11, %v2440_v61, %v2442_v62  ;;  %v2449_v20 = vadd.f32 %v2435_v8, %v2410_v45  ;;  %v2450_v21 = vadd.f32 %v2437_v9, %v2411_v46  ;;  %v2451_v22 = vadd.f32 %v2439_v16, %v2412_v47 }
 0x619   :  { %v2453_v23 = vadd.f32 %v2443_v19, %v2414_v53  ;;  %v2474_v24 = vsel %vm2471_vm12, %v2472_v11, %v2473_v12  ;;  %v2476_v25 = vsel %vm2471_vm12, %v2473_v12, %v2475_v13  ;;  %v2478_v26 = vsel %vm2471_vm12, %v2475_v13, %v2477_v14  ;;  %s10606_s6 = spop %10605 }
 0x61a   :  { %v2480_v28 = vsel %vm2471_vm12, %v2477_v14, %v2479_v51  ;;  %v2482_v30 = vsel %vm2471_vm12, %v2479_v51, %v2481_v15  ;;  %v2488_v31 = vadd.f32 %v2474_v24, %v2449_v20  ;;  %v2452_v32 = vadd.f32 %v2441_v18, %v2413_v48 }
 0x61b   :  { %v2489_v33 = vadd.f32 %v2476_v25, %v2450_v21  ;;  %v2490_v27 = vadd.f32 %v2478_v26, %v2451_v22  ;;  %v2492_v34 = vadd.f32 %v2482_v30, %v2453_v23  ;;  %v2498_v35 = vmul.f32 %v11507_v58, %v2496_v17 }
 0x61c   :  { %v2499_v36 = vmul.f32 %v11513_v10, %v2496_v17  ;;  %v2500_v54 = vmul.f32 %v11566_v41, %v2496_v17  ;;  %v2491_v37 = vadd.f32 %v2480_v28, %v2452_v32  ;;  %v2502_v38 = vmul.f32 %v2496_v17, %v11356_v50  ;;  %v11600_v50 = vld [vmem:[%s12706_s20 + $0x28] sm:$0xff] }
 0x61d   :  { %v2511_v39 = vstv %s10596_s9  ;;  %v2545_v40 = vstv %s10598_s5  ;;  %v2501_v42 = vmul.f32 %v2496_v17, %v11501_v56  ;;  %v2503_v43 = vadd.f32 %v2498_v35, %v2488_v31  ;;  %s10608_s9 = spop %10607 }
 0x61e   :  { %v2504_v44 = vadd.f32 %v2499_v36, %v2489_v33  ;;  %v2505_v45 = vadd.f32 %v2500_v54, %v2490_v27  ;;  %v2507_v46 = vadd.f32 %v2502_v38, %v2492_v34  ;;  %v2513_v47 = vmul.f32 %v11507_v58, %v2511_v39 }
 0x61f   :  { %v2514_v48 = vmul.f32 %v11513_v10, %v2511_v39  ;;  %v2515_v49 = vmul.f32 %v11566_v41, %v2511_v39  ;;  %v2516_v52 = vmul.f32 %v2511_v39, %v11501_v56  ;;  %v2517_v53 = vmul.f32 %v11600_v50, %v2511_v39 }
 0x620   :  { %v2547_v55 = vmul.f32 %v11507_v58, %v2545_v40  ;;  %v2548_v57 = vmul.f32 %v11513_v10, %v2545_v40  ;;  %v2523_v59 = vrot.slane %v2513_v47, 1  ;;  %v2549_v62 = vmul.f32 %v11566_v41, %v2545_v40 }
 0x621   :  { %v2524_v60 = vrot.slane %v2514_v48, 1  ;;  %v2526_v61 = vrot.slane %v2515_v49, 1  ;;  %v2528_v2 = vrot.slane %v2516_v52, 1  ;;  %v2530_v3 = vrot.slane %v2517_v53, 1 }
 0x622   :  { %v2550_v63 = vmul.f32 %v2545_v40, %v11501_v56  ;;  %v2551_v4 = vmul.f32 %v11600_v50, %v2545_v40  ;;  %v2557_v7 = vrot.slane %v2547_v55, 2  ;;  %v2558_v8 = vrot.slane %v2548_v57, 2 }
 0x623   :  { %v2525_v5 = vsel %vm223_vm2, %v2523_v59, %v2524_v60  ;;  %v2527_v6 = vsel %vm223_vm2, %v2524_v60, %v2526_v61  ;;  %v2506_v9 = vadd.f32 %v2501_v42, %v2491_v37  ;;  %v2529_v11 = vsel %vm223_vm2, %v2526_v61, %v2528_v2 }
 0x624   :  { %v2531_v12 = vsel %vm223_vm2, %v2528_v2, %v2530_v3  ;;  %v2579_v13 = vstv %s10600_s4  ;;  %v2537_v14 = vadd.f32 %v2525_v5, %v2503_v43  ;;  %v2538_v51 = vadd.f32 %v2527_v6, %v2504_v44 }
 0x625   :  { %v2539_v15 = vadd.f32 %v2529_v11, %v2505_v45  ;;  %v2541_v16 = vadd.f32 %v2530_v3, %v2507_v46  ;;  %v2559_v17 = vsel %vm405_vm3, %v2557_v7, %v2558_v8  ;;  %v2560_v18 = vrot.slane %v2549_v62, 2 }
 0x626   :  { %v2562_v19 = vrot.slane %v2550_v63, 2  ;;  %v2564_v20 = vrot.slane %v2551_v4, 2  ;;  %v2581_v21 = vmul.f32 %v11507_v58, %v2579_v13  ;;  %v2582_v22 = vmul.f32 %v11513_v10, %v2579_v13 }
 0x627   :  { %v2583_v23 = vmul.f32 %v11566_v41, %v2579_v13  ;;  %v2584_v24 = vmul.f32 %v2579_v13, %v11501_v56  ;;  %v2540_v25 = vadd.f32 %v2531_v12, %v2506_v9  ;;  %v2561_v26 = vsel %vm405_vm3, %v2558_v8, %v2560_v18 }
 0x628   :  { %v2563_v28 = vsel %vm405_vm3, %v2560_v18, %v2562_v19  ;;  %v2565_v30 = vsel %vm405_vm3, %v2562_v19, %v2564_v20  ;;  %v2571_v31 = vadd.f32 %v2559_v17, %v2537_v14  ;;  %v2572_v32 = vadd.f32 %v2561_v26, %v2538_v51 }
 0x629   :  { %v2575_v33 = vadd.f32 %v2564_v20, %v2541_v16  ;;  %v2585_v27 = vmul.f32 %v11600_v50, %v2579_v13  ;;  %v2591_v34 = vrot.slane %v2581_v21, 3  ;;  %v2592_v35 = vrot.slane %v2582_v22, 3 }
 0x62a   :  { %v2594_v36 = vrot.slane %v2583_v23, 3  ;;  %v2596_v54 = vrot.slane %v2584_v24, 3  ;;  %v2573_v37 = vadd.f32 %v2563_v28, %v2539_v15  ;;  %v2574_v38 = vadd.f32 %v2565_v30, %v2540_v25  ;;  %v11647_v24 = vld [vmem:[%s12706_s20 + $0x30] sm:$0x3] }
 0x62b   :  { %v2598_v39 = vrot.slane %v2585_v27, 3  ;;  %v2613_v40 = vstv %s10602_s18  ;;  %v2593_v42 = vsel %vm503_vm4, %v2591_v34, %v2592_v35  ;;  %v2647_v44 = vstv %s10604_s0 }
 0x62c   :  { %v2615_v43 = vmul.f32 %v11507_v58, %v2613_v40  ;;  %v2681_v45 = vstv %s10606_s6  ;;  %v2595_v46 = vsel %vm503_vm4, %v2592_v35, %v2594_v36  ;;  %v2597_v47 = vsel %vm503_vm4, %v2594_v36, %v2596_v54 }
 0x62d   :  { %v2599_v48 = vsel %vm503_vm4, %v2596_v54, %v2598_v39  ;;  %v2605_v49 = vadd.f32 %v2593_v42, %v2571_v31  ;;  %v2606_v52 = vadd.f32 %v2595_v46, %v2572_v32  ;;  %v2609_v53 = vadd.f32 %v2598_v39, %v2575_v33 }
 0x62e   :  { %v2616_v55 = vmul.f32 %v11513_v10, %v2613_v40  ;;  %v2617_v57 = vmul.f32 %v11566_v41, %v2613_v40  ;;  %v2618_v59 = vmul.f32 %v2613_v40, %v11501_v56  ;;  %v2619_v60 = vmul.f32 %v11600_v50, %v2613_v40 }
 0x62f   :  { %v2625_v61 = vrot.slane %v2615_v43, 4  ;;  %v2649_v62 = vmul.f32 %v11507_v58, %v2647_v44  ;;  %v2650_v63 = vmul.f32 %v11513_v10, %v2647_v44  ;;  %v2651_v4 = vmul.f32 %v11566_v41, %v2647_v44 }
 0x630   :  { %v2626_v2 = vrot.slane %v2616_v55, 4  ;;  %v2628_v3 = vrot.slane %v2617_v57, 4  ;;  %v2607_v5 = vadd.f32 %v2597_v47, %v2573_v37  ;;  %v2608_v6 = vadd.f32 %v2599_v48, %v2574_v38 }
 0x631   :  { %v2630_v7 = vrot.slane %v2618_v59, 4  ;;  %v2632_v8 = vrot.slane %v2619_v60, 4  ;;  %v2652_v12 = vmul.f32 %v2647_v44, %v11501_v56  ;;  %v2653_v13 = vmul.f32 %v11600_v50, %v2647_v44 }
 0x632   :  { %v2627_v9 = vsel %vm601_vm5, %v2625_v61, %v2626_v2  ;;  %v2629_v11 = vsel %vm601_vm5, %v2626_v2, %v2628_v3  ;;  %v2659_v15 = vrot.slane %v2649_v62, 5  ;;  %v2660_v16 = vrot.slane %v2650_v63, 5 }
 0x633   :  { %v2631_v14 = vsel %vm601_vm5, %v2628_v3, %v2630_v7  ;;  %v2633_v51 = vsel %vm601_vm5, %v2630_v7, %v2632_v8  ;;  %v2643_v17 = vadd.f32 %v2632_v8, %v2609_v53  ;;  %v2662_v18 = vrot.slane %v2651_v4, 5 }
 0x634   :  { %v2683_v19 = vmul.f32 %v11507_v58, %v2681_v45  ;;  %v2684_v20 = vmul.f32 %v11513_v10, %v2681_v45  ;;  %v2685_v21 = vmul.f32 %v11566_v41, %v2681_v45  ;;  %v2686_v22 = vmul.f32 %v2681_v45, %v11501_v56 }
 0x635   :  { %v2687_v23 = vmul.f32 %v11600_v50, %v2681_v45  ;;  %v2688_v25 = vmul.f32 %v11647_v24, %v2681_v45  ;;  %v2664_v26 = vrot.slane %v2652_v12, 5  ;;  %v2666_v28 = vrot.slane %v2653_v13, 5 }
 0x636   :  { %v2695_v30 = vrot.slane %v2683_v19, 6  ;;  %v2719_v31 = vstv %s10608_s9  ;;  %v2696_v32 = vrot.slane %v2684_v20, 6  ;;  %v2698_v33 = vrot.slane %v2685_v21, 6 }
 0x637   :  { %v2700_v27 = vrot.slane %v2686_v22, 6  ;;  %v2702_v34 = vrot.slane %v2687_v23, 6  ;;  %v2721_v35 = vmul.f32 %v11507_v58, %v2719_v31  ;;  %v2722_v36 = vmul.f32 %v11513_v10, %v2719_v31  ;;  %v179_v23 = vld [vmem:[#allocation9 + $0x8] sm:$0x3] }
 0x638   :  { %v2723_v54 = vmul.f32 %v11566_v41, %v2719_v31  ;;  %v2724_v37 = vmul.f32 %v2719_v31, %v11501_v56  ;;  %v2704_v38 = vrot.slane %v2688_v25, 6  ;;  %v2725_v39 = vmul.f32 %v11600_v50, %v2719_v31 }
 0x639   :  { %v2639_v40 = vadd.f32 %v2627_v9, %v2605_v49  ;;  %v2640_v42 = vadd.f32 %v2629_v11, %v2606_v52  ;;  %v2726_v43 = vmul.f32 %v11647_v24, %v2719_v31  ;;  %v2733_v44 = vrot.slane %v2721_v35, 7 }
 0x63a   :  { %v2734_v45 = vrot.slane %v2722_v36, 7  ;;  %v2736_v46 = vrot.slane %v2723_v54, 7  ;;  %v2738_v47 = vrot.slane %v2724_v37, 7  ;;  %v2740_v48 = vrot.slane %v2725_v39, 7  ;;  %v189_v36 = vld [vmem:[#allocation12 + $0x10] sm:$0xf] }
 0x63b   :  { %v2661_v58 = vsel %vm700_vm6, %v2659_v15, %v2660_v16  ;;  %v2663_v10 = vsel %vm700_vm6, %v2660_v16, %v2662_v18  ;;  %v2697_v56 = vsel %vm2432_vm11, %v2695_v30, %v2696_v32  ;;  %v2699_v55 = vsel %vm2432_vm11, %v2696_v32, %v2698_v33  ;;  %v187_v32 = vld [vmem:[#allocation12] sm:$0xff] }
 0x63c   :  { %v2673_v53 = vadd.f32 %v2661_v58, %v2639_v40  ;;  %v2674_v41 = vadd.f32 %v2663_v10, %v2640_v42  ;;  %v2735_v49 = vsel %vm2471_vm12, %v2733_v44, %v2734_v45  ;;  %v2737_v52 = vsel %vm2471_vm12, %v2734_v45, %v2736_v46  ;;  %v3175_v58 = vld [vmem:[%s12686_s11 + $0x8] sm:$0xff] }
 0x63d   :  { %v2641_v57 = vadd.f32 %v2631_v14, %v2607_v5  ;;  %v2642_v59 = vadd.f32 %v2633_v51, %v2608_v6  ;;  %v2665_v62 = vsel %vm700_vm6, %v2662_v18, %v2664_v26  ;;  %v2667_v2 = vsel %vm700_vm6, %v2664_v26, %v2666_v28  ;;  %v180_v26 = vld [vmem:[#allocation10] sm:$0xff] }
 0x63e   :  { %v2711_v60 = vadd.f32 %v2697_v56, %v2673_v53  ;;  %v2712_v61 = vadd.f32 %v2699_v55, %v2674_v41  ;;  %v2701_v4 = vsel %vm2432_vm11, %v2698_v33, %v2700_v27  ;;  %v2703_v7 = vsel %vm2432_vm11, %v2700_v27, %v2702_v34  ;;  %v188_v33 = vld [vmem:[#allocation12 + $0x8] sm:$0xff]  ;;  %v3176_v53 = vld [vmem:[%s12686_s11 + $0x10] sm:$0xff]  ;;  %v3177_v41 = vld [vmem:[%s12686_s11 + $0x18] sm:$0xff] }
 0x63f   :  { %v2675_v3 = vadd.f32 %v2665_v62, %v2641_v57  ;;  %v2676_v63 = vadd.f32 %v2667_v2, %v2642_v59  ;;  %v2677_v8 = vadd.f32 %v2666_v28, %v2643_v17  ;;  %v2705_v5 = vsel %vm2432_vm11, %v2702_v34, %v2704_v38  ;;  %v3178_v56 = vld [vmem:[%s12686_s11 + $0x20] sm:$0xff]  ;;  %v3180_v57 = vld [vmem:[%s12686_s11 + $0x30] sm:$0xff]  ;;  %v3181_v59 = vld [vmem:[%s12686_s11 + $0x38] sm:$0xff] }
 0x640   :  { %v2749_v9 = vadd.f32 %v2735_v49, %v2711_v60  ;;  %v2750_v11 = vadd.f32 %v2737_v52, %v2712_v61  ;;  %v2739_v14 = vsel %vm2471_vm12, %v2736_v46, %v2738_v47  ;;  %v2741_v51 = vsel %vm2471_vm12, %v2738_v47, %v2740_v48  ;;  %v191_v47 = vld [vmem:[#allocation13 + $0x8] sm:$0xff]  ;;  %v3179_v49 = vld [vmem:[%s12686_s11 + $0x28] sm:$0xff] }
 0x641   :  { %v2713_v12 = vadd.f32 %v2701_v4, %v2675_v3  ;;  %v2714_v13 = vadd.f32 %v2703_v7, %v2676_v63  ;;  %v2742_v15 = vrot.slane %v2726_v43, 7  ;;  %v2715_v19 = vadd.f32 %v2705_v5, %v2677_v8  ;;  %v190_v43 = vld [vmem:[#allocation13] sm:$0xff]  ;;  %v8175_v61 = vld [vmem:[%s12685_s10] ss:$0 sm:$0xff] }
 0x642   :  { %v10036_v6 = vpack.c.bf16 %v2750_v11, %v2749_v9  ;;  %v10044_v22 = vpack.c.bf16 %v11647_v24, %v11600_v50  ;;  %v181_v50 = vld [vmem:[#allocation10 + $0x8] sm:$0x3]  ;;  %v11686_v27 = vpack.c.bf16 %v188_v33, %v187_v32  ;;  %v10062_v55 = vpack.c.bf16 %v3177_v41, %v3176_v53  ;;  %v3182_v11 = vld [vmem:[%s12687_s12] sm:$0xff]  ;;  %v8204_v41 = vld [vmem:[%s12686_s11 + $0xb0] sm:$0xff] }
 0x643   :  { %v2751_v16 = vadd.f32 %v2739_v14, %v2713_v12  ;;  %v2752_v18 = vadd.f32 %v2741_v51, %v2714_v13  ;;  %v2743_v17 = vsel %vm2471_vm12, %v2740_v48, %v2742_v15  ;;  %v3174_v48 = vld [vmem:[%s12686_s11] sm:$0xff]  ;;  %v10066_v52 = vpack.c.bf16 %v3179_v49, %v3178_v56  ;;  %v8184_v51 = vld [vmem:[%s12686_s11 + $0x48] sm:$0xff]  ;;  %v8205_v56 = vld [vmem:[%s12686_s11 + $0xb8] sm:$0xff] }
 0x644   :  { %10037 = vmatprep.subr.bf16.mxu0 %v10036_v6  ;;  %v2753_v21 = vadd.f32 %v2743_v17, %v2715_v19  ;;  %v10058_v10 = vpack.c.bf16 %v3175_v58, %v3174_v48  ;;  %v10070_v60 = vpack.c.bf16 %v3181_v59, %v3180_v57  ;;  %v8183_v14 = vld [vmem:[%s12686_s11 + $0x40] sm:$0xff]  ;;  %v8188_v17 = vld [vmem:[%s12686_s11 + $0x68] sm:$0xff] }
 0x645   :  { %10039 = vmatpush3.bf16.msra.mxu0 %v10036_v6  ;;  %v10040_v20 = vpack.c.bf16 %v2752_v18, %v2751_v16  ;;  %v3183_v6 = vld [vmem:[%s12687_s12 + $0x8] sm:$0xff]  ;;  %v10078_v15 = vpack.c.bf16 %v8184_v51, %v8183_v14  ;;  %v8185_v16 = vld [vmem:[%s12686_s11 + $0x50] sm:$0xff]  ;;  %v8186_v18 = vld [vmem:[%s12686_s11 + $0x58] sm:$0xff] }
 0x646   :  { %v8187_v19 = vld [vmem:[%s12686_s11 + $0x60] sm:$0xff]  ;;  %v8195_v49 = vld [vmem:[#allocation15 + $0x1] ss:$0 sm:$0xff]  ;;  %v8215_v14 = vld [vmem:[%s12686_s11 + $0xd0] sm:$0xff] }
 0x647   :  { %10041 = vmatprep.subr.bf16.mxu0 %v10040_v20  ;;  %v8202_v58 = vld [vmem:[%s12686_s11 + $0xa0] sm:$0xff]  ;;  %v8216_v51 = vld [vmem:[%s12686_s11 + $0xd8] sm:$0xff] }
 0x649   :  { %10043 = vmatpush3.bf16.msra.mxu0 %v10040_v20  ;;  %v10082_v20 = vpack.c.bf16 %v8186_v18, %v8185_v16  ;;  %v10122_v16 = vpack.c.bf16 %v8216_v51, %v8215_v14  ;;  %v8218_v18 = vld [vmem:[%s12686_s11 + $0xe8] sm:$0xff] }
 0x64a   :  { %9177 = vmatprep.subr.msk.mxu0 %vm700_vm6, %v2753_v21 }
 0x64d   :  { %9178 = vmatpush3.msk.msra.mxu0 %vm700_vm6, %v2753_v21  ;;  %v10086_v21 = vpack.c.bf16 %v8188_v17, %v8187_v19  ;;  %v8220_v17 = vld [vmem:[%s12686_s11 + $0xf8] sm:$0xff] }
 0x64e   :  { %9180 = vmatmul.mubr.msk.f32.vlgmr.msra.gmra.mrb[12].mxu0 %vm2754_vm10, %v179_v23  ;;  %10046 = vmatprep.subr.msk.bf16.mxu0 %vm11674_vm14, %v10044_v22  ;;  %v8190_v23 = vld [vmem:[%s12686_s11 + $0x78] sm:$0xff] }
 0x64f   :  { %10049 = vmatpush3.bf16.msk.msra.mxu0 %vm11674_vm14, %v10044_v22  ;;  %9186 = vmatprep.mubr.msk.f32.mxu0 %vm2871_vm15, %v180_v26  ;;  %v8189_v22 = vld [vmem:[%s12686_s11 + $0x70] sm:$0xff] }
 0x650   :  { %10051 = vmatprep.subr.bf16.mxu0 %v11686_v27  ;;  %v10090_v26 = vpack.c.bf16 %v8190_v23, %v8189_v22  ;;  %v8210_v22 = vld [vmem:[#allocation15 + $0x2] ss:$0 sm:$0xff] }
 0x652   :  { %9187 = vmatmul.mubr.msk.f32.vlgmr.msra.gmra.mrb[14].mxu0 %vm2871_vm15, %v181_v50  ;;  %v8180_v50 = vld [vmem:[#allocation15] ss:$0 sm:$0xff] }
 0x653   :  { %10053 = vmatpush3.bf16.msra.mxu0 %v11686_v27 }
 0x654   :  { %9193 = vmatprep.subr.msk.mxu0 %vm601_vm5, %v189_v36 }
 0x657   :  { %9194 = vmatpush3.msk.msra.mxu0 %vm601_vm5, %v189_v36  ;;  %v8191_v36 = vld [vmem:[%s12687_s12 + $0x10] sm:$0xff] }
 0x658   :  { %9254 = vmatprep.mubr.msk.f32.mxu1 %vm229_vm1, %v8191_v36 }
 0x721   :  { %v9181_v24 = vpop.f32.mrb[12].mxu0 }
 0x722   :  { %v2830_v28 = vpop.f32.mrb[13].mxu0 }
 0x723   :  { %2839 = vxpose.xlu1.b32.start [1/2] (short) (narrow) %v2830_v28, 16 }
 0x725   :  { %v9188_v30 = vpop.f32.mrb[14].mxu0 }
 0x726   :  { %v2947_v31 = vpop.f32.mrb[15].mxu0 }
 0x727   :  { %2840 = vxpose.xlu1.b32.end [2/2] (short) (narrow) %v9181_v24, 16 }
 0x7a3   :  { %v2855_v34 = vpop.trf.xlu1 }
 0x7a4   :  { %2990 = vrot.lane.b32.xlu0 %v2855_v34, %s12696_s19 }
 0x7a7   :  { %v2856_v35 = vpop.trf.xlu1 }
 0x7a8   :  { %2992 = vrot.lane.b32.xlu0 %v2856_v35, %s12696_s19 }
 0x7c6   :  { %2956 = vxpose.xlu0.b32.start [1/2] (short) (narrow) %v2947_v31, 16 }
 0x7ca   :  { %2957 = vxpose.xlu0.b32.end [2/2] (short) (narrow) %v9188_v30, 16 }
 0x816   :  { %v2991_v54 = vpop.permute.xlu0 %2990 }
 0x81a   :  { %v2993_v37 = vpop.permute.xlu0 %2992 }
 0x846   :  { %v2972_v38 = vpop.trf.xlu0 }
 0x847   :  { %v11695_v39 = vsel %vm2871_vm15, %v2972_v38, %v2991_v54 }
 0x848   :  { %9195 = vmatprep.mubr.msk.f32.mxu0 %vm12700_vm13, %v11695_v39 }
 0x84a   :  { %v2973_v40 = vpop.trf.xlu0 }
 0x84b   :  { %v11700_v42 = vsel %vm2871_vm15, %v2973_v40, %v2993_v37  ;;  %v8192_v40 = vld [vmem:[%s12687_s12 + $0x18] sm:$0xff] }
 0x84c   :  { %9196 = vmatmul.mubr.msk.f32.vlgmr.msra.gmra.mrb[16].mxu0 %vm12700_vm13, %v11700_v42  ;;  %vm12102_vm13 = vmpackc.low %vm2871_vm15, %vm2871_vm15 }
 0x84d   :  { %9202 = vmatprep.mubr.msk.f32.mxu0 %vm229_vm1, %v190_v43  ;;  %v8198_v43 = vld [vmem:[%s12686_s11 + $0x80] sm:$0xff] }
 0x91f   :  { %v9197_v44 = vpop.f32.mrb[16].mxu0 }
 0x920   :  { %v3074_v45 = vpop.f32.mrb[17].mxu0 }
 0x921   :  { %v10054_v46 = vpack.c.bf16 %v9197_v44, %v3074_v45  ;;  %v8199_v44 = vld [vmem:[%s12686_s11 + $0x88] sm:$0xff]  ;;  %v8200_v45 = vld [vmem:[%s12686_s11 + $0x90] sm:$0xff] }
 0x923   :  { %10055 = vmatprep.subr.bf16.mxu0 %v10054_v46 }
 0x924   :  { %10057 = vmatpush3.bf16.msra.mxu0 %v10054_v46  ;;  %v10098_v46 = vpack.c.bf16 %v8199_v44, %v8198_v43  ;;  %v196_v44 = vld [vmem:[%s12689_s14 + $0x18] sm:$0xff] }
 0x925   :  { %10059 = vmatprep.subr.bf16.mxu0 %v10058_v10 }
 0x927   :  { %9203 = vmatmul.mubr.msk.f32.vlgmr.msra.gmra.mrb[18].mxu0 %vm229_vm1, %v191_v47  ;;  %v8201_v47 = vld [vmem:[%s12686_s11 + $0x98] sm:$0xff] }
 0x928   :  { %10061 = vmatpush3.bf16.msra.mxu0 %v10058_v10  ;;  %v10102_v48 = vpack.c.bf16 %v8201_v47, %v8200_v45  ;;  %v8203_v10 = vld [vmem:[%s12686_s11 + $0xa8] sm:$0xff] }
 0x929   :  { %10063 = vmatprep.subr.bf16.mxu0 %v10062_v55  ;;  %v10106_v53 = vpack.c.bf16 %v8203_v10, %v8202_v58  ;;  %v198_v47 = vld [vmem:[%s12689_s14 + $0x28] sm:$0xff]  ;;  %v199_v58 = vld [vmem:[%s12689_s14 + $0x30] sm:$0xff]  ;;  %v200_v10 = vld [vmem:[%s12689_s14 + $0x38] sm:$0xff] }
 0x92c   :  { %10065 = vmatpush3.bf16.msra.mxu0 %v10062_v55  ;;  %v10110_v55 = vpack.c.bf16 %v8205_v56, %v8204_v41  ;;  %v8225_v41 = vld [vmem:[#allocation15 + $0x3] ss:$0 sm:$0xff] }
 0x92d   :  { %10067 = vmatprep.subr.bf16.mxu0 %v10066_v52 }
 0x930   :  { %10069 = vmatpush3.bf16.msra.mxu0 %v10066_v52 }
 0x931   :  { %10071 = vmatprep.subr.bf16.mxu0 %v10070_v60 }
 0x934   :  { %10073 = vmatpush3.bf16.msra.mxu0 %v10070_v60 }
 0x9fa   :  { %v9204_v62 = vpop.f32.mrb[18].mxu0 }
 0x9fb   :  { %v3167_v2 = vadd.f32 %v9204_v62, %v8175_v61  ;;  %v3161_v3 = vpop.f32.mrb[19].mxu0 }
 0x9fc   :  { %v3162_v63 = vadd.f32 %v8175_v61, %v3161_v3 }
 0x9fd   :  { %v3171_v4 = vmul.f32 0.999995, %v3167_v2 }
 0x9fe   :  { %v3170_v7 = vmul.f32 0.999995, %v3162_v63 }
 0xa00   :  { %10676 = vtanh.f32 %v3170_v7  ;;  %v8206_v7 = vld [vmem:[%s12687_s12 + $0x20] sm:$0xff] }
 0xa01   :  { %10678 = vtanh.f32 %v3171_v4 }
 0xa0a   :  { %v11733_v8 = vpop.eup %10676 }
 0xa0b   :  { %v11735_v9 = vpop.eup %10678  ;;  %9221 = vmatprep.mubr.msk.f32.mxu0 %vm825_vm7, %v11733_v8 }
 0xa0c   :  { %9222 = vmatmul.mubr.msk.f32.vlgmr.msra.gmra.mrb[20].mxu0 %vm825_vm7, %v11735_v9 }
 0xa0d   :  { %9228 = vmatprep.mubr.msk.f32.mxu0 %vm229_vm1, %v3182_v11 }
 0xadf   :  { %v9223_v12 = vpop.f32.mrb[20].mxu0 }
 0xae0   :  { %v3257_v13 = vpop.f32.mrb[21].mxu0 }
 0xae1   :  { %v10074_v5 = vpack.c.bf16 %v9223_v12, %v3257_v13 }
 0xae3   :  { %10075 = vmatprep.subr.bf16.mxu0 %v10074_v5 }
 0xae4   :  { %10077 = vmatpush3.bf16.msra.mxu0 %v10074_v5  ;;  %v8214_v5 = vld [vmem:[%s12686_s11 + $0xc8] sm:$0xff] }
 0xae5   :  { %10079 = vmatprep.subr.bf16.mxu0 %v10078_v15 }
 0xae7   :  { %9229 = vmatmul.mubr.msk.f32.vlgmr.msra.gmra.mrb[22].mxu0 %vm229_vm1, %v3183_v6 }
 0xae8   :  { %10081 = vmatpush3.bf16.msra.mxu0 %v10078_v15  ;;  %v8217_v15 = vld [vmem:[%s12686_s11 + $0xe0] sm:$0xff] }
 0xae9   :  { %10083 = vmatprep.subr.bf16.mxu0 %v10082_v20  ;;  %v10126_v19 = vpack.c.bf16 %v8218_v18, %v8217_v15  ;;  %v4218_v15 = vld [vmem:[#allocation2] sm:$0xff] }
 0xaec   :  { %10085 = vmatpush3.bf16.msra.mxu0 %v10082_v20  ;;  %v8219_v20 = vld [vmem:[%s12686_s11 + $0xf0] sm:$0xff] }
 0xaed   :  { %10087 = vmatprep.subr.bf16.mxu0 %v10086_v21 }
 0xaf0   :  { %10089 = vmatpush3.bf16.msra.mxu0 %v10086_v21  ;;  %v10130_v21 = vpack.c.bf16 %v8220_v17, %v8219_v20  ;;  %v4402_v20 = vld [vmem:[#allocation2 + $0x20] sm:$0xff]  ;;  %v4403_v17 = vld [vmem:[#allocation2 + $0x28] sm:$0xff] }
 0xaf1   :  { %10091 = vmatprep.subr.bf16.mxu0 %v10090_v26 }
 0xaf4   :  { %10093 = vmatpush3.bf16.msra.mxu0 %v10090_v26 }
 0xaf5   :  { %10099 = vmatprep.subr.bf16.mxu0 %v10098_v46 }
 0xbba   :  { %v9230_v24 = vpop.f32.mrb[22].mxu0 }
 0xbbb   :  { %v3350_v28 = vadd.f32 %v9230_v24, %v8180_v50  ;;  %v3344_v30 = vpop.f32.mrb[23].mxu0 }
 0xbbc   :  { %v3345_v31 = vadd.f32 %v8180_v50, %v3344_v30 }
 0xbbd   :  { %v3354_v32 = vmul.f32 0.999995, %v3350_v28 }
 0xbbe   :  { %v3353_v33 = vmul.f32 0.999995, %v3345_v31 }
 0xbc0   :  { %10680 = vtanh.f32 %v3353_v33  ;;  %v8221_v33 = vld [vmem:[%s12687_s12 + $0x30] sm:$0xff] }
 0xbc1   :  { %10682 = vtanh.f32 %v3354_v32 }
 0xbca   :  { %v10681_v34 = vpop.eup %10680 }
 0xbcb   :  { %v10683_v35 = vpop.eup %10682  ;;  %9247 = vmatprep.mubr.msk.f32.mxu0 %vm825_vm7, %v10681_v34 }
 0xbcc   :  { %9248 = vmatmul.mubr.msk.f32.vlgmr.msra.gmra.mrb[24].mxu0 %vm825_vm7, %v10683_v35 }
 0xbcd   :  { %10101 = vmatpush3.bf16.msra.mxu0 %v10098_v46  ;;  %v197_v46 = vld [vmem:[%s12689_s14 + $0x20] sm:$0xff] }
 0xbce   :  { %10103 = vmatprep.subr.bf16.mxu0 %v10102_v48 }
 0xbd1   :  { %10105 = vmatpush3.bf16.msra.mxu0 %v10102_v48  ;;  %v11884_v48 = vpack.c.bf16 %v198_v47, %v197_v46  ;;  %v4690_v46 = vld [vmem:[#allocation2 + $0x50] sm:$0xff]  ;;  %v4691_v47 = vld [vmem:[#allocation2 + $0x58] sm:$0xff] }
 0xbd2   :  { %10107 = vmatprep.subr.bf16.mxu0 %v10106_v53 }
 0xbd5   :  { %10109 = vmatpush3.bf16.msra.mxu0 %v10106_v53  ;;  %v11894_v53 = vpack.c.bf16 %v200_v10, %v199_v58 }
 0xbd6   :  { %10111 = vmatprep.subr.bf16.mxu0 %v10110_v55 }
 0xbd9   :  { %10113 = vmatpush3.bf16.msra.mxu0 %v10110_v55 }
 0xc9f   :  { %v9249_v54 = vpop.f32.mrb[24].mxu0 }
 0xca0   :  { %v3443_v37 = vpop.f32.mrb[25].mxu0 }
 0xca1   :  { %v10094_v38 = vpack.c.bf16 %v9249_v54, %v3443_v37  ;;  %v8222_v54 = vld [vmem:[%s12687_s12 + $0x38] sm:$0xff]  ;;  %v193_v37 = vld [vmem:[%s12689_s14] sm:$0xff] }
 0xca3   :  { %10095 = vmatprep.subr.bf16.mxu1 %v10094_v38 }
 0xca4   :  { %10097 = vmatpush3.bf16.msra.mxu1 %v10094_v38  ;;  %v194_v38 = vld [vmem:[%s12689_s14 + $0x8] sm:$0xff] }
 0xca5   :  { %v11868_v43 = vpack.c.bf16 %v194_v38, %v193_v37 }
 0xca7   :  { %9255 = vmatmul.mubr.msk.f32.vlgmr.msra.gmra.mrb[10].mxu1 %vm229_vm1, %v8192_v40  ;;  %v195_v40 = vld [vmem:[%s12689_s14 + $0x10] sm:$0xff] }
 0xca8   :  { %9280 = vmatprep.mubr.msk.f32.mxu1 %vm229_vm1, %v8206_v7  ;;  %v11873_v45 = vpack.c.bf16 %v196_v44, %v195_v40 }
 0xd7a   :  { %v9256_v52 = vpop.f32.mrb[10].mxu1 }
 0xd7b   :  { %v3536_v57 = vadd.f32 %v9256_v52, %v8195_v49  ;;  %v3530_v59 = vpop.f32.mrb[11].mxu1 }
 0xd7c   :  { %v3531_v60 = vadd.f32 %v8195_v49, %v3530_v59 }
 0xd7d   :  { %v3540_v61 = vmul.f32 0.999995, %v3536_v57 }
 0xd7e   :  { %v3539_v62 = vmul.f32 0.999995, %v3531_v60  ;;  %v8240_v60 = vld [vmem:[%s12706_s20 + $0x38] sm:$0xff] }
 0xd7f   :  { %10684 = vtanh.f32 %v3540_v61  ;;  %v8241_v61 = vld [vmem:[%s12706_s20 + $0x40] sm:$0xff] }
 0xd80   :  { %10686 = vtanh.f32 %v3539_v62  ;;  %v4220_v62 = vld [vmem:[#allocation2 + $0x10] sm:$0xff]  ;;  %v11908_v7 = vmul.f32 0.001, %v8241_v61 }
 0xd82   :  { %v4597_v44 = vrot.slane %v11908_v7, 4 }
 0xd89   :  { %v10685_v2 = vpop.eup %10684 }
 0xd8a   :  { %v10687_v3 = vpop.eup %10686  ;;  %v11811_v4 = vadd.f32 %v10685_v2, %v11735_v9  ;;  %v8213_v9 = vld [vmem:[%s12686_s11 + $0xc0] sm:$0xff]  ;;  %v4221_v2 = vld [vmem:[#allocation2 + $0x18] sm:$0xff] }
 0xd8b   :  { %v11808_v63 = vadd.f32 %v10687_v3, %v11733_v8  ;;  %v8207_v8 = vld [vmem:[%s12687_s12 + $0x28] sm:$0xff]  ;;  %v10118_v6 = vpack.c.bf16 %v8214_v5, %v8213_v9  ;;  %v11906_v3 = vmul.f32 0.001, %v8240_v60 }
 0xd8d   :  { %9273 = vmatprep.mubr.msk.f32.mxu0 %vm825_vm7, %v11808_v63  ;;  %v4225_v5 = vrot.slane %v11906_v3, 1  ;;  %v4596_v40 = vrot.slane %v11906_v3, 4 }
 0xd8e   :  { %9274 = vmatmul.mubr.msk.f32.vlgmr.msra.gmra.mrb[26].mxu0 %vm825_vm7, %v11811_v4 }
 0xd8f   :  { %9306 = vmatprep.mubr.msk.f32.mxu0 %vm229_vm1, %v8221_v33  ;;  %v4501_v33 = vrot.slane %v11908_v7, 3  ;;  %v4598_v58 = vsel %vm601_vm5, %v4596_v40, %v4597_v44 }
 0xe61   :  { %v9275_v11 = vpop.f32.mrb[26].mxu0 }
 0xe62   :  { %v3631_v12 = vpop.f32.mrb[27].mxu0 }
 0xe63   :  { %v10114_v13 = vpack.c.bf16 %v9275_v11, %v3631_v12  ;;  %v8242_v11 = vld [vmem:[%s12706_s20 + $0x48] sm:$0xff] }
 0xe64   :  { %v11916_v14 = vmul.f32 0.001, %v8242_v11  ;;  %v5263_v11 = vld [vmem:[#allocation6 + $0x18] sm:$0xff] }
 0xe65   :  { %10115 = vmatprep.subr.bf16.mxu1 %v10114_v13 }
 0xe66   :  { %10117 = vmatpush3.bf16.msra.mxu1 %v10114_v13  ;;  %v4228_v18 = vrot.slane %v11916_v14, 1  ;;  %v4599_v10 = vrot.slane %v11916_v14, 4 }
 0xe67   :  { %10119 = vmatprep.subr.bf16.mxu1 %v10118_v6 }
 0xe69   :  { %9281 = vmatmul.mubr.msk.f32.vlgmr.msra.gmra.mrb[12].mxu1 %vm229_vm1, %v8207_v8  ;;  %v10163_v8 = vpack.c.bf16 %v4221_v2, %v4220_v62 }
 0xe6a   :  { %10121 = vmatpush3.bf16.msra.mxu1 %v10118_v6  ;;  %v4226_v6 = vrot.slane %v11908_v7, 1 }
 0xe6b   :  { %10123 = vmatprep.subr.bf16.mxu1 %v10122_v16 }
 0xe6e   :  { %10125 = vmatpush3.bf16.msra.mxu1 %v10122_v16  ;;  %v4219_v16 = vld [vmem:[#allocation2 + $0x8] sm:$0xff] }
 0xe6f   :  { %10127 = vmatprep.subr.bf16.mxu1 %v10126_v19 }
 0xe72   :  { %10129 = vmatpush3.bf16.msra.mxu1 %v10126_v19  ;;  %v10166_v19 = vpack.c.bf16 %v4219_v16, %v4218_v15  ;;  %v5411_v15 = vld [vmem:[#allocation6 + $0x28] sm:$0xff] }
 0xe73   :  { %10131 = vmatprep.subr.bf16.mxu1 %v10130_v21 }
 0xe76   :  { %10133 = vmatpush3.bf16.msra.mxu1 %v10130_v21  ;;  %v10169_v21 = vpack.c.bf16 %v4403_v17, %v4402_v20  ;;  %v5562_v20 = vld [vmem:[#allocation6 + $0x40] sm:$0xff]  ;;  %v5563_v17 = vld [vmem:[#allocation6 + $0x48] sm:$0xff] }
 0xf3c   :  { %v9282_v23 = vpop.f32.mrb[12].mxu1 }
 0xf3d   :  { %v3724_v26 = vadd.f32 %v9282_v23, %v8210_v22  ;;  %v3718_v50 = vpop.f32.mrb[13].mxu1  ;;  %v4405_v23 = vrot.slane %v11908_v7, 2 }
 0xf3e   :  { %v3719_v24 = vadd.f32 %v8210_v22, %v3718_v50  ;;  %v4404_v22 = vrot.slane %v11906_v3, 2  ;;  %v4499_v50 = vld [vmem:[#allocation2 + $0x38] sm:$0xff] }
 0xf3f   :  { %v3728_v28 = vmul.f32 0.999995, %v3724_v26  ;;  %v4498_v26 = vld [vmem:[#allocation2 + $0x30] sm:$0xff] }
 0xf40   :  { %v3727_v30 = vmul.f32 0.999995, %v3719_v24  ;;  %v4406_v24 = vsel %vm405_vm3, %v4404_v22, %v4405_v23 }
 0xf42   :  { %10688 = vtanh.f32 %v3727_v30  ;;  %v10172_v30 = vpack.c.bf16 %v4499_v50, %v4498_v26 }
 0xf43   :  { %10690 = vtanh.f32 %v3728_v28  ;;  %v4407_v28 = vrot.slane %v11916_v14, 2 }
 0xf4c   :  { %v10689_v31 = vpop.eup %10688 }
 0xf4d   :  { %v10691_v32 = vpop.eup %10690  ;;  %9299 = vmatprep.mubr.msk.f32.mxu1 %vm825_vm7, %v10689_v31  ;;  %v4408_v31 = vsel %vm405_vm3, %v4405_v23, %v4407_v28  ;;  %v10273_v23 = vpack.c.bf16 %v5563_v17, %v5562_v20 }
 0xf4e   :  { %9300 = vmatmul.mubr.msk.f32.vlgmr.msra.gmra.mrb[14].mxu1 %vm825_vm7, %v10691_v32  ;;  %v4500_v32 = vrot.slane %v11906_v3, 3 }
0x1021   :  { %v9301_v34 = vpop.f32.mrb[14].mxu1 }
0x1022   :  { %v3817_v35 = vpop.f32.mrb[15].mxu1 }
0x1023   :  { %v10134_v36 = vpack.c.bf16 %v9301_v34, %v3817_v35  ;;  %v4594_v34 = vld [vmem:[#allocation2 + $0x40] sm:$0xff]  ;;  %v4595_v35 = vld [vmem:[#allocation2 + $0x48] sm:$0xff] }
0x1024   :  { %v10175_v37 = vpack.c.bf16 %v4595_v35, %v4594_v34 }
0x1025   :  { %10135 = vmatprep.subr.bf16.mxu0 %v10134_v36 }
0x1026   :  { %10137 = vmatpush3.bf16.msra.mxu0 %v10134_v36  ;;  %v4502_v36 = vsel %vm503_vm4, %v4500_v32, %v4501_v33 }
0x1027   :  { %10139 = vmatprep.subr.bf16.mxu0 %v11868_v43 }
0x1029   :  { %9307 = vmatmul.mubr.msk.f32.vlgmr.msra.gmra.mrb[28].mxu0 %vm229_vm1, %v8222_v54  ;;  %v4503_v54 = vrot.slane %v11916_v14, 3 }
0x102a   :  { %10141 = vmatpush3.bf16.msra.mxu0 %v11868_v43 }
0x102b   :  { %10143 = vmatprep.subr.bf16.mxu0 %v11873_v45  ;;  %v4504_v38 = vsel %vm503_vm4, %v4501_v33, %v4503_v54 }
0x102e   :  { %10145 = vmatpush3.bf16.msra.mxu0 %v11873_v45 }
0x102f   :  { %10147 = vmatprep.subr.bf16.mxu0 %v11884_v48 }
0x1032   :  { %10149 = vmatpush3.bf16.msra.mxu0 %v11884_v48 }
0x1033   :  { %10151 = vmatprep.subr.bf16.mxu0 %v11894_v53 }
0x1036   :  { %10153 = vmatpush3.bf16.msra.mxu0 %v11894_v53 }
0x1037   :  { %10162 = vmatprep.subr.bf16.mxu0 %v10967_v0 }
0x10fc   :  { %v9308_v56 = vpop.f32.mrb[28].mxu0 }
0x10fd   :  { %v3910_v55 = vadd.f32 %v9308_v56, %v8225_v41  ;;  %v3904_v49 = vpop.f32.mrb[29].mxu0  ;;  %v4600_v56 = vsel %vm601_vm5, %v4597_v44, %v4599_v10 }
0x10fe   :  { %v3905_v52 = vadd.f32 %v8225_v41, %v3904_v49  ;;  %v10178_v41 = vpack.c.bf16 %v4691_v47, %v4690_v46  ;;  %v4694_v49 = vrot.slane %v11908_v7, 5 }
0x10ff   :  { %v3914_v57 = vmul.f32 0.999995, %v3910_v55  ;;  %v4693_v55 = vrot.slane %v11906_v3, 5 }
0x1100   :  { %v3913_v59 = vmul.f32 0.999995, %v3905_v52  ;;  %v11997_v52 = vld [vmem:[%s12706_s20 + $0x50] sm:$0xff] }
0x1101   :  { %10692 = vtanh.f32 %v3914_v57  ;;  %v4695_v57 = vsel %vm700_vm6, %v4693_v55, %v4694_v49  ;;  %v4217_v60 = vmul.f32 0.001, %v11997_v52 }
0x1102   :  { %10694 = vtanh.f32 %v3913_v59  ;;  %v4696_v59 = vrot.slane %v11916_v14, 5 }
0x1103   :  { %v4698_v62 = vrot.slane %v4217_v60, 5 }
0x1104   :  { %v4697_v61 = vsel %vm700_vm6, %v4694_v49, %v4696_v59 }
0x1105   :  { %v4699_v2 = vsel %vm700_vm6, %v4696_v59, %v4698_v62 }
0x110b   :  { %v10693_v12 = vpop.eup %10692 }
0x110c   :  { %v10695_v13 = vpop.eup %10694  ;;  %v3918_v51 = vadd.f32 %v10693_v12, %v11811_v4  ;;  %v4229_v4 = vsel %vm223_vm2, %v4226_v6, %v4228_v18  ;;  %v8245_v12 = vld [vmem:[%s12706_s20 + $0x60] sm:$0xff] }
0x110d   :  { %v3917_v9 = vadd.f32 %v10695_v13, %v11808_v63  ;;  %v4227_v63 = vsel %vm223_vm2, %v4225_v5, %v4226_v6  ;;  %v5261_v5 = vld [vmem:[#allocation6 + $0x8] sm:$0xff] }
0x110f   :  { %9325 = vmatprep.mubr.msk.f32.mxu0 %vm825_vm7, %v3917_v9  ;;  %v5260_v9 = vld [vmem:[#allocation6] sm:$0xff] }
0x1110   :  { %9326 = vmatmul.mubr.msk.f32.vlgmr.msra.gmra.mrb[30].mxu0 %vm825_vm7, %v3918_v51  ;;  %v5410_v51 = vld [vmem:[#allocation6 + $0x20] sm:$0xff] }
0x1111   :  { %10164 = vmatpush3.bf16.msra.mxu0 %v10163_v8  ;;  %9358 = vmatprep.mubr.msk.f32.mxu0 %vm12701_vm0, %v10969_v1  ;;  %v5258_v8 = vmul.f32 0.001, %v8245_v12  ;;  %v10267_v16 = vpack.c.bf16 %v5411_v15, %v5410_v51 }
0x1112   :  { %10165 = vmatprep.subr.bf16.mxu0 %v10967_v0 }
0x1113   :  { %v5265_v6 = vrot.slane %v5258_v8, 1  ;;  %v5488_v22 = vrot.slane %v5258_v8, 3  ;;  %v5565_v50 = vrot.slane %v5258_v8, 4  ;;  %v5643_v33 = vrot.slane %v5258_v8, 5 }
0x1114   :  { %9359 = vmatmul.mubr.msk.f32.vlgmr.msra.gmra.mrb[32].mxu0 %vm229_vm1, %v4227_v63  ;;  %v5486_v63 = vld [vmem:[#allocation6 + $0x30] sm:$0xff] }
0x1115   :  { %9361 = vmatprep.mubr.msk.f32.mxu0 %vm12701_vm0, %v10969_v1  ;;  %10167 = vmatpush3.bf16.msra.mxu0 %v10166_v19  ;;  %v5412_v19 = vrot.slane %v5258_v8, 2 }
0x1116   :  { %10168 = vmatprep.subr.bf16.mxu0 %v10967_v0 }
0x1118   :  { %9362 = vmatmul.mubr.msk.f32.gmra.mrb[34].mxu0 %vm229_vm1, %v4229_v4 }
0x1119   :  { %9364 = vmatprep.mubr.msk.f32.mxu0 %vm12701_vm0, %v10969_v1 }
0x111c   :  { %9365 = vmatmul.mubr.msk.f32.gmra.mrb[36].mxu0 %vm229_vm1, %v4228_v18  ;;  %v5487_v18 = vld [vmem:[#allocation6 + $0x38] sm:$0xff] }
0x111d   :  { %9371 = vmatprep.mubr.msk.f32.mxu0 %vm12701_vm0, %v10969_v1  ;;  %v10270_v4 = vpack.c.bf16 %v5487_v18, %v5486_v63 }
0x1120   :  { %9372 = vmatmul.mubr.msk.f32.vlgmr.msra.gmra.mrb[32].mxu0 %vm229_vm1, %v11906_v3  ;;  %v201_v3 = vld [vmem:[%s12690_s15] sm:$0xff] }
0x1121   :  { %9374 = vmatprep.mubr.msk.f32.mxu0 %vm12701_vm0, %v10969_v1  ;;  %10170 = vmatpush3.bf16.msra.mxu0 %v10169_v21  ;;  %v8246_v21 = vld [vmem:[%s12706_s20 + $0x68] sm:$0x3] }
0x1122   :  { %10171 = vmatprep.subr.bf16.mxu0 %v10967_v0  ;;  %9332 = vmatprep.mubr.msk.f32.mxu1 %vm229_vm1, %v201_v3  ;;  %v5259_v26 = vmul.f32 0.001, %v8246_v21 }
0x1124   :  { %9375 = vmatmul.mubr.msk.f32.gmra.mrb[34].mxu0 %vm229_vm1, %v11908_v7  ;;  %v5262_v7 = vld [vmem:[#allocation6 + $0x10] sm:$0xff]  ;;  %v5644_v34 = vrot.slane %v5259_v26, 5 }
0x1125   :  { %9377 = vmatprep.mubr.msk.f32.mxu0 %vm12701_vm0, %v10969_v1  ;;  %v10261_v13 = vpack.c.bf16 %v5263_v11, %v5262_v7 }
0x1126   :  { %v5645_v35 = vsel %vm700_vm6, %v5643_v33, %v5644_v34  ;;  %v4805_v34 = vld [vmem:[#allocation4 + $0x68] sm:$0xff] }
0x1128   :  { %9378 = vmatmul.mubr.msk.f32.gmra.mrb[36].mxu0 %vm229_vm1, %v11916_v14  ;;  %v10264_v14 = vpack.c.bf16 %v5261_v5, %v5260_v9 }
0x1129   :  { %9384 = vmatprep.mubr.msk.f32.mxu0 %vm12701_vm0, %v10969_v1 }
0x112c   :  { %9385 = vmatmul.mubr.msk.f32.vlgmr.msra.gmra.mrb[32].mxu0 %vm229_vm1, %v4406_v24  ;;  %v5566_v24 = vrot.slane %v5259_v26, 4 }
0x112d   :  { %9387 = vmatprep.mubr.msk.f32.mxu0 %vm12701_vm0, %v10969_v1  ;;  %10173 = vmatpush3.bf16.msra.mxu0 %v10172_v30  ;;  %v5642_v30 = vld [vmem:[#allocation6 + $0x58] sm:$0xff] }
0x112e   :  { %10174 = vmatprep.subr.bf16.mxu0 %v10967_v0 }
0x1130   :  { %9388 = vmatmul.mubr.msk.f32.gmra.mrb[34].mxu0 %vm229_vm1, %v4408_v31  ;;  %v5567_v31 = vsel %vm601_vm5, %v5565_v50, %v5566_v24  ;;  %v10743_v24 = vld [vmem:[%s12682_s7 + $0x10] sm:$0xff] }
0x1131   :  { %9390 = vmatprep.mubr.msk.f32.mxu0 %vm12701_vm0, %v10969_v1 }
0x1134   :  { %9391 = vmatmul.mubr.msk.f32.gmra.mrb[36].mxu0 %vm229_vm1, %v4407_v28  ;;  %v5641_v28 = vld [vmem:[#allocation6 + $0x50] sm:$0xff] }
0x1135   :  { %9397 = vmatprep.mubr.msk.f32.mxu0 %vm12701_vm0, %v10969_v1  ;;  %v10276_v32 = vpack.c.bf16 %v5642_v30, %v5641_v28 }
0x1138   :  { %9398 = vmatmul.mubr.msk.f32.vlgmr.msra.gmra.mrb[32].mxu0 %vm229_vm1, %v4502_v36 }
0x1139   :  { %9400 = vmatprep.mubr.msk.f32.mxu0 %vm12701_vm0, %v10969_v1  ;;  %10176 = vmatpush3.bf16.msra.mxu0 %v10175_v37 }
0x113a   :  { %10177 = vmatprep.subr.bf16.mxu0 %v10967_v0 }
0x113c   :  { %9401 = vmatmul.mubr.msk.f32.gmra.mrb[34].mxu0 %vm229_vm1, %v4504_v38  ;;  %v202_v38 = vld [vmem:[%s12690_s15 + $0x8] sm:$0xff] }
0x113d   :  { %9403 = vmatprep.mubr.msk.f32.mxu0 %vm12701_vm0, %v10969_v1 }
0x1140   :  { %9404 = vmatmul.mubr.msk.f32.gmra.mrb[36].mxu0 %vm229_vm1, %v4503_v54 }
0x1141   :  { %9410 = vmatprep.mubr.msk.f32.mxu0 %vm12701_vm0, %v10969_v1 }
0x1144   :  { %9411 = vmatmul.mubr.msk.f32.vlgmr.msra.gmra.mrb[32].mxu0 %vm229_vm1, %v4598_v58 }
0x1145   :  { %9413 = vmatprep.mubr.msk.f32.mxu0 %vm12701_vm0, %v10969_v1  ;;  %10179 = vmatpush3.bf16.msra.mxu0 %v10178_v41 }
0x1146   :  { %10260 = vmatprep.subr.bf16.mxu0 %v10967_v0 }
0x1148   :  { %9414 = vmatmul.mubr.msk.f32.gmra.mrb[34].mxu0 %vm229_vm1, %v4600_v56 }
0x1149   :  { %9416 = vmatprep.mubr.msk.f32.mxu0 %vm12701_vm0, %v10969_v1 }
0x114c   :  { %9417 = vmatmul.mubr.msk.f32.gmra.mrb[36].mxu0 %vm229_vm1, %v4599_v10 }
0x114d   :  { %9423 = vmatprep.mubr.msk.f32.mxu0 %vm12701_vm0, %v10969_v1 }
0x1150   :  { %9424 = vmatmul.mubr.msk.f32.vlgmr.msra.gmra.mrb[32].mxu0 %vm229_vm1, %v4695_v57 }
0x1151   :  { %9426 = vmatprep.mubr.msk.f32.mxu0 %vm12701_vm0, %v10969_v1  ;;  %10262 = vmatpush3.bf16.msra.mxu0 %v10261_v13 }
0x1152   :  { %10263 = vmatprep.subr.bf16.mxu0 %v10967_v0 }
0x1154   :  { %9427 = vmatmul.mubr.msk.f32.gmra.mrb[34].mxu0 %vm229_vm1, %v4697_v61 }
0x1155   :  { %9429 = vmatprep.mubr.msk.f32.mxu0 %vm12701_vm0, %v10969_v1 }
0x1158   :  { %9430 = vmatmul.mubr.msk.f32.gmra.mrb[36].mxu0 %vm229_vm1, %v4699_v2 }
0x1159   :  { %9531 = vmatprep.mubr.msk.f32.mxu0 %vm12701_vm0, %v10969_v1 }
0x115c   :  { %9532 = vmatmul.mubr.msk.f32.vlgmr.msra.gmra.mrb[38].mxu0 %vm229_vm1, %v5265_v6 }
0x115d   :  { %10265 = vmatpush3.bf16.msra.mxu0 %v10264_v14  ;;  %9538 = vmatprep.mubr.msk.f32.mxu0 %vm12701_vm0, %v10969_v1 }
0x115e   :  { %10266 = vmatprep.subr.bf16.mxu0 %v10967_v0 }
0x1164   :  { %9539 = vmatmul.mubr.msk.f32.vlgmr.msra.gmra.mrb[38].mxu0 %vm229_vm1, %v5258_v8 }
0x1165   :  { %10268 = vmatpush3.bf16.msra.mxu0 %v10267_v16  ;;  %9545 = vmatprep.mubr.msk.f32.mxu0 %vm12701_vm0, %v10969_v1 }
0x1166   :  { %10269 = vmatprep.subr.bf16.mxu0 %v10967_v0 }
0x116c   :  { %9546 = vmatmul.mubr.msk.f32.vlgmr.msra.gmra.mrb[38].mxu0 %vm229_vm1, %v5412_v19  ;;  %v8230_v19 = vld [vmem:[%s12691_s16] ss:$0 sm:$0xff] }
0x116d   :  { %10271 = vmatpush3.bf16.msra.mxu0 %v10270_v4  ;;  %9552 = vmatprep.mubr.msk.f32.mxu0 %vm12701_vm0, %v10969_v1 }
0x116e   :  { %10272 = vmatprep.subr.bf16.mxu0 %v10967_v0 }
0x1174   :  { %9553 = vmatmul.mubr.msk.f32.vlgmr.msra.gmra.mrb[38].mxu0 %vm229_vm1, %v5488_v22  ;;  %v4800_v22 = vld [vmem:[#allocation4 + $0x40] sm:$0xff] }
0x1175   :  { %10274 = vmatpush3.bf16.msra.mxu0 %v10273_v23  ;;  %9559 = vmatprep.mubr.msk.f32.mxu0 %vm12701_vm0, %v10969_v1  ;;  %v4801_v23 = vld [vmem:[#allocation4 + $0x48] sm:$0xff] }
0x1176   :  { %10275 = vmatprep.subr.bf16.mxu0 %v10967_v0  ;;  %v10180_v28 = vpack.c.bf16 %v4801_v23, %v4800_v22  ;;  %v5069_v22 = vld [vmem:[#allocation4 + $0xc8] sm:$0xff] }
0x117c   :  { %9560 = vmatmul.mubr.msk.f32.vlgmr.msra.gmra.mrb[38].mxu0 %vm229_vm1, %v5567_v31  ;;  %v4802_v31 = vld [vmem:[#allocation4 + $0x50] sm:$0xff] }
0x117d   :  { %10277 = vmatpush3.bf16.msra.mxu0 %v10276_v32  ;;  %9566 = vmatprep.mubr.msk.f32.mxu0 %vm12701_vm0, %v10969_v1  ;;  %v4803_v32 = vld [vmem:[#allocation4 + $0x58] sm:$0xff] }
0x117e   :  { %10338 = vmatprep.subr.bf16.mxu0 %v10967_v0  ;;  %v10184_v33 = vpack.c.bf16 %v4803_v32, %v4802_v31  ;;  %v5074_v31 = vld [vmem:[#allocation4 + $0xf0] sm:$0xff]  ;;  %v5075_v32 = vld [vmem:[#allocation4 + $0xf8] sm:$0xff] }
0x1184   :  { %9567 = vmatmul.mubr.msk.f32.vlgmr.msra.gmra.mrb[38].mxu0 %vm229_vm1, %v5645_v35  ;;  %v183_v35 = vld [vmem:[%s12682_s7 + $0x8] sm:$0xff] }
0x1185   :  { %9668 = vmatprep.mubr.msk.f32.mxu0 %vm12701_vm0, %v10969_v1 }
0x11e3   :  { %v9327_v36 = vpop.f32.mrb[30].mxu0 }
0x11e4   :  { %v3991_v54 = vpop.f32.mrb[31].mxu0 }
0x11e5   :  { %v10154_v37 = vpack.c.bf16 %v9327_v36, %v3991_v54  ;;  %v4806_v54 = vld [vmem:[#allocation4 + $0x70] sm:$0xff] }
0x11e7   :  { %10155 = vmatprep.subr.bf16.mxu1 %v10154_v37 }
0x11e8   :  { %10157 = vmatpush3.bf16.msra.mxu1 %v10154_v37  ;;  %v4807_v37 = vld [vmem:[#allocation4 + $0x78] sm:$0xff] }
0x11e9   :  { %10158 = vmatprep.subr.bf16.mxu1 %v10967_v0 }
0x11eb   :  { %9333 = vmatmul.mubr.msk.f32.vlgmr.msra.gmra.mrb[16].mxu1 %vm229_vm1, %v202_v38  ;;  %v184_v38 = vld [vmem:[%s12682_s7 + $0x10] sm:$0xff] }
0x11ec   :  { %9339 = vmatprep.mubr.msk.f32.mxu1 %vm12701_vm0, %v10969_v1 }
0x1223   :  { %v4772_v40 = vpop.f32.mrb[32].mxu0 }
0x1224   :  { %v12059_v44 = vmax.f32 %v4772_v40, 0.0  ;;  %v9425_v46 = vpop.f32.mrb[33].mxu0  ;;  %v10192_v40 = vpack.c.bf16 %v4807_v37, %v4806_v54  ;;  %v5166_v54 = vld [vmem:[#allocation4 + $0x120] sm:$0xff]  ;;  %v5167_v37 = vld [vmem:[#allocation4 + $0x128] sm:$0xff] }
0x1225   :  { %v4792_v46 = vld [vmem:[#allocation4] sm:$0xff] }
0x1226   :  { %v4811_v41 = vrot.slane %v12059_v44, 1  ;;  %v4982_v56 = vrot.slane %v12059_v44, 2  ;;  %v5076_v55 = vrot.slane %v12059_v44, 3  ;;  %v5170_v49 = vrot.slane %v12059_v44, 4 }
0x1227   :  { %v4777_v47 = vpop.f32.mrb[34].mxu0 }
0x1228   :  { %v12061_v58 = vmax.f32 %v4777_v47, 0.0  ;;  %v9428_v10 = vpop.f32.mrb[35].mxu0  ;;  %v4793_v47 = vld [vmem:[#allocation4 + $0x8] sm:$0xff] }
0x1229   :  { %v185_v10 = vld [vmem:[%s12682_s7 + $0x18] sm:$0xff] }
0x122a   :  { %v4812_v57 = vrot.slane %v12061_v58, 1  ;;  %v4983_v59 = vrot.slane %v12061_v58, 2  ;;  %v5077_v60 = vrot.slane %v12061_v58, 3  ;;  %v5171_v61 = vrot.slane %v12061_v58, 4 }
0x122b   :  { %v4782_v62 = vpop.f32.mrb[36].mxu0 }
0x122c   :  { %v4791_v2 = vmax.f32 %v4782_v62, 0.0  ;;  %v9431_v3 = vpop.f32.mrb[37].mxu0  ;;  %v12072_v7 = vsel %vm223_vm2, %v4811_v41, %v4812_v57  ;;  %v12075_v11 = vsel %vm405_vm3, %v4982_v56, %v4983_v59  ;;  %v12078_v12 = vsel %vm503_vm4, %v5076_v55, %v5077_v60  ;;  %v186_v56 = vld [vmem:[%s12682_s7 + $0x20] sm:$0x7]  ;;  %v4794_v55 = vld [vmem:[#allocation4 + $0x10] sm:$0xff] }
0x122d   :  { %v12081_v13 = vsel %vm601_vm5, %v5170_v49, %v5171_v61  ;;  %v10196_v41 = vpack.c.bf16 %v4793_v47, %v4792_v46  ;;  %v4795_v49 = vld [vmem:[#allocation4 + $0x18] sm:$0xff]  ;;  %v4798_v62 = vld [vmem:[#allocation4 + $0x30] sm:$0xff]  ;;  %v5728_v47 = vld [vmem:[#allocation7 + $0x40] sm:$0xff] }
0x122e   :  { %v4814_v8 = vrot.slane %v4791_v2, 1  ;;  %v4985_v9 = vrot.slane %v4791_v2, 2  ;;  %v5079_v5 = vrot.slane %v4791_v2, 3  ;;  %v5173_v6 = vrot.slane %v4791_v2, 4  ;;  %v4799_v2 = vld [vmem:[#allocation4 + $0x38] sm:$0xff] }
0x122f   :  { %v10208_v3 = vpack.c.bf16 %v4799_v2, %v4798_v62  ;;  %v5721_v2 = vld [vmem:[#allocation7 + $0x8] sm:$0xff] }
0x1230   :  { %v4815_v14 = vsel %vm223_vm2, %v4812_v57, %v4814_v8  ;;  %v12085_v51 = vsel %vm405_vm3, %v4983_v59, %v4985_v9  ;;  %v12088_v15 = vsel %vm503_vm4, %v5077_v60, %v5079_v5  ;;  %v12091_v16 = vsel %vm601_vm5, %v5171_v61, %v5173_v6  ;;  %v4796_v59 = vld [vmem:[#allocation4 + $0x20] sm:$0xff]  ;;  %v4797_v60 = vld [vmem:[#allocation4 + $0x28] sm:$0xff]  ;;  %v4976_v5 = vld [vmem:[#allocation4 + $0x90] sm:$0xff] }
0x1231   :  { %v10200_v57 = vpack.c.bf16 %v4795_v49, %v4794_v55  ;;  %v10204_v61 = vpack.c.bf16 %v4797_v60, %v4796_v59  ;;  %v4974_v8 = vld [vmem:[#allocation4 + $0x80] sm:$0xff]  ;;  %v4975_v9 = vld [vmem:[#allocation4 + $0x88] sm:$0xff]  ;;  %v4977_v6 = vld [vmem:[#allocation4 + $0x98] sm:$0xff] }
0x1232   :  { %v5732_v55 = vld [vmem:[#allocation7 + $0x60] sm:$0xff]  ;;  %v5733_v49 = vld [vmem:[#allocation7 + $0x68] sm:$0xff]  ;;  %v5734_v59 = vld [vmem:[#allocation7 + $0x70] sm:$0xff] }
0x1233   :  { %v5735_v60 = vld [vmem:[#allocation7 + $0x78] sm:$0xff] }
0x1257   :  { %v12093_v63 = vpop.f32.mrb[38].mxu0 }
0x1258   :  { %v9568_v18 = vpop.f32.mrb[39].mxu0  ;;  %v12161_v62 = vmax.f32 %v12093_v63, 0.0  ;;  %v5724_v63 = vld [vmem:[#allocation7 + $0x20] sm:$0xff] }
0x1259   :  { %v4978_v18 = vld [vmem:[#allocation4 + $0xa0] sm:$0xff] }
0x12be   :  { %v9334_v4 = vpop.f32.mrb[16].mxu1 }
0x12bf   :  { %v4084_v20 = vadd.f32 %v9334_v4, %v8230_v19  ;;  %v4078_v17 = vpop.f32.mrb[17].mxu1  ;;  %v4980_v4 = vld [vmem:[#allocation4 + $0xb0] sm:$0xff] }
0x12c0   :  { %v4079_v21 = vadd.f32 %v8230_v19, %v4078_v17  ;;  %v4979_v19 = vld [vmem:[#allocation4 + $0xa8] sm:$0xff] }
0x12c1   :  { %v4088_v26 = vadd.f32 %v4084_v20, %v11700_v42  ;;  %v182_v42 = vld [vmem:[%s12682_s7] sm:$0xff]  ;;  %v4981_v20 = vld [vmem:[#allocation4 + $0xb8] sm:$0xff] }
0x12c2   :  { %v4087_v50 = vadd.f32 %v4079_v21, %v11695_v39  ;;  %v4804_v39 = vld [vmem:[#allocation4 + $0x60] sm:$0xff]  ;;  %v10224_v17 = vpack.c.bf16 %v4981_v20, %v4980_v4  ;;  %v5883_v20 = vld [vmem:[#allocation7 + $0x88] sm:$0xff] }
0x12c3   :  { %v10188_v36 = vpack.c.bf16 %v4805_v34, %v4804_v39  ;;  %v5068_v21 = vld [vmem:[#allocation4 + $0xc0] sm:$0xff]  ;;  %v5163_v39 = vld [vmem:[#allocation4 + $0x108] sm:$0xff] }
0x12c4   :  { %v10159_v30 = vpack.c.bf16 %v4088_v26, %v4087_v50  ;;  %v10228_v23 = vpack.c.bf16 %v5069_v22, %v5068_v21  ;;  %v5070_v26 = vld [vmem:[#allocation4 + $0xd0] sm:$0xff]  ;;  %v5071_v50 = vld [vmem:[#allocation4 + $0xd8] sm:$0xff]  ;;  %v5882_v4 = vld [vmem:[#allocation7 + $0x80] sm:$0xff] }
0x12c5   :  { %v5884_v21 = vld [vmem:[#allocation7 + $0x90] sm:$0xff]  ;;  %v5885_v22 = vld [vmem:[#allocation7 + $0x98] sm:$0xff] }
0x12c6   :  { %10161 = vmatpush3.bf16.xpose.msk.msra.mxu1 %vm12102_vm13, %v10159_v30  ;;  %v5073_v30 = vld [vmem:[#allocation4 + $0xe8] sm:$0xff] }
0x12c7   :  { %10181 = vmatprep.subr.bf16.mxu1 %v10180_v28 }
0x12cd   :  { %9340 = vmatmul.mubr.msk.f32.vlgmr.msra.gmra.mrb[18].mxu1 %vm2871_vm15, %v182_v42  ;;  %v10240_v42 = vpack.c.bf16 %v5075_v32, %v5074_v31  ;;  %v5964_v31 = vld [vmem:[#allocation7 + $0xc0] sm:$0xff]  ;;  %v5965_v32 = vld [vmem:[#allocation7 + $0xc8] sm:$0xff] }
0x12ce   :  { %10183 = vmatpush3.bf16.msra.mxu1 %v10180_v28  ;;  %9342 = vmatprep.mubr.msk.f32.mxu1 %vm12701_vm0, %v10969_v1  ;;  %v5072_v28 = vld [vmem:[#allocation4 + $0xe0] sm:$0xff] }
0x12cf   :  { %10185 = vmatprep.subr.bf16.mxu1 %v10184_v33 }
0x12d1   :  { %9343 = vmatmul.mubr.msk.f32.gmra.mrb[20].mxu1 %vm2871_vm15, %v183_v35  ;;  %v5164_v35 = vld [vmem:[#allocation4 + $0x110] sm:$0xff] }
0x12d2   :  { %10187 = vmatpush3.bf16.msra.mxu1 %v10184_v33  ;;  %9345 = vmatprep.mubr.msk.f32.mxu1 %vm12701_vm0, %v10969_v1  ;;  %v5162_v33 = vld [vmem:[#allocation4 + $0x100] sm:$0xff] }
0x12d3   :  { %10189 = vmatprep.subr.bf16.mxu1 %v10188_v36  ;;  %v10244_v34 = vpack.c.bf16 %v5163_v39, %v5162_v33  ;;  %v5890_v33 = vrot.slane %v12161_v62, 2  ;;  %v5966_v39 = vld [vmem:[#allocation7 + $0xd0] sm:$0xff] }
0x12d5   :  { %9346 = vmatmul.mubr.msk.f32.gmra.mrb[22].mxu1 %vm2871_vm15, %v184_v38  ;;  %v5168_v38 = vld [vmem:[#allocation4 + $0x130] sm:$0xff] }
0x12d6   :  { %9348 = vmatprep.mubr.msk.f32.mxu1 %vm12701_vm0, %v10969_v1  ;;  %10191 = vmatpush3.bf16.msra.mxu1 %v10188_v36  ;;  %v5165_v36 = vld [vmem:[#allocation4 + $0x118] sm:$0xff] }
0x12d7   :  { %10193 = vmatprep.subr.bf16.mxu1 %v10192_v40 }
0x12d9   :  { %9349 = vmatmul.mubr.msk.f32.gmra.mrb[24].mxu1 %vm2871_vm15, %v185_v10  ;;  %v5729_v10 = vld [vmem:[#allocation7 + $0x48] sm:$0xff] }
0x12da   :  { %9351 = vmatprep.mubr.msk.f32.mxu1 %vm12701_vm0, %v10969_v1  ;;  %10195 = vmatpush3.bf16.msra.mxu1 %v10192_v40  ;;  %v5169_v40 = vld [vmem:[#allocation4 + $0x138] sm:$0xff] }
0x12db   :  { %10197 = vmatprep.subr.bf16.mxu1 %v10196_v41  ;;  %v10256_v46 = vpack.c.bf16 %v5169_v40, %v5168_v38  ;;  %v6046_v40 = vld [vmem:[#allocation7 + $0x100] sm:$0xff] }
0x12dd   :  { %9352 = vmatmul.mubr.msk.f32.gmra.mrb[26].mxu1 %vm2871_vm15, %v186_v56  ;;  %v5731_v56 = vld [vmem:[#allocation7 + $0x58] sm:$0xff] }
0x12de   :  { %9448 = vmatprep.mubr.msk.f32.mxu1 %vm825_vm7, %v12072_v7  ;;  %v10212_v7 = vpack.c.bf16 %v4975_v9, %v4974_v8  ;;  %v5737_v8 = vrot.slane %v12161_v62, 1  ;;  %v5722_v9 = vld [vmem:[#allocation7 + $0x10] sm:$0xff] }
0x12e1   :  { %9449 = vmatmul.mubr.msk.f32.vlgmr.msra.gmra.mrb[28].mxu1 %vm825_vm7, %v4815_v14  ;;  %v10216_v14 = vpack.c.bf16 %v4977_v6, %v4976_v5  ;;  %v5725_v6 = vld [vmem:[#allocation7 + $0x28] sm:$0xff] }
0x12e2   :  { %10199 = vmatpush3.bf16.msra.mxu1 %v10196_v41  ;;  %9467 = vmatprep.mubr.msk.f32.mxu1 %vm825_vm7, %v12059_v44  ;;  %v10220_v44 = vpack.c.bf16 %v4979_v19, %v4978_v18  ;;  %v10279_v41 = vpack.c.bf16 %v5729_v10, %v5728_v47  ;;  %v5726_v18 = vld [vmem:[#allocation7 + $0x30] sm:$0xff]  ;;  %v5727_v19 = vld [vmem:[#allocation7 + $0x38] sm:$0xff]  ;;  %v5972_v10 = vrot.slane %v12161_v62, 3 }
0x12e3   :  { %10201 = vmatprep.subr.bf16.mxu1 %v10200_v57 }
0x12e6   :  { %10203 = vmatpush3.bf16.msra.mxu1 %v10200_v57  ;;  %v10285_v57 = vpack.c.bf16 %v5733_v49, %v5732_v55  ;;  %v6051_v55 = vld [vmem:[#allocation7 + $0x128] sm:$0xff] }
0x12e7   :  { %10205 = vmatprep.subr.bf16.mxu1 %v10204_v61 }
0x12ea   :  { %10207 = vmatpush3.bf16.msra.mxu1 %v10204_v61  ;;  %v10288_v61 = vpack.c.bf16 %v5735_v60, %v5734_v59  ;;  %v6053_v59 = vld [vmem:[#allocation7 + $0x138] sm:$0xff] }
0x12eb   :  { %10209 = vmatprep.subr.bf16.mxu1 %v10208_v3 }
0x12ee   :  { %10211 = vmatpush3.bf16.msra.mxu1 %v10208_v3 }
0x12ef   :  { %10213 = vmatprep.subr.bf16.mxu1 %v10212_v7 }
0x12f1   :  { %9468 = vmatmul.mubr.msk.f32.vlgmr.msra.gmra.mrb[28].mxu1 %vm825_vm7, %v12061_v58  ;;  %v10232_v58 = vpack.c.bf16 %v5071_v50, %v5070_v26  ;;  %v5886_v26 = vld [vmem:[#allocation7 + $0xa0] sm:$0xff]  ;;  %v5887_v50 = vld [vmem:[#allocation7 + $0xa8] sm:$0xff] }
0x12f2   :  { %10215 = vmatpush3.bf16.msra.mxu1 %v10212_v7  ;;  %9486 = vmatprep.mubr.msk.f32.mxu1 %vm825_vm7, %v12075_v11  ;;  %v10236_v11 = vpack.c.bf16 %v5073_v30, %v5072_v28  ;;  %v5723_v7 = vld [vmem:[#allocation7 + $0x18] sm:$0xff]  ;;  %v5888_v28 = vld [vmem:[#allocation7 + $0xb0] sm:$0xff] }
0x12f3   :  { %10217 = vmatprep.subr.bf16.mxu1 %v10216_v14  ;;  %v10294_v5 = vpack.c.bf16 %v5723_v7, %v5722_v9  ;;  %v5889_v30 = vld [vmem:[#allocation7 + $0xb8] sm:$0xff] }
0x12f6   :  { %10219 = vmatpush3.bf16.msra.mxu1 %v10216_v14  ;;  %v10297_v14 = vpack.c.bf16 %v5725_v6, %v5724_v63 }
0x12f7   :  { %10221 = vmatprep.subr.bf16.mxu1 %v10220_v44 }
0x12fa   :  { %10223 = vmatpush3.bf16.msra.mxu1 %v10220_v44  ;;  %v10300_v44 = vpack.c.bf16 %v5727_v19, %v5726_v18 }
0x12fb   :  { %10225 = vmatprep.subr.bf16.mxu1 %v10224_v17 }
0x12fe   :  { %10227 = vmatpush3.bf16.msra.mxu1 %v10224_v17  ;;  %v10303_v17 = vpack.c.bf16 %v5883_v20, %v5882_v4 }
0x12ff   :  { %10229 = vmatprep.subr.bf16.mxu1 %v10228_v23 }
0x1301   :  { %9487 = vmatmul.mubr.msk.f32.vlgmr.msra.gmra.mrb[28].mxu1 %vm825_vm7, %v12085_v51  ;;  %v10248_v51 = vpack.c.bf16 %v5165_v36, %v5164_v35  ;;  %v5968_v36 = vld [vmem:[#allocation7 + $0xe0] sm:$0xff] }
0x1302   :  { %10231 = vmatpush3.bf16.msra.mxu1 %v10228_v23  ;;  %9505 = vmatprep.mubr.msk.f32.mxu1 %vm825_vm7, %v12078_v12  ;;  %v10252_v12 = vpack.c.bf16 %v5167_v37, %v5166_v54  ;;  %v10306_v23 = vpack.c.bf16 %v5885_v22, %v5884_v21  ;;  %v5970_v37 = vld [vmem:[#allocation7 + $0xf0] sm:$0xff]  ;;  %v10724_v22 = vld [vmem:[#allocation9] sm:$0xff] }
0x1303   :  { %10233 = vmatprep.subr.bf16.mxu1 %v10232_v58 }
0x1306   :  { %10235 = vmatpush3.bf16.msra.mxu1 %v10232_v58  ;;  %v10309_v58 = vpack.c.bf16 %v5887_v50, %v5886_v26 }
0x1307   :  { %10237 = vmatprep.subr.bf16.mxu1 %v10236_v11 }
0x130a   :  { %10239 = vmatpush3.bf16.msra.mxu1 %v10236_v11  ;;  %v10312_v11 = vpack.c.bf16 %v5889_v30, %v5888_v28 }
0x130b   :  { %10241 = vmatprep.subr.bf16.mxu1 %v10240_v42 }
0x130e   :  { %10243 = vmatpush3.bf16.msra.mxu1 %v10240_v42  ;;  %v10315_v42 = vpack.c.bf16 %v5965_v32, %v5964_v31 }
0x130f   :  { %10245 = vmatprep.subr.bf16.mxu1 %v10244_v34 }
0x1311   :  { %9506 = vmatmul.mubr.msk.f32.vlgmr.msra.gmra.mrb[28].mxu1 %vm825_vm7, %v12088_v15  ;;  %v5730_v15 = vld [vmem:[#allocation7 + $0x50] sm:$0xff] }
0x1312   :  { %10247 = vmatpush3.bf16.msra.mxu1 %v10244_v34  ;;  %9524 = vmatprep.mubr.msk.f32.mxu1 %vm825_vm7, %v12081_v13  ;;  %v10282_v13 = vpack.c.bf16 %v5731_v56, %v5730_v15  ;;  %v5967_v34 = vld [vmem:[#allocation7 + $0xd8] sm:$0xff] }
0x1313   :  { %10249 = vmatprep.subr.bf16.mxu1 %v10248_v51  ;;  %v10318_v35 = vpack.c.bf16 %v5967_v34, %v5966_v39  ;;  %v6049_v15 = vld [vmem:[#allocation7 + $0x118] sm:$0xff] }
0x1316   :  { %10251 = vmatpush3.bf16.msra.mxu1 %v10248_v51  ;;  %v5969_v51 = vld [vmem:[#allocation7 + $0xe8] sm:$0xff] }
0x1317   :  { %10253 = vmatprep.subr.bf16.mxu1 %v10252_v12  ;;  %v10321_v54 = vpack.c.bf16 %v5969_v51, %v5968_v36 }
0x131a   :  { %10255 = vmatpush3.bf16.msra.mxu1 %v10252_v12  ;;  %v5971_v12 = vld [vmem:[#allocation7 + $0xf8] sm:$0xff] }
0x131b   :  { %10257 = vmatprep.subr.bf16.mxu1 %v10256_v46  ;;  %v10324_v38 = vpack.c.bf16 %v5971_v12, %v5970_v37 }
0x131e   :  { %10259 = vmatpush3.bf16.msra.mxu1 %v10256_v46  ;;  %v6047_v46 = vld [vmem:[#allocation7 + $0x108] sm:$0xff] }
0x131f   :  { %10278 = vmatprep.subr.bf16.mxu1 %v10967_v0  ;;  %v10327_v47 = vpack.c.bf16 %v6047_v46, %v6046_v40 }
0x1321   :  { %9525 = vmatmul.mubr.msk.f32.vlgmr.msra.gmra.mrb[28].mxu1 %vm825_vm7, %v12091_v16  ;;  %v5720_v16 = vld [vmem:[#allocation7] sm:$0xff] }
0x1322   :  { %10280 = vmatpush3.bf16.msra.mxu1 %v10279_v41  ;;  %9585 = vmatprep.mubr.msk.f32.mxu1 %vm12701_vm0, %v10969_v1  ;;  %v10291_v3 = vpack.c.bf16 %v5721_v2, %v5720_v16  ;;  %v6048_v41 = vld [vmem:[#allocation7 + $0x110] sm:$0xff] }
0x1323   :  { %10281 = vmatprep.subr.bf16.mxu1 %v10967_v0  ;;  %v10330_v56 = vpack.c.bf16 %v6049_v15, %v6048_v41  ;;  %v12246_v41 = vld [vmem:[%s12706_s20 + $0x38] sm:$0xff] }
0x1326   :  { %10283 = vmatpush3.bf16.msra.mxu1 %v10282_v13  ;;  %v6050_v13 = vld [vmem:[#allocation7 + $0x120] sm:$0xff] }
0x1327   :  { %10284 = vmatprep.subr.bf16.mxu1 %v10967_v0  ;;  %v10333_v49 = vpack.c.bf16 %v6051_v55, %v6050_v13  ;;  %v12258_v55 = vld [vmem:[%s12706_s20 + $0x48] sm:$0xff] }
0x132a   :  { %10286 = vmatpush3.bf16.msra.mxu1 %v10285_v57  ;;  %v6052_v57 = vld [vmem:[#allocation7 + $0x130] sm:$0xff] }
0x132b   :  { %10287 = vmatprep.subr.bf16.mxu1 %v10967_v0  ;;  %v10336_v60 = vpack.c.bf16 %v6053_v59, %v6052_v57 }
0x132e   :  { %10289 = vmatpush3.bf16.msra.mxu1 %v10288_v61  ;;  %v6054_v61 = vrot.slane %v12161_v62, 4 }
0x132f   :  { %10290 = vmatprep.subr.bf16.mxu1 %v10967_v0 }
0x1331   :  { %9586 = vmatmul.mubr.msk.f32.vlgmr.msra.gmra.mrb[30].mxu1 %vm825_vm7, %v5737_v8 }
0x1332   :  { %10292 = vmatpush3.bf16.msra.mxu1 %v10291_v3  ;;  %9604 = vmatprep.mubr.msk.f32.mxu1 %vm12701_vm0, %v10969_v1 }
0x1333   :  { %10293 = vmatprep.subr.bf16.mxu1 %v10967_v0 }
0x1336   :  { %10295 = vmatpush3.bf16.msra.mxu1 %v10294_v5 }
0x1337   :  { %10296 = vmatprep.subr.bf16.mxu1 %v10967_v0 }
0x133a   :  { %10298 = vmatpush3.bf16.msra.mxu1 %v10297_v14 }
0x133b   :  { %10299 = vmatprep.subr.bf16.mxu1 %v10967_v0 }
0x133e   :  { %10301 = vmatpush3.bf16.msra.mxu1 %v10300_v44 }
0x133f   :  { %10302 = vmatprep.subr.bf16.mxu1 %v10967_v0 }
0x1341   :  { %9605 = vmatmul.mubr.msk.f32.vlgmr.msra.gmra.mrb[30].mxu1 %vm825_vm7, %v12161_v62 }
0x1342   :  { %10304 = vmatpush3.bf16.msra.mxu1 %v10303_v17  ;;  %9623 = vmatprep.mubr.msk.f32.mxu1 %vm12701_vm0, %v10969_v1 }
0x1343   :  { %10305 = vmatprep.subr.bf16.mxu1 %v10967_v0 }
0x1346   :  { %10307 = vmatpush3.bf16.msra.mxu1 %v10306_v23 }
0x1347   :  { %10308 = vmatprep.subr.bf16.mxu1 %v10967_v0 }
0x134a   :  { %10310 = vmatpush3.bf16.msra.mxu1 %v10309_v58 }
0x134b   :  { %10311 = vmatprep.subr.bf16.mxu1 %v10967_v0 }
0x134e   :  { %10313 = vmatpush3.bf16.msra.mxu1 %v10312_v11 }
0x134f   :  { %10314 = vmatprep.subr.bf16.mxu1 %v10967_v0 }
0x1351   :  { %9624 = vmatmul.mubr.msk.f32.vlgmr.msra.gmra.mrb[30].mxu1 %vm825_vm7, %v5890_v33 }
0x1352   :  { %10316 = vmatpush3.bf16.msra.mxu1 %v10315_v42  ;;  %9642 = vmatprep.mubr.msk.f32.mxu1 %vm12701_vm0, %v10969_v1 }
0x1353   :  { %10317 = vmatprep.subr.bf16.mxu1 %v10967_v0 }
0x1356   :  { %10319 = vmatpush3.bf16.msra.mxu1 %v10318_v35 }
0x1357   :  { %10320 = vmatprep.subr.bf16.mxu1 %v10967_v0 }
0x135a   :  { %10322 = vmatpush3.bf16.msra.mxu1 %v10321_v54 }
0x135b   :  { %10323 = vmatprep.subr.bf16.mxu1 %v10967_v0 }
0x135e   :  { %10325 = vmatpush3.bf16.msra.mxu1 %v10324_v38 }
0x135f   :  { %10326 = vmatprep.subr.bf16.mxu1 %v10967_v0 }
0x1361   :  { %9643 = vmatmul.mubr.msk.f32.vlgmr.msra.gmra.mrb[30].mxu1 %vm825_vm7, %v5972_v10  ;;  %v12241_v10 = vld [vmem:[%s12706_s20 + $0x58] sm:$0xff] }
0x1362   :  { %10328 = vmatpush3.bf16.msra.mxu1 %v10327_v47  ;;  %9661 = vmatprep.mubr.msk.f32.mxu1 %vm12701_vm0, %v10969_v1  ;;  %vm4204_vm0 = vcmask 124928  }
0x1363   :  { %10329 = vmatprep.subr.bf16.mxu1 %v10967_v0 }
0x1366   :  { %10331 = vmatpush3.bf16.msra.mxu1 %v10330_v56  ;;  %v12252_v56 = vld [vmem:[%s12706_s20 + $0x40] sm:$0xff] }
0x1367   :  { %10332 = vmatprep.subr.bf16.mxu1 %v10967_v0 }
0x136a   :  { %10334 = vmatpush3.bf16.msra.mxu1 %v10333_v49 }
0x136b   :  { %10335 = vmatprep.subr.bf16.mxu1 %v10967_v0 }
0x136e   :  { %10337 = vmatpush3.bf16.msra.mxu1 %v10336_v60 }
0x1371   :  { %9662 = vmatmul.mubr.msk.f32.vlgmr.msra.gmra.mrb[30].mxu1 %vm825_vm7, %v6054_v61 }
0x13a0   :  { %v4176_v16 = vpop.f32.mrb[18].mxu1 }
0x13a1   :  { %4200 = vst.msk [vmem:[%s12692_s17] sm:$0xff] %vm229_vm1, %v4176_v16  ;;  %v9341_v2 = vpop.f32.mrb[19].mxu1 }
0x13a4   :  { %v4181_v3 = vpop.f32.mrb[20].mxu1 }
0x13a5   :  { %4201 = vst.msk [vmem:[%s12692_s17 + $0x8] sm:$0xff] %vm229_vm1, %v4181_v3  ;;  %v9344_v8 = vpop.f32.mrb[21].mxu1 }
0x13a8   :  { %v4186_v9 = vpop.f32.mrb[22].mxu1 }
0x13a9   :  { %4202 = vst.msk [vmem:[%s12692_s17 + $0x10] sm:$0xff] %vm229_vm1, %v4186_v9  ;;  %v9347_v62 = vpop.f32.mrb[23].mxu1 }
0x13ac   :  { %v4191_v7 = vpop.f32.mrb[24].mxu1 }
0x13ad   :  { %4203 = vst.msk [vmem:[%s12692_s17 + $0x18] sm:$0xff] %vm229_vm1, %v4191_v7  ;;  %v9350_v5 = vpop.f32.mrb[25].mxu1 }
0x13b0   :  { %v4196_v63 = vpop.f32.mrb[26].mxu1 }
0x13b1   :  { %4205 = vst.msk [vmem:[%s12692_s17 + $0x20] sm:$0x7] %vm4204_vm0, %v4196_v63  ;;  %v9353_v6 = vpop.f32.mrb[27].mxu1 }
0x13f4   :  { %v9526_v14 = vpop.f32.mrb[28].mxu1 }
0x13f5   :  { %v5257_v18 = vmax.f32 %v9526_v14, 0.0  ;;  %v5245_v19 = vpop.f32.mrb[29].mxu1 }
0x13f6   :  { %v5256_v44 = vmax.f32 %v5245_v19, 0.0 }
0x13f8   :  { %v10339_v4 = vpack.c.bf16 %v5257_v18, %v5256_v44 }
0x13fa   :  { %10341 = vmatpush3.bf16.xpose.msk.msra.mxu0 %vm11434_vm8, %v10339_v4 }
0x1444   :  { %v6123_v20 = vpop.f32.mrb[30].mxu1 }
0x1445   :  { %v6128_v17 = vmax.f32 %v6123_v20, 0.0  ;;  %v9663_v21 = vpop.f32.mrb[31].mxu1 }
0x1447   :  { %9669 = vmatmul.mubr.msk.f32.vlgmr.msra.gmra.mrb[40].mxu0 %vm825_vm7, %v6128_v17 }
0x1448   :  { %9681 = vmatprep.mubr.msk.f32.mxu0 %vm2754_vm10, %v10724_v22 }
0x151a   :  { %v6204_v23 = vpop.f32.mrb[40].mxu0 }
0x151b   :  { %v6205_v26 = vadd.f32 1e-15, %v6204_v23  ;;  %v9670_v50 = vpop.f32.mrb[41].mxu0 }
0x151d   :  { %v6208_v58 = vsel %vm2230_vm9, %v6205_v26, 0.0 }
0x151e   :  { %6209 = vadd.xlane.f32.xlu0 %v6208_v58 }
0x15ab   :  { %v6210_v28 = vpop.xlane.xlu0 %6209 }
0x15ac   :  { %10696 = vrcp.f32 %v6210_v28 }
0x15b6   :  { %v10697_v30 = vpop.eup %10696 }
0x15b7   :  { %v6212_v11 = vmul.f32 %v10697_v30, %v6205_v26 }
0x15b9   :  { %6392 = vrot.lane.b32.xlu0 %v6212_v11, %s10978_s22  ;;  %6222 = vrot.lane.b32.xlu1 %v6212_v11, %s10971_s3  ;;  %10609 = vpush %v6212_v11  ;;  %s12713_s3 = smov 117   ;;  %s12714_s22 = smov 115  }
0x15bd   :  { %6585 = vrot.lane.b32.xlu0 %v6212_v11, %s10983_s30  ;;  %6256 = vrot.lane.b32.xlu1 %v6212_v11, %s10970_s2  ;;  %s12715_s2 = smov 113  }
0x15c1   :  { %6653 = vrot.lane.b32.xlu0 %v6212_v11, %s10984_s26  ;;  %6290 = vrot.lane.b32.xlu1 %v6212_v11, %s10972_s27 }
0x15c5   :  { %6324 = vrot.lane.b32.xlu1 %v6212_v11, %s10974_s24 }
0x15c9   :  { %6358 = vrot.lane.b32.xlu1 %v6212_v11, %s10976_s8 }
0x15cd   :  { %6430 = vrot.lane.b32.xlu1 %v6212_v11, %s10980_s13 }
0x15d1   :  { %6468 = vrot.lane.b32.xlu1 %v6212_v11, %s10981_s1 }
0x15d5   :  { %6483 = vrot.lane.b32.xlu1 %v6212_v11, %s10973_s25 }
0x15d9   :  { %6517 = vrot.lane.b32.xlu1 %v6212_v11, %s10982_s29 }
0x15dd   :  { %6551 = vrot.lane.b32.xlu1 %v6212_v11, %s12713_s3 }
0x15e1   :  { %6619 = vrot.lane.b32.xlu1 %v6212_v11, %s12714_s22 }
0x15e5   :  { %6691 = vrot.lane.b32.xlu1 %v6212_v11, %s12715_s2 }
0x15ea   :  { %s10610_s27 = spop %10609 }
0x15eb   :  { %v6215_v46 = vstv %s10610_s27 }
0x15ec   :  { %v6217_v59 = vmul.f32 %v12246_v41, %v6215_v46  ;;  %v6218_v60 = vmul.f32 %v12252_v56, %v6215_v46  ;;  %v6219_v9 = vmul.f32 %v12258_v55, %v6215_v46  ;;  %v6220_v62 = vmul.f32 %v11997_v52, %v6215_v46 }
0x15ed   :  { %v6221_v19 = vmul.f32 %v12241_v10, %v6215_v46 }
0x162b   :  { %v6223_v29 = vpop.permute.xlu1 %6222  ;;  %v6393_v39 = vpop.permute.xlu0 %6392 }
0x162c   :  { %10611 = vpush %v6223_v29 }
0x162f   :  { %v6257_v31 = vpop.permute.xlu1 %6256  ;;  %v6586_v54 = vpop.permute.xlu0 %6585 }
0x1630   :  { %10613 = vpush %v6257_v31 }
0x1633   :  { %v6291_v32 = vpop.permute.xlu1 %6290  ;;  %v6654_v38 = vpop.permute.xlu0 %6653 }
0x1634   :  { %10615 = vpush %v6291_v32 }
0x1637   :  { %v6325_v42 = vpop.permute.xlu1 %6324 }
0x1638   :  { %10617 = vpush %v6325_v42 }
0x163b   :  { %v6359_v33 = vpop.permute.xlu1 %6358 }
0x163c   :  { %10619 = vpush %v6359_v33 }
0x163d   :  { %10621 = vpush %v6393_v39 }
0x163f   :  { %v6431_v34 = vpop.permute.xlu1 %6430 }
0x1640   :  { %10623 = vpush %v6431_v34 }
0x1643   :  { %v6469_v35 = vpop.permute.xlu1 %6468 }
0x1644   :  { %10625 = vpush %v6469_v35 }
0x1647   :  { %v6484_v36 = vpop.permute.xlu1 %6483 }
0x1648   :  { %10627 = vpush %v6484_v36 }
0x164b   :  { %v6518_v51 = vpop.permute.xlu1 %6517 }
0x164c   :  { %10629 = vpush %v6518_v51 }
0x164f   :  { %v6552_v37 = vpop.permute.xlu1 %6551 }
0x1650   :  { %10631 = vpush %v6552_v37 }
0x1651   :  { %10633 = vpush %v6586_v54 }
0x1653   :  { %v6620_v12 = vpop.permute.xlu1 %6619 }
0x1654   :  { %10635 = vpush %v6620_v12 }
0x1655   :  { %10637 = vpush %v6654_v38 }
0x1657   :  { %v6692_v40 = vpop.permute.xlu1 %6691 }
0x1658   :  { %10639 = vpush %v6692_v40 }
0x165d   :  { %s10612_s25 = spop %10611 }
0x165e   :  { %v6225_v47 = vstv %s10612_s25 }
0x165f   :  { %v6227_v15 = vmul.f32 %v12246_v41, %v6225_v47  ;;  %v6228_v13 = vmul.f32 %v12252_v56, %v6225_v47  ;;  %v6229_v49 = vmul.f32 %v12258_v55, %v6225_v47  ;;  %v6230_v57 = vmul.f32 %v11997_v52, %v6225_v47 }
0x1660   :  { %v6231_v61 = vmul.f32 %v12241_v10, %v6225_v47 }
0x1661   :  { %v6237_v16 = vrot.slane %v6227_v15, 1  ;;  %v6238_v2 = vrot.slane %v6228_v13, 1  ;;  %v6240_v3 = vrot.slane %v6229_v49, 1  ;;  %v6242_v8 = vrot.slane %v6230_v57, 1  ;;  %s10614_s6 = spop %10613 }
0x1662   :  { %v6244_v7 = vrot.slane %v6231_v61, 1  ;;  %v6259_v5 = vstv %s10614_s6 }
0x1663   :  { %v6239_v63 = vsel %vm223_vm2, %v6237_v16, %v6238_v2  ;;  %v6241_v6 = vsel %vm223_vm2, %v6238_v2, %v6240_v3  ;;  %v6243_v14 = vsel %vm223_vm2, %v6240_v3, %v6242_v8  ;;  %v6261_v18 = vmul.f32 %v12246_v41, %v6259_v5 }
0x1664   :  { %v6245_v44 = vsel %vm223_vm2, %v6242_v8, %v6244_v7  ;;  %v6251_v4 = vadd.f32 %v6239_v63, %v6217_v59  ;;  %v6252_v20 = vadd.f32 %v6241_v6, %v6218_v60  ;;  %v6253_v17 = vadd.f32 %v6243_v14, %v6219_v9  ;;  %v12296_v6 = vld [vmem:[%s12706_s20 + $0x50] sm:$0xff] }
0x1665   :  { %v6254_v21 = vadd.f32 %v6245_v44, %v6220_v62  ;;  %v6262_v22 = vmul.f32 %v12252_v56, %v6259_v5  ;;  %v6263_v23 = vmul.f32 %v12258_v55, %v6259_v5  ;;  %s10616_s9 = spop %10615  ;;  %v6264_v26 = vmul.f32 %v11997_v52, %v6259_v5 }
0x1666   :  { %v6265_v50 = vmul.f32 %v12241_v10, %v6259_v5  ;;  %v6271_v58 = vrot.slane %v6261_v18, 2  ;;  %v6293_v28 = vstv %s10616_s9  ;;  %v6255_v54 = vadd.f32 %v6244_v7, %v6221_v19 }
0x1667   :  { %v6272_v30 = vrot.slane %v6262_v22, 2  ;;  %v6274_v11 = vrot.slane %v6263_v23, 2  ;;  %v6295_v29 = vmul.f32 %v12246_v41, %v6293_v28  ;;  %v6296_v31 = vmul.f32 %v12252_v56, %v6293_v28 }
0x1668   :  { %v6276_v32 = vrot.slane %v6264_v26, 2  ;;  %v6278_v42 = vrot.slane %v6265_v50, 2  ;;  %v6297_v33 = vmul.f32 %v12258_v55, %v6293_v28  ;;  %v6298_v39 = vmul.f32 %v11997_v52, %v6293_v28 }
0x1669   :  { %v6273_v34 = vsel %vm405_vm3, %v6271_v58, %v6272_v30  ;;  %v6275_v35 = vsel %vm405_vm3, %v6272_v30, %v6274_v11  ;;  %v6299_v36 = vmul.f32 %v12241_v10, %v6293_v28  ;;  %v6305_v51 = vrot.slane %v6295_v29, 3  ;;  %s10618_s19 = spop %10617 }
0x166a   :  { %v6277_v37 = vsel %vm405_vm3, %v6274_v11, %v6276_v32  ;;  %v6279_v12 = vsel %vm405_vm3, %v6276_v32, %v6278_v42  ;;  %v6285_v38 = vadd.f32 %v6273_v34, %v6251_v4  ;;  %v6286_v40 = vadd.f32 %v6275_v35, %v6252_v20 }
0x166b   :  { %v6287_v46 = vadd.f32 %v6277_v37, %v6253_v17  ;;  %v6288_v47 = vadd.f32 %v6279_v12, %v6254_v21  ;;  %v6306_v15 = vrot.slane %v6296_v31, 3  ;;  %v6308_v13 = vrot.slane %v6297_v33, 3 }
0x166c   :  { %v6310_v52 = vrot.slane %v6298_v39, 3  ;;  %v6312_v49 = vrot.slane %v6299_v36, 3  ;;  %v6327_v57 = vstv %s10618_s19  ;;  %v6289_v2 = vadd.f32 %v6278_v42, %v6255_v54 }
0x166d   :  { %v6307_v59 = vsel %vm503_vm4, %v6305_v51, %v6306_v15  ;;  %v6329_v60 = vmul.f32 %v12246_v41, %v6327_v57  ;;  %v6330_v61 = vmul.f32 %v12252_v56, %v6327_v57  ;;  %v6331_v16 = vmul.f32 %v12258_v55, %v6327_v57  ;;  %s10620_s28 = spop %10619 }
0x166e   :  { %v6309_v3 = vsel %vm503_vm4, %v6306_v15, %v6308_v13  ;;  %v6311_v8 = vsel %vm503_vm4, %v6308_v13, %v6310_v52  ;;  %v6313_v9 = vsel %vm503_vm4, %v6310_v52, %v6312_v49  ;;  %s10622_s21 = spop %10621  ;;  %v6319_v62 = vadd.f32 %v6307_v59, %v6285_v38 }
0x166f   :  { %v6320_v7 = vadd.f32 %v6309_v3, %v6286_v40  ;;  %v6321_v5 = vadd.f32 %v6311_v8, %v6287_v46  ;;  %v6322_v63 = vadd.f32 %v6313_v9, %v6288_v47  ;;  %v6332_v14 = vmul.f32 %v12296_v6, %v6327_v57  ;;  %v12321_v3 = vld [vmem:[%s12706_s20 + $0x60] sm:$0xff] }
0x1670   :  { %v6333_v18 = vmul.f32 %v12241_v10, %v6327_v57  ;;  %v6339_v19 = vrot.slane %v6329_v60, 4  ;;  %v6340_v44 = vrot.slane %v6330_v61, 4  ;;  %v6323_v4 = vadd.f32 %v6312_v49, %v6289_v2 }
0x1671   :  { %v6342_v20 = vrot.slane %v6331_v16, 4  ;;  %v6361_v17 = vstv %s10620_s28  ;;  %v6395_v21 = vstv %s10622_s21  ;;  %v6344_v23 = vrot.slane %v6332_v14, 4  ;;  %s10624_s23 = spop %10623 }
0x1672   :  { %v6341_v22 = vsel %vm601_vm5, %v6339_v19, %v6340_v44  ;;  %v6346_v26 = vrot.slane %v6333_v18, 4  ;;  %v6363_v50 = vmul.f32 %v12246_v41, %v6361_v17  ;;  %v6364_v30 = vmul.f32 %v12252_v56, %v6361_v17 }
0x1673   :  { %v6343_v58 = vsel %vm601_vm5, %v6340_v44, %v6342_v20  ;;  %v6353_v28 = vadd.f32 %v6341_v22, %v6319_v62  ;;  %v6365_v11 = vmul.f32 %v12258_v55, %v6361_v17  ;;  %v6345_v29 = vsel %vm601_vm5, %v6342_v20, %v6344_v23 }
0x1674   :  { %v6347_v31 = vsel %vm601_vm5, %v6344_v23, %v6346_v26  ;;  %v6354_v32 = vadd.f32 %v6343_v58, %v6320_v7  ;;  %v6357_v42 = vadd.f32 %v6346_v26, %v6323_v4  ;;  %v6355_v33 = vadd.f32 %v6345_v29, %v6321_v5 }
0x1675   :  { %v6356_v39 = vadd.f32 %v6347_v31, %v6322_v63  ;;  %v6366_v34 = vmul.f32 %v12296_v6, %v6361_v17  ;;  %v6367_v35 = vmul.f32 %v12241_v10, %v6361_v17  ;;  %v6373_v36 = vrot.slane %v6363_v50, 5  ;;  %s10626_s4 = spop %10625 }
0x1676   :  { %v6374_v51 = vrot.slane %v6364_v30, 5  ;;  %v6376_v54 = vrot.slane %v6365_v11, 5  ;;  %v6397_v37 = vmul.f32 %v12246_v41, %v6395_v21  ;;  %v6398_v40 = vmul.f32 %v12252_v56, %v6395_v21 }
0x1677   :  { %v6378_v12 = vrot.slane %v6366_v34, 5  ;;  %v6380_v38 = vrot.slane %v6367_v35, 5  ;;  %v6399_v46 = vmul.f32 %v12258_v55, %v6395_v21  ;;  %v6400_v13 = vmul.f32 %v12296_v6, %v6395_v21 }
0x1678   :  { %v6375_v47 = vsel %vm700_vm6, %v6373_v36, %v6374_v51  ;;  %v6377_v15 = vsel %vm700_vm6, %v6374_v51, %v6376_v54  ;;  %v6401_v52 = vmul.f32 %v12241_v10, %v6395_v21  ;;  %v6402_v8 = vmul.f32 %v12321_v3, %v6395_v21 }
0x1679   :  { %v6379_v49 = vsel %vm700_vm6, %v6376_v54, %v6378_v12  ;;  %v6381_v57 = vsel %vm700_vm6, %v6378_v12, %v6380_v38  ;;  %v6387_v59 = vadd.f32 %v6375_v47, %v6353_v28  ;;  %v6388_v60 = vadd.f32 %v6377_v15, %v6354_v32  ;;  %s10628_s22 = spop %10627 }
0x167a   :  { %v6389_v61 = vadd.f32 %v6379_v49, %v6355_v33  ;;  %v6390_v16 = vadd.f32 %v6381_v57, %v6356_v39  ;;  %v6391_v2 = vadd.f32 %v6380_v38, %v6357_v42  ;;  %v6409_v9 = vrot.slane %v6397_v37, 6 }
0x167b   :  { %v6410_v62 = vrot.slane %v6398_v40, 6  ;;  %v6412_v7 = vrot.slane %v6399_v46, 6  ;;  %v6414_v5 = vrot.slane %v6400_v13, 6  ;;  %v6416_v63 = vrot.slane %v6401_v52, 6 }
0x167c   :  { %v6418_v14 = vrot.slane %v6402_v8, 6  ;;  %v6433_v18 = vstv %s10624_s23  ;;  %v6471_v19 = vstv %s10626_s4 }
0x167d   :  { %v6435_v44 = vmul.f32 %v12246_v41, %v6433_v18  ;;  %v6436_v4 = vmul.f32 %v12252_v56, %v6433_v18  ;;  %v6437_v20 = vmul.f32 %v12258_v55, %v6433_v18  ;;  %v6438_v17 = vmul.f32 %v12296_v6, %v6433_v18  ;;  %s10630_s2 = spop %10629 }
0x167e   :  { %v6439_v22 = vmul.f32 %v12241_v10, %v6433_v18  ;;  %v6440_v21 = vmul.f32 %v12321_v3, %v6433_v18  ;;  %v6411_v23 = vsel %vm2432_vm11, %v6409_v9, %v6410_v62  ;;  %v6413_v26 = vsel %vm2432_vm11, %v6410_v62, %v6412_v7 }
0x167f   :  { %v6447_v50 = vrot.slane %v6435_v44, 7  ;;  %v6448_v58 = vrot.slane %v6436_v4, 7  ;;  %v6450_v28 = vrot.slane %v6437_v20, 7  ;;  %v6452_v30 = vrot.slane %v6438_v17, 7 }
0x1680   :  { %v6454_v11 = vrot.slane %v6439_v22, 7  ;;  %v6456_v41 = vrot.slane %v6440_v21, 7  ;;  %v6415_v29 = vsel %vm2432_vm11, %v6412_v7, %v6414_v5  ;;  %v6417_v31 = vsel %vm2432_vm11, %v6414_v5, %v6416_v63 }
0x1681   :  { %v6419_v32 = vsel %vm2432_vm11, %v6416_v63, %v6418_v14  ;;  %v6425_v42 = vadd.f32 %v6411_v23, %v6387_v59  ;;  %v6426_v33 = vadd.f32 %v6413_v26, %v6388_v60  ;;  %v6427_v39 = vadd.f32 %v6415_v29, %v6389_v61  ;;  %s10632_s27 = spop %10631 }
0x1682   :  { %v6428_v34 = vadd.f32 %v6417_v31, %v6390_v16  ;;  %v6429_v35 = vadd.f32 %v6419_v32, %v6391_v2  ;;  %v6449_v36 = vsel %vm2471_vm12, %v6447_v50, %v6448_v58  ;;  %v6451_v51 = vsel %vm2471_vm12, %v6448_v58, %v6450_v28  ;;  %s10634_s25 = spop %10633 }
0x1683   :  { %v6453_v54 = vsel %vm2471_vm12, %v6450_v28, %v6452_v30  ;;  %v6455_v37 = vsel %vm2471_vm12, %v6452_v30, %v6454_v11  ;;  %v6457_v12 = vsel %vm2471_vm12, %v6454_v11, %v6456_v41  ;;  %v6463_v38 = vadd.f32 %v6449_v36, %v6425_v42 }
0x1684   :  { %v6464_v40 = vadd.f32 %v6451_v51, %v6426_v33  ;;  %v6465_v46 = vadd.f32 %v6453_v54, %v6427_v39  ;;  %v6466_v47 = vadd.f32 %v6455_v37, %v6428_v34  ;;  %v6473_v15 = vmul.f32 %v12252_v56, %v6471_v19 }
0x1685   :  { %v6474_v13 = vmul.f32 %v12258_v55, %v6471_v19  ;;  %v6475_v52 = vmul.f32 %v12296_v6, %v6471_v19  ;;  %v6476_v49 = vmul.f32 %v12241_v10, %v6471_v19  ;;  %v6467_v57 = vadd.f32 %v6457_v12, %v6429_v35  ;;  %s10636_s24 = spop %10635 }
0x1686   :  { %v6477_v59 = vmul.f32 %v12321_v3, %v6471_v19  ;;  %v6486_v60 = vstv %s10628_s22  ;;  %v6520_v61 = vstv %s10630_s2  ;;  %v6478_v16 = vadd.f32 %v6473_v15, %v6463_v38  ;;  %s10638_s8 = spop %10637 }
0x1687   :  { %v6479_v2 = vadd.f32 %v6474_v13, %v6464_v40  ;;  %v6480_v8 = vadd.f32 %v6475_v52, %v6465_v46  ;;  %v6554_v9 = vstv %s10632_s27  ;;  %v6481_v62 = vadd.f32 %v6476_v49, %v6466_v47 }
0x1688   :  { %v6488_v7 = vmul.f32 %v12252_v56, %v6486_v60  ;;  %v6489_v5 = vmul.f32 %v12258_v55, %v6486_v60  ;;  %v6490_v63 = vmul.f32 %v12296_v6, %v6486_v60  ;;  %v6491_v14 = vmul.f32 %v12241_v10, %v6486_v60 }
0x1689   :  { %v6492_v18 = vmul.f32 %v12321_v3, %v6486_v60  ;;  %v6522_v44 = vmul.f32 %v12252_v56, %v6520_v61  ;;  %v6523_v19 = vmul.f32 %v12258_v55, %v6520_v61  ;;  %v6524_v22 = vmul.f32 %v12296_v6, %v6520_v61  ;;  %s10640_s13 = spop %10639 }
0x168a   :  { %v6498_v4 = vrot.slane %v6488_v7, 1  ;;  %v6499_v20 = vrot.slane %v6489_v5, 1  ;;  %v6501_v17 = vrot.slane %v6490_v63, 1  ;;  %v6503_v21 = vrot.slane %v6491_v14, 1 }
0x168b   :  { %v6505_v23 = vrot.slane %v6492_v18, 1  ;;  %v6525_v26 = vmul.f32 %v12241_v10, %v6520_v61  ;;  %v6526_v50 = vmul.f32 %v12321_v3, %v6520_v61  ;;  %v6532_v30 = vrot.slane %v6522_v44, 2 }
0x168c   :  { %v6500_v58 = vsel %vm223_vm2, %v6498_v4, %v6499_v20  ;;  %v6502_v28 = vsel %vm223_vm2, %v6499_v20, %v6501_v17  ;;  %v6533_v11 = vrot.slane %v6523_v19, 2  ;;  %v6482_v41 = vadd.f32 %v6477_v59, %v6467_v57 }
0x168d   :  { %v6504_v29 = vsel %vm223_vm2, %v6501_v17, %v6503_v21  ;;  %v6506_v31 = vsel %vm223_vm2, %v6503_v21, %v6505_v23  ;;  %v6512_v32 = vadd.f32 %v6500_v58, %v6478_v16  ;;  %v6513_v42 = vadd.f32 %v6502_v28, %v6479_v2 }
0x168e   :  { %v6514_v33 = vadd.f32 %v6504_v29, %v6480_v8  ;;  %v6515_v39 = vadd.f32 %v6506_v31, %v6481_v62  ;;  %v6534_v34 = vsel %vm405_vm3, %v6532_v30, %v6533_v11  ;;  %v6516_v35 = vadd.f32 %v6505_v23, %v6482_v41 }
0x168f   :  { %v6535_v36 = vrot.slane %v6524_v22, 2  ;;  %v6537_v51 = vrot.slane %v6525_v26, 2  ;;  %v6539_v54 = vrot.slane %v6526_v50, 2  ;;  %v6556_v37 = vmul.f32 %v12252_v56, %v6554_v9 }
0x1690   :  { %v6557_v12 = vmul.f32 %v12258_v55, %v6554_v9  ;;  %v6558_v38 = vmul.f32 %v12296_v6, %v6554_v9  ;;  %v6559_v40 = vmul.f32 %v12241_v10, %v6554_v9  ;;  %v6546_v13 = vadd.f32 %v6534_v34, %v6512_v32 }
0x1691   :  { %v6536_v46 = vsel %vm405_vm3, %v6533_v11, %v6535_v36  ;;  %v6538_v47 = vsel %vm405_vm3, %v6535_v36, %v6537_v51  ;;  %v6540_v15 = vsel %vm405_vm3, %v6537_v51, %v6539_v54  ;;  %v6550_v57 = vadd.f32 %v6539_v54, %v6516_v35 }
0x1692   :  { %v6547_v52 = vadd.f32 %v6536_v46, %v6513_v42  ;;  %v6548_v49 = vadd.f32 %v6538_v47, %v6514_v33  ;;  %v6560_v59 = vmul.f32 %v12321_v3, %v6554_v9  ;;  %v6566_v60 = vrot.slane %v6556_v37, 3 }
0x1693   :  { %v6567_v61 = vrot.slane %v6557_v12, 3  ;;  %v6569_v16 = vrot.slane %v6558_v38, 3  ;;  %v6571_v2 = vrot.slane %v6559_v40, 3  ;;  %v6549_v8 = vadd.f32 %v6540_v15, %v6515_v39 }
0x1694   :  { %v6573_v62 = vrot.slane %v6560_v59, 3  ;;  %v6588_v7 = vstv %s10634_s25  ;;  %v6622_v5 = vstv %s10636_s24  ;;  %v6656_v20 = vstv %s10638_s8 }
0x1695   :  { %v6568_v63 = vsel %vm503_vm4, %v6566_v60, %v6567_v61  ;;  %v6570_v14 = vsel %vm503_vm4, %v6567_v61, %v6569_v16  ;;  %v6572_v18 = vsel %vm503_vm4, %v6569_v16, %v6571_v2  ;;  %v6590_v44 = vmul.f32 %v12252_v56, %v6588_v7 }
0x1696   :  { %v6574_v19 = vsel %vm503_vm4, %v6571_v2, %v6573_v62  ;;  %v6580_v9 = vadd.f32 %v6568_v63, %v6546_v13  ;;  %v6581_v4 = vadd.f32 %v6570_v14, %v6547_v52  ;;  %v12373_v17 = vadd.f32 %v6572_v18, %v6548_v49  ;;  %v10730_v49 = vld [vmem:[%s12706_s20 + $0x68] sm:$0x3]  ;;  %s12716_s20 = smov 10  }
0x1697   :  { %v6584_v22 = vadd.f32 %v6573_v62, %v6550_v57  ;;  %v6591_v21 = vmul.f32 %v12258_v55, %v6588_v7  ;;  %v6592_v23 = vmul.f32 %v12296_v6, %v6588_v7  ;;  %v6593_v26 = vmul.f32 %v12241_v10, %v6588_v7 }
0x1698   :  { %v6594_v50 = vmul.f32 %v12321_v3, %v6588_v7  ;;  %v6600_v58 = vrot.slane %v6590_v44, 4  ;;  %v6624_v28 = vmul.f32 %v12252_v56, %v6622_v5  ;;  %v6625_v41 = vmul.f32 %v12258_v55, %v6622_v5 }
0x1699   :  { %v6601_v30 = vrot.slane %v6591_v21, 4  ;;  %v6603_v11 = vrot.slane %v6592_v23, 4  ;;  %v6626_v29 = vmul.f32 %v12296_v6, %v6622_v5  ;;  %v6583_v31 = vadd.f32 %v6574_v19, %v6549_v8 }
0x169a   :  { %v6605_v32 = vrot.slane %v6593_v26, 4  ;;  %v6607_v42 = vrot.slane %v6594_v50, 4  ;;  %v6628_v33 = vmul.f32 %v12321_v3, %v6622_v5  ;;  %v6627_v35 = vmul.f32 %v12241_v10, %v6622_v5 }
0x169b   :  { %v6602_v39 = vsel %vm601_vm5, %v6600_v58, %v6601_v30  ;;  %v6604_v34 = vsel %vm601_vm5, %v6601_v30, %v6603_v11  ;;  %v6634_v36 = vrot.slane %v6624_v28, 5  ;;  %v6635_v12 = vrot.slane %v6625_v41, 5 }
0x169c   :  { %v6606_v51 = vsel %vm601_vm5, %v6603_v11, %v6605_v32  ;;  %v6608_v54 = vsel %vm601_vm5, %v6605_v32, %v6607_v42  ;;  %v6618_v37 = vadd.f32 %v6607_v42, %v6584_v22  ;;  %v6637_v38 = vrot.slane %v6626_v29, 5 }
0x169d   :  { %v6641_v40 = vrot.slane %v6628_v33, 5  ;;  %v6658_v46 = vmul.f32 %v12252_v56, %v6656_v20  ;;  %v6659_v47 = vmul.f32 %v12258_v55, %v6656_v20  ;;  %v6660_v15 = vmul.f32 %v12296_v6, %v6656_v20 }
0x169e   :  { %v6661_v13 = vmul.f32 %v12241_v10, %v6656_v20  ;;  %v6662_v52 = vmul.f32 %v12321_v3, %v6656_v20  ;;  %v6663_v57 = vmul.f32 %v10730_v49, %v6656_v20  ;;  %v6639_v59 = vrot.slane %v6627_v35, 5 }
0x169f   :  { %v6652_v60 = vadd.f32 %v6641_v40, %v6618_v37  ;;  %v6670_v61 = vrot.slane %v6658_v46, 6  ;;  %v6694_v16 = vstv %s10640_s13  ;;  %v6671_v2 = vrot.slane %v6659_v47, 6 }
0x16a0   :  { %v6673_v8 = vrot.slane %v6660_v15, 6  ;;  %v6675_v62 = vrot.slane %v6661_v13, 6  ;;  %v6677_v7 = vrot.slane %v6662_v52, 6  ;;  %v6696_v5 = vmul.f32 %v12252_v56, %v6694_v16 }
0x16a1   :  { %v6697_v63 = vmul.f32 %v12258_v55, %v6694_v16  ;;  %v6698_v14 = vmul.f32 %v12296_v6, %v6694_v16  ;;  %v6699_v18 = vmul.f32 %v12241_v10, %v6694_v16  ;;  %v6679_v44 = vrot.slane %v6663_v57, 6 }
0x16a2   :  { %v6700_v19 = vmul.f32 %v12321_v3, %v6694_v16  ;;  %v6614_v20 = vadd.f32 %v6602_v39, %v6580_v9  ;;  %v6615_v22 = vadd.f32 %v6604_v34, %v6581_v4  ;;  %v6701_v21 = vmul.f32 %v10730_v49, %v6694_v16 }
0x16a3   :  { %v6708_v23 = vrot.slane %v6696_v5, 7  ;;  %v6709_v26 = vrot.slane %v6697_v63, 7  ;;  %v6711_v50 = vrot.slane %v6698_v14, 7  ;;  %v6713_v58 = vrot.slane %v6699_v18, 7 }
0x16a4   :  { %v6715_v28 = vrot.slane %v6700_v19, 7  ;;  %v6636_v30 = vsel %vm700_vm6, %v6634_v36, %v6635_v12  ;;  %v6638_v56 = vsel %vm700_vm6, %v6635_v12, %v6637_v38  ;;  %v6672_v6 = vsel %vm2432_vm11, %v6670_v61, %v6671_v2 }
0x16a5   :  { %v6648_v55 = vadd.f32 %v6636_v30, %v6614_v20  ;;  %v6649_v11 = vadd.f32 %v6638_v56, %v6615_v22  ;;  %v6674_v10 = vsel %vm2432_vm11, %v6671_v2, %v6673_v8  ;;  %v6710_v41 = vsel %vm2471_vm12, %v6708_v23, %v6709_v26  ;;  %v10731_v2 = vld [vmem:[#allocation9 + $0x8] sm:$0x3]  ;;  %v10735_v22 = vld [vmem:[#allocation13] sm:$0xff]  ;;  %v7121_v56 = vld [vmem:[%s12686_s11 + $0x10] sm:$0xff] }
0x16a6   :  { %v6712_v9 = vsel %vm2471_vm12, %v6709_v26, %v6711_v50  ;;  %v6616_v4 = vadd.f32 %v6606_v51, %v12373_v17  ;;  %v6617_v29 = vadd.f32 %v6608_v54, %v6583_v31  ;;  %v6640_v33 = vsel %vm700_vm6, %v6637_v38, %v6639_v59 }
0x16a7   :  { %v6686_v32 = vadd.f32 %v6672_v6, %v6648_v55  ;;  %v6687_v42 = vadd.f32 %v6674_v10, %v6649_v11  ;;  %v6642_v39 = vsel %vm700_vm6, %v6639_v59, %v6641_v40  ;;  %v6676_v36 = vsel %vm2432_vm11, %v6673_v8, %v6675_v62  ;;  %v10733_v8 = vld [vmem:[#allocation10 + $0x8] sm:$0x3]  ;;  %v7123_v6 = vld [vmem:[%s12686_s11 + $0x20] sm:$0xff]  ;;  %v7124_v10 = vld [vmem:[%s12686_s11 + $0x28] sm:$0xff] }
0x16a8   :  { %v6650_v34 = vadd.f32 %v6640_v33, %v6616_v4  ;;  %v6651_v35 = vadd.f32 %v6642_v39, %v6617_v29  ;;  %v6678_v37 = vsel %vm2432_vm11, %v6675_v62, %v6677_v7  ;;  %v6714_v47 = vsel %vm2471_vm12, %v6711_v50, %v6713_v58  ;;  %v10736_v50 = vld [vmem:[#allocation13 + $0x8] sm:$0xff]  ;;  %v7122_v55 = vld [vmem:[%s12686_s11 + $0x18] sm:$0xff] }
0x16a9   :  { %v6724_v12 = vadd.f32 %v6710_v41, %v6686_v32  ;;  %v6725_v46 = vadd.f32 %v6712_v9, %v6687_v42  ;;  %v6716_v15 = vsel %vm2471_vm12, %v6713_v58, %v6715_v28  ;;  %v6717_v17 = vrot.slane %v6701_v21, 7  ;;  %v7119_v58 = vld [vmem:[%s12686_s11] sm:$0xff]  ;;  %v7125_v9 = vld [vmem:[%s12686_s11 + $0x30] sm:$0xff]  ;;  %v7126_v4 = vld [vmem:[%s12686_s11 + $0x38] sm:$0xff] }
0x16aa   :  { %v6688_v31 = vadd.f32 %v6676_v36, %v6650_v34  ;;  %v6689_v51 = vadd.f32 %v6678_v37, %v6651_v35  ;;  %v6680_v54 = vsel %vm2432_vm11, %v6677_v7, %v6679_v44  ;;  %v10350_v16 = vpack.c.bf16 %v10730_v49, %v12321_v3  ;;  %v10734_v3 = vld [vmem:[#allocation12 + $0x10] sm:$0xf]  ;;  %v10737_v42 = vld [vmem:[%s12685_s10] ss:$0 sm:$0xff] }
0x16ab   :  { %v10342_v38 = vpack.c.bf16 %v6725_v46, %v6724_v12  ;;  %v6690_v52 = vadd.f32 %v6680_v54, %v6652_v60  ;;  %v6718_v59 = vsel %vm2471_vm12, %v6715_v28, %v6717_v17  ;;  %v10732_v60 = vld [vmem:[#allocation10] sm:$0xff]  ;;  %vm12717_vm2 = vcmask 162816   ;;  %v7120_v28 = vld [vmem:[%s12686_s11 + $0x8] sm:$0xff]  ;;  %v7127_v46 = vld [vmem:[%s12687_s12] sm:$0xff] }
0x16ac   :  { %v6726_v13 = vadd.f32 %v6714_v47, %v6688_v31  ;;  %v6727_v40 = vadd.f32 %v6716_v15, %v6689_v51  ;;  %vm12718_vm3 = vmmov %vm12717_vm2  ;;  %v10364_v30 = vpack.c.bf16 %v7120_v28, %v7119_v58  ;;  %v10368_v11 = vpack.c.bf16 %v7122_v55, %v7121_v56  ;;  %v7128_v31 = vld [vmem:[%s12687_s12 + $0x8] sm:$0xff]  ;;  %v8305_v51 = vld [vmem:[%s12686_s11 + $0x40] sm:$0xff] }
0x16ad   :  { %10343 = vmatprep.subr.bf16.mxu0 %v10342_v38  ;;  %v6728_v61 = vadd.f32 %v6718_v59, %v6690_v52  ;;  %v10372_v41 = vpack.c.bf16 %v7124_v10, %v7123_v6  ;;  %v10376_v29 = vpack.c.bf16 %v7126_v4, %v7125_v9  ;;  %v8306_v54 = vld [vmem:[%s12686_s11 + $0x48] sm:$0xff]  ;;  %v8323_v28 = vld [vmem:[%s12686_s11 + $0x98] sm:$0xff]  ;;  %v8324_v56 = vld [vmem:[%s12686_s11 + $0xa0] sm:$0xff]  ;;  %vm12719_vm4 = vmmov 0  }
0x16ae   :  { %10345 = vmatpush3.bf16.msra.mxu0 %v10342_v38  ;;  %v10346_v57 = vpack.c.bf16 %v6727_v40, %v6726_v13  ;;  %v10384_v38 = vpack.c.bf16 %v8306_v54, %v8305_v51  ;;  %v8307_v13 = vld [vmem:[%s12686_s11 + $0x50] sm:$0xff]  ;;  %v8308_v40 = vld [vmem:[%s12686_s11 + $0x58] sm:$0xff]  ;;  %v8310_v59 = vld [vmem:[%s12686_s11 + $0x68] sm:$0xff] }
0x16af   :  { %v10388_v52 = vpack.c.bf16 %v8308_v40, %v8307_v13  ;;  %v8325_v55 = vld [vmem:[%s12686_s11 + $0xa8] sm:$0xff]  ;;  %v8326_v6 = vld [vmem:[%s12686_s11 + $0xb0] sm:$0xff]  ;;  %v8327_v10 = vld [vmem:[%s12686_s11 + $0xb8] sm:$0xff] }
0x16b0   :  { %10347 = vmatprep.subr.bf16.mxu0 %v10346_v57  ;;  %v8317_v9 = vld [vmem:[#allocation15 + $0x1] ss:$0 sm:$0xff]  ;;  %v8338_v13 = vld [vmem:[%s12686_s11 + $0xd8] sm:$0xff] }
0x16b1   :  { %v8336_v51 = vld [vmem:[%s12686_s11 + $0xc8] sm:$0xff] }
0x16b2   :  { %10349 = vmatpush3.bf16.msra.mxu0 %v10346_v57  ;;  %v8309_v57 = vld [vmem:[%s12686_s11 + $0x60] sm:$0xff] }
0x16b3   :  { %9679 = vmatprep.subr.msk.mxu0 %vm700_vm6, %v6728_v61 }
0x16b6   :  { %9680 = vmatpush3.msk.msra.mxu0 %vm700_vm6, %v6728_v61  ;;  %v10392_v61 = vpack.c.bf16 %v8310_v59, %v8309_v57  ;;  %v8340_v57 = vld [vmem:[%s12686_s11 + $0xe8] sm:$0xff] }
0x16b7   :  { %9682 = vmatmul.mubr.msk.f32.vlgmr.msra.gmra.mrb[42].mxu0 %vm2754_vm10, %v10731_v2  ;;  %10352 = vmatprep.subr.msk.bf16.mxu0 %vm11674_vm14, %v10350_v16  ;;  %v8312_v2 = vld [vmem:[%s12686_s11 + $0x78] sm:$0xff] }
0x16b8   :  { %10355 = vmatpush3.bf16.msk.msra.mxu0 %vm11674_vm14, %v10350_v16  ;;  %9688 = vmatprep.mubr.msk.f32.mxu0 %vm2871_vm15, %v10732_v60  ;;  %v8311_v16 = vld [vmem:[%s12686_s11 + $0x70] sm:$0xff] }
0x16b9   :  { %10357 = vmatprep.subr.bf16.mxu0 %v11686_v27  ;;  %v10396_v60 = vpack.c.bf16 %v8312_v2, %v8311_v16  ;;  %v8342_v16 = vld [vmem:[%s12686_s11 + $0xf8] sm:$0xff] }
0x16bb   :  { %9689 = vmatmul.mubr.msk.f32.vlgmr.msra.gmra.mrb[44].mxu0 %vm2871_vm15, %v10733_v8  ;;  %v8302_v8 = vld [vmem:[#allocation15] ss:$0 sm:$0xff] }
0x16bc   :  { %10359 = vmatpush3.bf16.msra.mxu0 %v11686_v27 }
0x16bd   :  { %9695 = vmatprep.subr.msk.mxu0 %vm601_vm5, %v10734_v3 }
0x16c0   :  { %9696 = vmatpush3.msk.msra.mxu0 %vm601_vm5, %v10734_v3 }
0x178a   :  { %v9683_v49 = vpop.f32.mrb[42].mxu0 }
0x178b   :  { %v6798_v62 = vpop.f32.mrb[43].mxu0 }
0x178c   :  { %6807 = vxpose.xlu0.b32.start [1/2] (short) (narrow) %v6798_v62, 16 }
0x178e   :  { %v9690_v25 = vpop.f32.mrb[44].mxu0 }
0x178f   :  { %v6908_v7 = vpop.f32.mrb[45].mxu0 }
0x1790   :  { %6808 = vxpose.xlu0.b32.end [2/2] (short) (narrow) %v9683_v49, 16 }
0x180c   :  { %v6823_v5 = vpop.trf.xlu0 }
0x180d   :  { %6951 = vrot.lane.b32.xlu1 %v6823_v5, %s12716_s20 }
0x1810   :  { %v6824_v63 = vpop.trf.xlu0 }
0x1811   :  { %6953 = vrot.lane.b32.xlu1 %v6824_v63, %s12716_s20 }
0x183a   :  { %6917 = vxpose.xlu1.b32.start [1/2] (short) (narrow) %v6908_v7, 16 }
0x183e   :  { %6918 = vxpose.xlu1.b32.end [2/2] (short) (narrow) %v9690_v25, 16 }
0x187f   :  { %v6952_v27 = vpop.permute.xlu1 %6951 }
0x1883   :  { %v6954_v14 = vpop.permute.xlu1 %6953 }
0x18ba   :  { %v6933_v18 = vpop.trf.xlu1 }
0x18bb   :  { %v12433_v44 = vsel %vm2871_vm15, %v6933_v18, %v6952_v27 }
0x18bc   :  { %9697 = vmatprep.mubr.msk.f32.mxu0 %vm12717_vm2, %v12433_v44 }
0x18be   :  { %v6934_v19 = vpop.trf.xlu1 }
0x18bf   :  { %v12438_v20 = vsel %vm2871_vm15, %v6934_v19, %v6954_v14  ;;  %v8313_v14 = vld [vmem:[%s12687_s12 + $0x10] sm:$0xff] }
0x18c0   :  { %9698 = vmatmul.mubr.msk.f32.vlgmr.msra.gmra.mrb[46].mxu0 %vm12718_vm3, %v12438_v20  ;;  %9756 = vmatprep.mubr.msk.f32.mxu1 %vm229_vm1, %v8313_v14  ;;  %v8343_v14 = vld [vmem:[%s12687_s12 + $0x30] sm:$0xff] }
0x18c1   :  { %9704 = vmatprep.mubr.msk.f32.mxu0 %vm229_vm1, %v10735_v22 }
0x1993   :  { %v9699_v21 = vpop.f32.mrb[46].mxu0 }
0x1994   :  { %v7031_v23 = vpop.f32.mrb[47].mxu0 }
0x1995   :  { %v10360_v26 = vpack.c.bf16 %v9699_v21, %v7031_v23  ;;  %v8314_v21 = vld [vmem:[%s12687_s12 + $0x18] sm:$0xff]  ;;  %v8320_v23 = vld [vmem:[%s12686_s11 + $0x80] sm:$0xff] }
0x1997   :  { %10361 = vmatprep.subr.bf16.mxu0 %v10360_v26 }
0x1998   :  { %10363 = vmatpush3.bf16.msra.mxu0 %v10360_v26  ;;  %v8321_v26 = vld [vmem:[%s12686_s11 + $0x88] sm:$0xff] }
0x1999   :  { %10365 = vmatprep.subr.bf16.mxu0 %v10364_v30  ;;  %v10404_v58 = vpack.c.bf16 %v8321_v26, %v8320_v23  ;;  %v8347_v23 = vld [vmem:[#allocation15 + $0x3] ss:$0 sm:$0xff] }
0x199b   :  { %9705 = vmatmul.mubr.msk.f32.vlgmr.msra.gmra.mrb[48].mxu0 %vm229_vm1, %v10736_v50  ;;  %v8322_v50 = vld [vmem:[%s12686_s11 + $0x90] sm:$0xff] }
0x199c   :  { %10367 = vmatpush3.bf16.msra.mxu0 %v10364_v30  ;;  %v10408_v30 = vpack.c.bf16 %v8323_v28, %v8322_v50 }
0x199d   :  { %10369 = vmatprep.subr.bf16.mxu0 %v10368_v11 }
0x19a0   :  { %10371 = vmatpush3.bf16.msra.mxu0 %v10368_v11  ;;  %v10412_v11 = vpack.c.bf16 %v8325_v55, %v8324_v56 }
0x19a1   :  { %10373 = vmatprep.subr.bf16.mxu0 %v10372_v41 }
0x19a4   :  { %10375 = vmatpush3.bf16.msra.mxu0 %v10372_v41  ;;  %v10416_v41 = vpack.c.bf16 %v8327_v10, %v8326_v6  ;;  %v10739_v10 = vld [vmem:[%s12690_s15 + $0x8] sm:$0xff] }
0x19a5   :  { %10377 = vmatprep.subr.bf16.mxu0 %v10376_v29 }
0x19a8   :  { %10379 = vmatpush3.bf16.msra.mxu0 %v10376_v29 }
0x1a6e   :  { %v9706_v32 = vpop.f32.mrb[48].mxu0 }
0x1a6f   :  { %v7112_v33 = vadd.f32 %v10737_v42, %v9706_v32  ;;  %v7106_v39 = vpop.f32.mrb[49].mxu0 }
0x1a70   :  { %v7107_v34 = vadd.f32 %v10737_v42, %v7106_v39 }
0x1a71   :  { %v7116_v35 = vmul.f32 0.999995, %v7112_v33 }
0x1a72   :  { %v7115_v36 = vmul.f32 0.999995, %v7107_v34 }
0x1a74   :  { %10698 = vtanh.f32 %v7115_v36 }
0x1a75   :  { %10700 = vtanh.f32 %v7116_v35 }
0x1a7e   :  { %v12471_v37 = vpop.eup %10698 }
0x1a7f   :  { %v12473_v12 = vpop.eup %10700  ;;  %9723 = vmatprep.mubr.msk.f32.mxu0 %vm825_vm7, %v12471_v37 }
0x1a80   :  { %9724 = vmatmul.mubr.msk.f32.vlgmr.msra.gmra.mrb[50].mxu0 %vm825_vm7, %v12473_v12 }
0x1a81   :  { %9730 = vmatprep.mubr.msk.f32.mxu0 %vm229_vm1, %v7127_v46 }
0x1b53   :  { %v9725_v47 = vpop.f32.mrb[50].mxu0 }
0x1b54   :  { %v7202_v15 = vpop.f32.mrb[51].mxu0 }
0x1b55   :  { %v10380_v17 = vpack.c.bf16 %v9725_v47, %v7202_v15  ;;  %v8328_v47 = vld [vmem:[%s12687_s12 + $0x20] sm:$0xff] }
0x1b57   :  { %10381 = vmatprep.subr.bf16.mxu0 %v10380_v17 }
0x1b58   :  { %10383 = vmatpush3.bf16.msra.mxu0 %v10380_v17 }
0x1b59   :  { %10385 = vmatprep.subr.bf16.mxu0 %v10384_v38 }
0x1b5b   :  { %9731 = vmatmul.mubr.msk.f32.vlgmr.msra.gmra.mrb[52].mxu0 %vm229_vm1, %v7128_v31 }
0x1b5c   :  { %10387 = vmatpush3.bf16.msra.mxu0 %v10384_v38  ;;  %v8337_v38 = vld [vmem:[%s12686_s11 + $0xd0] sm:$0xff] }
0x1b5d   :  { %10389 = vmatprep.subr.bf16.mxu0 %v10388_v52  ;;  %v10428_v40 = vpack.c.bf16 %v8338_v13, %v8337_v38 }
0x1b60   :  { %10391 = vmatpush3.bf16.msra.mxu0 %v10388_v52  ;;  %v8339_v52 = vld [vmem:[%s12686_s11 + $0xe0] sm:$0xff] }
0x1b61   :  { %10393 = vmatprep.subr.bf16.mxu0 %v10392_v61  ;;  %v10432_v59 = vpack.c.bf16 %v8340_v57, %v8339_v52 }
0x1b64   :  { %10395 = vmatpush3.bf16.msra.mxu0 %v10392_v61  ;;  %v8341_v61 = vld [vmem:[%s12686_s11 + $0xf0] sm:$0xff] }
0x1b65   :  { %10397 = vmatprep.subr.bf16.mxu0 %v10396_v60  ;;  %v10436_v2 = vpack.c.bf16 %v8342_v16, %v8341_v61 }
0x1b68   :  { %10399 = vmatpush3.bf16.msra.mxu0 %v10396_v60  ;;  %v8332_v60 = vld [vmem:[#allocation15 + $0x2] ss:$0 sm:$0xff] }
0x1b69   :  { %10405 = vmatprep.subr.bf16.mxu0 %v10404_v58 }
0x1c2e   :  { %v9732_v3 = vpop.f32.mrb[52].mxu0 }
0x1c2f   :  { %v7295_v49 = vadd.f32 %v9732_v3, %v8302_v8  ;;  %v7289_v62 = vpop.f32.mrb[53].mxu0 }
0x1c30   :  { %v7290_v25 = vadd.f32 %v8302_v8, %v7289_v62 }
0x1c31   :  { %v7299_v7 = vmul.f32 0.999995, %v7295_v49 }
0x1c32   :  { %v7298_v5 = vmul.f32 0.999995, %v7290_v25 }
0x1c34   :  { %10702 = vtanh.f32 %v7298_v5 }
0x1c35   :  { %10704 = vtanh.f32 %v7299_v7 }
0x1c3e   :  { %v10703_v63 = vpop.eup %10702 }
0x1c3f   :  { %v10705_v27 = vpop.eup %10704  ;;  %9749 = vmatprep.mubr.msk.f32.mxu0 %vm825_vm7, %v10703_v63 }
0x1c40   :  { %9750 = vmatmul.mubr.msk.f32.vlgmr.msra.gmra.mrb[54].mxu0 %vm825_vm7, %v10705_v27  ;;  %v10738_v27 = vld [vmem:[%s12690_s15] sm:$0xff] }
0x1c41   :  { %10407 = vmatpush3.bf16.msra.mxu0 %v10404_v58 }
0x1c42   :  { %10409 = vmatprep.subr.bf16.mxu0 %v10408_v30 }
0x1c45   :  { %10411 = vmatpush3.bf16.msra.mxu0 %v10408_v30 }
0x1c46   :  { %10413 = vmatprep.subr.bf16.mxu0 %v10412_v11 }
0x1c49   :  { %10415 = vmatpush3.bf16.msra.mxu0 %v10412_v11 }
0x1c4a   :  { %10417 = vmatprep.subr.bf16.mxu0 %v10416_v41 }
0x1c4d   :  { %10419 = vmatpush3.bf16.msra.mxu0 %v10416_v41 }
0x1d13   :  { %v9751_v18 = vpop.f32.mrb[54].mxu0 }
0x1d14   :  { %v7385_v19 = vpop.f32.mrb[55].mxu0 }
0x1d15   :  { %v10400_v22 = vpack.c.bf16 %v9751_v18, %v7385_v19 }
0x1d17   :  { %10401 = vmatprep.subr.bf16.mxu1 %v10400_v22 }
0x1d18   :  { %10403 = vmatpush3.bf16.msra.mxu1 %v10400_v22 }
0x1d1b   :  { %9757 = vmatmul.mubr.msk.f32.vlgmr.msra.gmra.mrb[32].mxu1 %vm229_vm1, %v8314_v21  ;;  %v8344_v21 = vld [vmem:[%s12687_s12 + $0x38] sm:$0xff] }
0x1d1c   :  { %9782 = vmatprep.mubr.msk.f32.mxu1 %vm229_vm1, %v8328_v47 }
0x1dee   :  { %v9758_v4 = vpop.f32.mrb[32].mxu1 }
0x1def   :  { %v7478_v29 = vadd.f32 %v9758_v4, %v8317_v9  ;;  %v7472_v32 = vpop.f32.mrb[33].mxu1 }
0x1df0   :  { %v7473_v42 = vadd.f32 %v8317_v9, %v7472_v32  ;;  %v10740_v9 = vld [vmem:[%s12691_s16] ss:$0 sm:$0xff] }
0x1df1   :  { %v7482_v33 = vmul.f32 0.999995, %v7478_v29 }
0x1df2   :  { %v7481_v39 = vmul.f32 0.999995, %v7473_v42 }
0x1df3   :  { %10706 = vtanh.f32 %v7482_v33 }
0x1df4   :  { %10708 = vtanh.f32 %v7481_v39  ;;  %v10741_v39 = vld [vmem:[%s12682_s7] sm:$0xff] }
0x1dfd   :  { %v10707_v34 = vpop.eup %10706 }
0x1dfe   :  { %v10709_v35 = vpop.eup %10708  ;;  %v12549_v46 = vadd.f32 %v10707_v34, %v12473_v12  ;;  %v8335_v12 = vld [vmem:[%s12686_s11 + $0xc0] sm:$0xff]  ;;  %v10742_v34 = vld [vmem:[%s12682_s7 + $0x8] sm:$0xff] }
0x1dff   :  { %v12546_v36 = vadd.f32 %v10709_v35, %v12471_v37  ;;  %v8329_v37 = vld [vmem:[%s12687_s12 + $0x28] sm:$0xff]  ;;  %v10424_v54 = vpack.c.bf16 %v8336_v51, %v8335_v12 }
0x1e01   :  { %9775 = vmatprep.mubr.msk.f32.mxu0 %vm825_vm7, %v12546_v36 }
0x1e02   :  { %9776 = vmatmul.mubr.msk.f32.vlgmr.msra.gmra.mrb[56].mxu0 %vm825_vm7, %v12549_v46 }
0x1e03   :  { %9808 = vmatprep.mubr.msk.f32.mxu0 %vm229_vm1, %v8343_v14 }
0x1ed5   :  { %v9777_v15 = vpop.f32.mrb[56].mxu0 }
0x1ed6   :  { %v7570_v17 = vpop.f32.mrb[57].mxu0 }
0x1ed7   :  { %v10420_v31 = vpack.c.bf16 %v9777_v15, %v7570_v17 }
0x1ed9   :  { %10421 = vmatprep.subr.bf16.mxu1 %v10420_v31 }
0x1eda   :  { %10423 = vmatpush3.bf16.msra.mxu1 %v10420_v31 }
0x1edb   :  { %10425 = vmatprep.subr.bf16.mxu1 %v10424_v54 }
0x1edd   :  { %9783 = vmatmul.mubr.msk.f32.vlgmr.msra.gmra.mrb[34].mxu1 %vm229_vm1, %v8329_v37 }
0x1ede   :  { %10427 = vmatpush3.bf16.msra.mxu1 %v10424_v54 }
0x1edf   :  { %10429 = vmatprep.subr.bf16.mxu1 %v10428_v40 }
0x1ee2   :  { %10431 = vmatpush3.bf16.msra.mxu1 %v10428_v40 }
0x1ee3   :  { %10433 = vmatprep.subr.bf16.mxu1 %v10432_v59 }
0x1ee6   :  { %10435 = vmatpush3.bf16.msra.mxu1 %v10432_v59 }
0x1ee7   :  { %10437 = vmatprep.subr.bf16.mxu1 %v10436_v2 }
0x1eea   :  { %10439 = vmatpush3.bf16.msra.mxu1 %v10436_v2 }
0x1fb0   :  { %v9784_v8 = vpop.f32.mrb[34].mxu1 }
0x1fb1   :  { %v7663_v3 = vadd.f32 %v9784_v8, %v8332_v60  ;;  %v7657_v49 = vpop.f32.mrb[35].mxu1 }
0x1fb2   :  { %v7658_v62 = vadd.f32 %v8332_v60, %v7657_v49 }
0x1fb3   :  { %v7667_v25 = vmul.f32 0.999995, %v7663_v3 }
0x1fb4   :  { %v7666_v7 = vmul.f32 0.999995, %v7658_v62 }
0x1fb6   :  { %10710 = vtanh.f32 %v7666_v7 }
0x1fb7   :  { %10712 = vtanh.f32 %v7667_v25 }
0x1fc0   :  { %v10711_v5 = vpop.eup %10710 }
0x1fc1   :  { %v10713_v63 = vpop.eup %10712  ;;  %9801 = vmatprep.mubr.msk.f32.mxu1 %vm825_vm7, %v10711_v5 }
0x1fc2   :  { %9802 = vmatmul.mubr.msk.f32.vlgmr.msra.gmra.mrb[36].mxu1 %vm825_vm7, %v10713_v63 }
0x1fc3   :  { %9834 = vmatprep.mubr.msk.f32.mxu1 %vm229_vm1, %v10738_v27 }
0x2095   :  { %v9803_v18 = vpop.f32.mrb[36].mxu1 }
0x2096   :  { %v7753_v19 = vpop.f32.mrb[37].mxu1 }
0x2097   :  { %v10440_v22 = vpack.c.bf16 %v9803_v18, %v7753_v19 }
0x2099   :  { %10441 = vmatprep.subr.bf16.mxu0 %v10440_v22 }
0x209a   :  { %10443 = vmatpush3.bf16.msra.mxu0 %v10440_v22 }
0x209b   :  { %10445 = vmatprep.subr.bf16.mxu0 %v11868_v43 }
0x209d   :  { %9809 = vmatmul.mubr.msk.f32.vlgmr.msra.gmra.mrb[58].mxu0 %vm229_vm1, %v8344_v21 }
0x209e   :  { %10447 = vmatpush3.bf16.msra.mxu0 %v11868_v43 }
0x209f   :  { %10449 = vmatprep.subr.bf16.mxu0 %v11873_v45 }
0x20a2   :  { %10451 = vmatpush3.bf16.msra.mxu0 %v11873_v45 }
0x20a3   :  { %10453 = vmatprep.subr.bf16.mxu0 %v11884_v48 }
0x20a6   :  { %10455 = vmatpush3.bf16.msra.mxu0 %v11884_v48 }
0x20a7   :  { %10457 = vmatprep.subr.bf16.mxu0 %v11894_v53 }
0x20aa   :  { %10459 = vmatpush3.bf16.msra.mxu0 %v11894_v53 }
0x2170   :  { %v9810_v26 = vpop.f32.mrb[58].mxu0 }
0x2171   :  { %v7846_v50 = vadd.f32 %v9810_v26, %v8347_v23  ;;  %v7840_v58 = vpop.f32.mrb[59].mxu0 }
0x2172   :  { %v7841_v28 = vadd.f32 %v8347_v23, %v7840_v58 }
0x2173   :  { %v7850_v30 = vmul.f32 0.999995, %v7846_v50 }
0x2174   :  { %v7849_v56 = vmul.f32 0.999995, %v7841_v28 }
0x2175   :  { %10714 = vtanh.f32 %v7850_v30 }
0x2176   :  { %10716 = vtanh.f32 %v7849_v56 }
0x217f   :  { %v10715_v43 = vpop.eup %10714 }
0x2180   :  { %v10717_v55 = vpop.eup %10716  ;;  %v7854_v11 = vadd.f32 %v10715_v43, %v12549_v46 }
0x2181   :  { %v7853_v45 = vadd.f32 %v10717_v55, %v12546_v36 }
0x2183   :  { %9827 = vmatprep.mubr.msk.f32.mxu0 %vm825_vm7, %v7853_v45 }
0x2184   :  { %9828 = vmatmul.mubr.msk.f32.vlgmr.msra.gmra.mrb[60].mxu0 %vm825_vm7, %v7854_v11 }
0x2257   :  { %v9829_v48 = vpop.f32.mrb[60].mxu0 }
0x2258   :  { %v7927_v53 = vpop.f32.mrb[61].mxu0 }
0x2259   :  { %v10460_v6 = vpack.c.bf16 %v9829_v48, %v7927_v53 }
0x225b   :  { %10461 = vmatprep.subr.bf16.mxu1 %v10460_v6 }
0x225c   :  { %10463 = vmatpush3.bf16.msra.mxu1 %v10460_v6 }
0x225d   :  { %10464 = vmatprep.subr.bf16.mxu1 %v10967_v0 }
0x225f   :  { %9835 = vmatmul.mubr.msk.f32.vlgmr.msra.gmra.mrb[38].mxu1 %vm229_vm1, %v10739_v10 }
0x2260   :  { %9841 = vmatprep.mubr.msk.f32.mxu1 %vm12719_vm4, %v10969_v1 }
0x2332   :  { %v9836_v41 = vpop.f32.mrb[38].mxu1 }
0x2333   :  { %v8008_v4 = vadd.f32 %v10740_v9, %v9836_v41  ;;  %v8002_v29 = vpop.f32.mrb[39].mxu1 }
0x2334   :  { %v8003_v32 = vadd.f32 %v10740_v9, %v8002_v29 }
0x2335   :  { %v8012_v42 = vadd.f32 %v8008_v4, %v12438_v20  ;;  %v10745_v20 = vld [vmem:[%s12682_s7 + $0x20] sm:$0x7] }
0x2336   :  { %v8011_v0 = vadd.f32 %v8003_v32, %v12433_v44  ;;  %v10744_v44 = vld [vmem:[%s12682_s7 + $0x18] sm:$0xff] }
0x2338   :  { %v10465_v33 = vpack.c.bf16 %v8012_v42, %v8011_v0 }
0x233a   :  { %10467 = vmatpush3.bf16.xpose.msk.msra.mxu1 %vm12102_vm13, %v10465_v33 }
0x2341   :  { %9842 = vmatmul.mubr.msk.f32.vlgmr.msra.gmra.mrb[40].mxu1 %vm2871_vm15, %v10741_v39 }
0x2342   :  { %9844 = vmatprep.mubr.msk.f32.mxu1 %vm12719_vm4, %v10969_v1 }
0x2345   :  { %9845 = vmatmul.mubr.msk.f32.gmra.mrb[42].mxu1 %vm2871_vm15, %v10742_v34 }
0x2346   :  { %9847 = vmatprep.mubr.msk.f32.mxu1 %vm12719_vm4, %v10969_v1 }
0x2349   :  { %9848 = vmatmul.mubr.msk.f32.gmra.mrb[44].mxu1 %vm2871_vm15, %v10743_v24 }
0x234a   :  { %9850 = vmatprep.mubr.msk.f32.mxu1 %vm12719_vm4, %v10969_v1 }
0x234d   :  { %9851 = vmatmul.mubr.msk.f32.gmra.mrb[46].mxu1 %vm2871_vm15, %v10744_v44 }
0x234e   :  { %9853 = vmatprep.mubr.msk.f32.mxu1 %vm12719_vm4, %v10969_v1 }
0x2351   :  { %9854 = vmatmul.mubr.msk.f32.gmra.mrb[48].mxu1 %vm2871_vm15, %v10745_v20 }
0x2414   :  { %v8085_v35 = vpop.f32.mrb[40].mxu1 }
0x2415   :  { %8361 = vst.msk [vmem:[%s12692_s17 + $0x28] sm:$0xff] %vm229_vm1, %v8085_v35  ;;  %v9843_v36 = vpop.f32.mrb[41].mxu1 }
0x2418   :  { %v8090_v46 = vpop.f32.mrb[42].mxu1 }
0x2419   :  { %8362 = vst.msk [vmem:[%s12692_s17 + $0x30] sm:$0xff] %vm229_vm1, %v8090_v46  ;;  %v9846_v1 = vpop.f32.mrb[43].mxu1 }
0x241c   :  { %v8095_v47 = vpop.f32.mrb[44].mxu1 }
0x241d   :  { %8363 = vst.msk [vmem:[%s12692_s17 + $0x38] sm:$0xff] %vm229_vm1, %v8095_v47  ;;  %v9849_v15 = vpop.f32.mrb[45].mxu1 }
0x2420   :  { %v8100_v17 = vpop.f32.mrb[46].mxu1 }
0x2421   :  { %8364 = vst.msk [vmem:[%s12692_s17 + $0x40] sm:$0xff] %vm229_vm1, %v8100_v17  ;;  %v9852_v31 = vpop.f32.mrb[47].mxu1 }
0x2424   :  { %v8105_v37 = vpop.f32.mrb[48].mxu1 }
0x2425   :  { %8365 = vst.msk [vmem:[%s12692_s17 + $0x48] sm:$0x7] %vm4204_vm0, %v8105_v37  ;;  %v9855_v12 = vpop.f32.mrb[49].mxu1 }
0x2426   :  { %8119 = vsyncpa [#allocation3], 1 }
0x2427   :  { %8120 = vsyncpa [#allocation5], 1 }
0x2428   :  { %8121 = vsyncpa [#allocation8], 1 }
0x2429   :  { %8122 = vsyncpa [#allocation11], 1 }
0x242a   :  { %8123 = vsyncpa [#allocation14], 1 }

</bundles_post_ra>
